<compile_context>
chip_gen: v7x
topology: tpu7x:2x2x1
jax: 0.10.0
libtpu: 0.0.40
codegen_flags: <defaults>
</compile_context>

<pallas_src>
import functools

import jax
import jax.numpy as jnp
from jax.experimental import pallas as pl
from jax.experimental.pallas import tpu as pltpu

LANE = 128  # pad output channels / classes to this for lane-dense stores


def _round_up(x, m):
    return ((x + m - 1) // m) * m


# ----------------------------- Pallas kernels ------------------------------

def _make_conv_relu_pool_kernel(wp, tm, tme, cin):
    """Fused 3x3 conv (stride 1, valid) + bias + ReLU + 2x2 max, on flat slabs.

    x_ref : (4, x_rows, cin) bf16.  Slab s holds x[n, h, w+s, :] at flat row
            (n*H + h)*wp + w  (wp = row pitch, multiple of 16; zero padded).
    w_ref : (9*cin, ocp) bf16, rows ordered (kh, kw, c).
    b_ref : (1, ocp) f32.
    o_ref : (tm, ocp) bf16.  Row r = max over the 2x2 window anchored at the
            (h, w) position of flat row  program_id*tm + r.
    """

    def kernel(x_ref, w_ref, b_ref, o_ref, acc0_ref, acc1_ref):
        base = pl.multiple_of(pl.program_id(0) * tm, 16)
        for dh in range(3):
            start = pl.multiple_of(base + dh * wp, 16)  # 16-aligned dyn start
            for dw in range(3):
                k = 3 * dh + dw
                rhs = w_ref[k * cin:(k + 1) * cin, :]            # (cin, ocp)
                lhs0 = x_ref[dw, pl.ds(start, tme), :]           # col w
                lhs1 = x_ref[dw + 1, pl.ds(start, tme), :]       # col w + 1
                d0 = jnp.dot(lhs0, rhs, preferred_element_type=jnp.float32)
                d1 = jnp.dot(lhs1, rhs, preferred_element_type=jnp.float32)
                if k == 0:
                    acc0_ref[...] = d0
                    acc1_ref[...] = d1
                else:
                    acc0_ref[...] += d0
                    acc1_ref[...] += d1
        # relu(max(.) + bias) == max(relu(. + bias)) for per-channel bias, so
        # do the cheap maxes first and a single bias-add + ReLU afterwards.
        m = jnp.maximum(acc0_ref[...], acc1_ref[...])            # (tme, ocp)
        p = jnp.maximum(m[0:tm], m[wp:wp + tm])                  # (tm, ocp)
        o_ref[...] = jnp.maximum(p + b_ref[...], 0.0).astype(o_ref.dtype)

    return kernel


def _linear_kernel(x_ref, w_ref, b_ref, o_ref):
    acc = jnp.dot(x_ref[...], w_ref[...], preferred_element_type=jnp.float32)
    o_ref[...] = (acc + b_ref[...]).astype(o_ref.dtype)


# ----------------------------- Pallas wrappers ------------------------------

def conv3x3_relu_pool(x, w_prep, b_prep, *, tm=128):
    """Fused DConv2d(3x3, valid) + ReLU + MaxPool2d(2,2) on NHWC input.

    x      : (N, H, W, C) with C equal to the (padded) cin used in w_prep.
    w_prep : (9*C, OCP) bf16, b_prep: (1, OCP) f32.
    Returns (N, (H-2)//2, (W-2)//2, OCP) bf16.
    """
    N, H, W, C = x.shape
    assert w_prep.shape[0] == 9 * C
    assert tm % 16 == 0
    OH, OW = H - 2, W - 2
    PH, PW = OH // 2, OW // 2
    OCP = w_prep.shape[1]

    Wp = _round_up(W, 16)                # bf16 sublane-pack-aligned row pitch
    M = N * H * Wp                       # flat rows of the full (padded) grid
    Mp = _round_up(M, tm)
    grid = Mp // tm
    tme = tm + Wp                        # rows of conv output needed per tile
    x_rows = Mp + 3 * Wp                 # covers max in-kernel read, exclusive

    # Four column-shifted bf16 slabs of the (small) input:
    # slab[s, (n*H+h)*Wp + w, c] = x[n, h, w+s, c] (zero outside the image).
    xw = jnp.pad(x.astype(jnp.bfloat16),
                 ((0, 0), (0, 0), (0, Wp + 3 - W), (0, 0)))
    slabs = jnp.stack([xw[:, :, s:s + Wp, :].reshape(M, C) for s in range(4)],
                      axis=0)                                   # (4, M, C)
    slabs = jnp.pad(slabs, ((0, 0), (0, x_rows - M), (0, 0)))   # (4, x_rows, C)

    out = pl.pallas_call(
        _make_conv_relu_pool_kernel(Wp, tm, tme, C),
        out_shape=jax.ShapeDtypeStruct((Mp, OCP), jnp.bfloat16),
        grid=(grid,),
        in_specs=[
            pl.BlockSpec((4, x_rows, C), lambda i: (0, 0, 0)),
            pl.BlockSpec((9 * C, OCP), lambda i: (0, 0)),
            pl.BlockSpec((1, OCP), lambda i: (0, 0)),
        ],
        out_specs=pl.BlockSpec((tm, OCP), lambda i: (i, 0)),
        scratch_shapes=[pltpu.VMEM((tme, OCP), jnp.float32),
                        pltpu.VMEM((tme, OCP), jnp.float32)],
        compiler_params=pltpu.CompilerParams(
            dimension_semantics=("parallel",)),
    )(slabs, w_prep, b_prep)

    # Keep only the valid pooled anchors (even h < 2*PH, even w < 2*PW).
    pooled = out[:M].reshape(N, H, Wp, OCP)[:, 0:2 * PH:2, 0:2 * PW:2, :]
    return pooled


def pallas_linear(x, w, b):
    """(M, K) @ (K, NP) + (1, NP); NP lane-dense, M padded to 8 sublanes."""
    M, K = x.shape
    Kw, NP = w.shape
    assert K == Kw
    Mp = _round_up(max(M, 1), 8)
    if Mp != M:
        x = jnp.pad(x, ((0, Mp - M), (0, 0)))
    out = pl.pallas_call(
        _linear_kernel,
        out_shape=jax.ShapeDtypeStruct((Mp, NP), jnp.float32),
        grid=(1,),
        in_specs=[
            pl.BlockSpec((Mp, K), lambda i: (0, 0)),
            pl.BlockSpec((K, NP), lambda i: (0, 0)),
            pl.BlockSpec((1, NP), lambda i: (0, 0)),
        ],
        out_specs=pl.BlockSpec((Mp, NP), lambda i: (0, 0)),
    )(x, w, b)
    return out[:M]


# ------------------------------- JAX glue -----------------------------------

def adaptive_avg_pool2d_nhwc(x, out_h, out_w):
    """nn.AdaptiveAvgPool2d semantics on NHWC. Identity on the hot path."""
    N, H, W, C = x.shape
    if (H, W) == (out_h, out_w):
        return x  # identity for this model (feature map is already 7x7)
    # TODO(synk): general (non-identity) adaptive pool kept as XLA glue; it is
    # off the hot path for this model.
    rows = []
    for i in range(out_h):
        hs, he = (i * H) // out_h, -(-((i + 1) * H) // out_h)
        cols = []
        for j in range(out_w):
            ws, we = (j * W) // out_w, -(-((j + 1) * W) // out_w)
            cols.append(jnp.mean(x[:, hs:he, ws:we, :], axis=(1, 2)))
        rows.append(jnp.stack(cols, axis=1))
    return jnp.stack(rows, axis=1)


# ------------------------------- Parameters ---------------------------------

def init_params(key, in_channels, n_class):
    """PyTorch-layout parameters (OIHW conv weights, (out, in) linear weight)."""
    k1, k2, k3, k4, k5, k6 = jax.random.split(key, 6)
    w1 = jax.random.normal(k1, (40, in_channels, 3, 3), jnp.float32) * 0.1
    b1 = jax.random.normal(k2, (40,), jnp.float32) * 0.01
    w2 = jax.random.normal(k3, (80, 40, 3, 3), jnp.float32) * 0.05
    b2 = jax.random.normal(k4, (80,), jnp.float32) * 0.01
    wl = jax.random.normal(k5, (n_class, 7 * 7 * 80), jnp.float32) * 0.02
    bl = jax.random.normal(k6, (n_class,), jnp.float32) * 0.01
    return dict(w1=w1, b1=b1, w2=w2, b2=b2, wl=wl, bl=bl)


def _prep_conv(w, b, cin_pad, oc_pad):
    OC, Cin, KH, KW = w.shape
    wt = jnp.transpose(w, (2, 3, 1, 0))                      # (KH, KW, Cin, OC)
    wt = jnp.pad(wt, ((0, 0), (0, 0), (0, cin_pad - Cin), (0, oc_pad - OC)))
    wt = wt.reshape(KH * KW * cin_pad, oc_pad).astype(jnp.bfloat16)
    bt = jnp.pad(b, (0, oc_pad - OC)).reshape(1, oc_pad).astype(jnp.float32)
    return wt, bt


def prepare_params(params):
    """Rearrange torch-layout params into kernel-ready, lane-dense layouts."""
    in_channels = params["w1"].shape[1]
    n_class = params["wl"].shape[0]
    cin1 = _round_up(max(in_channels, 1), 16)
    w1p, b1p = _prep_conv(params["w1"], params["b1"], cin1, LANE)
    w2p, b2p = _prep_conv(params["w2"], params["b2"], LANE, LANE)
    # Linear: torch feature order is c*49 + h*7 + w (Flatten of NCHW); ours is
    # (h*7 + w)*128 + c (flatten of padded NHWC). Pad classes to 128 lanes.
    wl = params["wl"].reshape(n_class, 80, 7, 7)
    wl = jnp.transpose(wl, (2, 3, 1, 0))                     # (7, 7, 80, n_class)
    wl = jnp.pad(wl, ((0, 0), (0, 0), (0, LANE - 80), (0, LANE - n_class)))
    wl = wl.reshape(7 * 7 * LANE, LANE).astype(jnp.bfloat16)
    bl = jnp.pad(params["bl"], (0, LANE - n_class)).reshape(1, LANE)
    return dict(w1=w1p, b1=b1p, w2=w2p, b2=b2p,
                wl=wl, bl=bl.astype(jnp.float32))


# ------------------------------- Model ---------------------------------------

@functools.partial(jax.jit, static_argnames=("n_class",))
def dcnn_simple_forward(prepared, x, *, n_class):
    # x: (N, in_channels, H, W) float32 (NCHW, same as the PyTorch module)
    cin1 = prepared["w1"].shape[0] // 9                 # padded conv1 in-channels
    x = jnp.transpose(x, (0, 2, 3, 1))                  # NHWC once at the boundary
    x = jnp.pad(x, ((0, 0), (0, 0), (0, 0), (0, cin1 - x.shape[-1])))
    y = conv3x3_relu_pool(x, prepared["w1"], prepared["b1"])   # (N, 17, 17, 128)
    y = conv3x3_relu_pool(y, prepared["w2"], prepared["b2"])   # (N, 7, 7, 128)
    y = adaptive_avg_pool2d_nhwc(y, 7, 7)                      # identity here
    y = y.reshape(y.shape[0], -1)                              # (N, 7*7*128) bf16
    logits = pallas_linear(y, prepared["wl"], prepared["bl"])  # (N, 128) f32
    return logits[:, :n_class]


if __name__ == "__main__":
    in_channels, n_class = 3, 10
    key = jax.random.PRNGKey(0)
    kx, kp = jax.random.split(key)
    # 36x36 input: 36 -conv3-> 34 -pool-> 17 -conv3-> 15 -pool-> 7 -adapt-> 7
    x = jax.random.normal(kx, (2, in_channels, 36, 36), jnp.float32)
    params = init_params(kp, in_channels, n_class)
    prepared = prepare_params(params)

    logits = dcnn_simple_forward(prepared, x, n_class=n_class)
    logits = jax.block_until_ready(logits)
    assert logits.shape == (2, n_class), logits.shape
    assert bool(jnp.all(jnp.isfinite(logits)))
    print("KERNEL_OK")
</pallas_src>

<mosaic_0001>
module attributes {stable_mosaic.version = 11 : i64} {
  func.func @kernel(%arg0: i32, %arg1: memref<4x3600x16xbf16, #tpu.memory_space<vmem>>, %arg2: memref<144x128xbf16, #tpu.memory_space<vmem>>, %arg3: memref<1x128xf32, #tpu.memory_space<vmem>>, %arg4: memref<128x128xbf16, #tpu.memory_space<vmem>>, %arg5: memref<176x128xf32, #tpu.memory_space<vmem>>, %arg6: memref<176x128xf32, #tpu.memory_space<vmem>>) attributes {dimension_semantics = [#tpu.dimension_semantics<parallel>], iteration_bounds = array<i64: 27>, scalar_prefetch = 0 : i64, scratch_operands = 2 : i64, tpu.core_type = #tpu.core_type<tc>, window_params = [{pipeline_mode = #tpu.pipeline_mode<synchronous>, transform_indices = @transform_0, window_bounds = array<i64: 4, 3600, 16>}, {pipeline_mode = #tpu.pipeline_mode<synchronous>, transform_indices = @transform_1, window_bounds = array<i64: 144, 128>}, {pipeline_mode = #tpu.pipeline_mode<synchronous>, transform_indices = @transform_2, window_bounds = array<i64: 1, 128>}, {transform_indices = @transform_3, window_bounds = array<i64: 128, 128>}]} {
    %c128_i32 = arith.constant 128 : i32
    %0 = arith.muli %arg0, %c128_i32 : i32
    %1 = tpu.assume_multiple %0, 16 : i32
    %c0_i32 = arith.constant 0 : i32
    %2 = arith.addi %1, %c0_i32 : i32
    %3 = tpu.assume_multiple %2, 16 : i32
    %c0 = arith.constant 0 : index
    %c0_0 = arith.constant 0 : index
    %4 = vector.load %arg2[%c0, %c0_0] : memref<144x128xbf16, #tpu.memory_space<vmem>>, vector<16x128xbf16>
    %c0_1 = arith.constant 0 : index
    %5 = arith.index_cast %3 : i32 to index
    %c0_2 = arith.constant 0 : index
    %6 = vector.load %arg1[%c0_1, %5, %c0_2] : memref<4x3600x16xbf16, #tpu.memory_space<vmem>>, vector<1x176x16xbf16>
    %7 = vector.shape_cast %6 : vector<1x176x16xbf16> to vector<176x16xbf16>
    %c1 = arith.constant 1 : index
    %8 = arith.index_cast %3 : i32 to index
    %c0_3 = arith.constant 0 : index
    %9 = vector.load %arg1[%c1, %8, %c0_3] : memref<4x3600x16xbf16, #tpu.memory_space<vmem>>, vector<1x176x16xbf16>
    %10 = vector.shape_cast %9 : vector<1x176x16xbf16> to vector<176x16xbf16>
    %cst = arith.constant dense<0.000000e+00> : vector<176x128xf32>
    %11 = tpu.matmul %7, %4, %cst {dimension_numbers = #tpu.dot_dimension_numbers<[1], [0], [0], [1], [0, 0, 1, 1], [], []>} : vector<176x16xbf16>, vector<16x128xbf16>, vector<176x128xf32> -> vector<176x128xf32>
    %cst_4 = arith.constant dense<0.000000e+00> : vector<176x128xf32>
    %12 = tpu.matmul %10, %4, %cst_4 {dimension_numbers = #tpu.dot_dimension_numbers<[1], [0], [0], [1], [0, 0, 1, 1], [], []>} : vector<176x16xbf16>, vector<16x128xbf16>, vector<176x128xf32> -> vector<176x128xf32>
    %c0_5 = arith.constant 0 : index
    %c0_6 = arith.constant 0 : index
    %13 = vector.load %arg5[%c0_5, %c0_6] : memref<176x128xf32, #tpu.memory_space<vmem>>, vector<176x128xf32>
    tpu.vector_store %arg5[%c0_5, %c0_6], %11 {strides = array<i32>} : memref<176x128xf32, #tpu.memory_space<vmem>>, vector<176x128xf32>,
    %c0_7 = arith.constant 0 : index
    %c0_8 = arith.constant 0 : index
    %14 = vector.load %arg6[%c0_7, %c0_8] : memref<176x128xf32, #tpu.memory_space<vmem>>, vector<176x128xf32>
    tpu.vector_store %arg6[%c0_7, %c0_8], %12 {strides = array<i32>} : memref<176x128xf32, #tpu.memory_space<vmem>>, vector<176x128xf32>,
    %c16 = arith.constant 16 : index
    %c0_9 = arith.constant 0 : index
    %15 = vector.load %arg2[%c16, %c0_9] : memref<144x128xbf16, #tpu.memory_space<vmem>>, vector<16x128xbf16>
    %c1_10 = arith.constant 1 : index
    %16 = arith.index_cast %3 : i32 to index
    %c0_11 = arith.constant 0 : index
    %17 = vector.load %arg1[%c1_10, %16, %c0_11] : memref<4x3600x16xbf16, #tpu.memory_space<vmem>>, vector<1x176x16xbf16>
    %18 = vector.shape_cast %17 : vector<1x176x16xbf16> to vector<176x16xbf16>
    %c2 = arith.constant 2 : index
    %19 = arith.index_cast %3 : i32 to index
    %c0_12 = arith.constant 0 : index
    %20 = vector.load %arg1[%c2, %19, %c0_12] : memref<4x3600x16xbf16, #tpu.memory_space<vmem>>, vector<1x176x16xbf16>
    %21 = vector.shape_cast %20 : vector<1x176x16xbf16> to vector<176x16xbf16>
    %cst_13 = arith.constant dense<0.000000e+00> : vector<176x128xf32>
    %22 = tpu.matmul %18, %15, %cst_13 {dimension_numbers = #tpu.dot_dimension_numbers<[1], [0], [0], [1], [0, 0, 1, 1], [], []>} : vector<176x16xbf16>, vector<16x128xbf16>, vector<176x128xf32> -> vector<176x128xf32>
    %cst_14 = arith.constant dense<0.000000e+00> : vector<176x128xf32>
    %23 = tpu.matmul %21, %15, %cst_14 {dimension_numbers = #tpu.dot_dimension_numbers<[1], [0], [0], [1], [0, 0, 1, 1], [], []>} : vector<176x16xbf16>, vector<16x128xbf16>, vector<176x128xf32> -> vector<176x128xf32>
    %c0_15 = arith.constant 0 : index
    %c0_16 = arith.constant 0 : index
    %24 = vector.load %arg5[%c0_15, %c0_16] : memref<176x128xf32, #tpu.memory_space<vmem>>, vector<176x128xf32>
    %25 = arith.addf %24, %22 : vector<176x128xf32>
    %c0_17 = arith.constant 0 : index
    %c0_18 = arith.constant 0 : index
    %26 = vector.load %arg5[%c0_17, %c0_18] : memref<176x128xf32, #tpu.memory_space<vmem>>, vector<176x128xf32>
    tpu.vector_store %arg5[%c0_17, %c0_18], %25 {strides = array<i32>} : memref<176x128xf32, #tpu.memory_space<vmem>>, vector<176x128xf32>,
    %c0_19 = arith.constant 0 : index
    %c0_20 = arith.constant 0 : index
    %27 = vector.load %arg6[%c0_19, %c0_20] : memref<176x128xf32, #tpu.memory_space<vmem>>, vector<176x128xf32>
    %28 = arith.addf %27, %23 : vector<176x128xf32>
    %c0_21 = arith.constant 0 : index
    %c0_22 = arith.constant 0 : index
    %29 = vector.load %arg6[%c0_21, %c0_22] : memref<176x128xf32, #tpu.memory_space<vmem>>, vector<176x128xf32>
    tpu.vector_store %arg6[%c0_21, %c0_22], %28 {strides = array<i32>} : memref<176x128xf32, #tpu.memory_space<vmem>>, vector<176x128xf32>,
    %c32 = arith.constant 32 : index
    %c0_23 = arith.constant 0 : index
    %30 = vector.load %arg2[%c32, %c0_23] : memref<144x128xbf16, #tpu.memory_space<vmem>>, vector<16x128xbf16>
    %c2_24 = arith.constant 2 : index
    %31 = arith.index_cast %3 : i32 to index
    %c0_25 = arith.constant 0 : index
    %32 = vector.load %arg1[%c2_24, %31, %c0_25] : memref<4x3600x16xbf16, #tpu.memory_space<vmem>>, vector<1x176x16xbf16>
    %33 = vector.shape_cast %32 : vector<1x176x16xbf16> to vector<176x16xbf16>
    %c3 = arith.constant 3 : index
    %34 = arith.index_cast %3 : i32 to index
    %c0_26 = arith.constant 0 : index
    %35 = vector.load %arg1[%c3, %34, %c0_26] : memref<4x3600x16xbf16, #tpu.memory_space<vmem>>, vector<1x176x16xbf16>
    %36 = vector.shape_cast %35 : vector<1x176x16xbf16> to vector<176x16xbf16>
    %cst_27 = arith.constant dense<0.000000e+00> : vector<176x128xf32>
    %37 = tpu.matmul %33, %30, %cst_27 {dimension_numbers = #tpu.dot_dimension_numbers<[1], [0], [0], [1], [0, 0, 1, 1], [], []>} : vector<176x16xbf16>, vector<16x128xbf16>, vector<176x128xf32> -> vector<176x128xf32>
    %cst_28 = arith.constant dense<0.000000e+00> : vector<176x128xf32>
    %38 = tpu.matmul %36, %30, %cst_28 {dimension_numbers = #tpu.dot_dimension_numbers<[1], [0], [0], [1], [0, 0, 1, 1], [], []>} : vector<176x16xbf16>, vector<16x128xbf16>, vector<176x128xf32> -> vector<176x128xf32>
    %c0_29 = arith.constant 0 : index
    %c0_30 = arith.constant 0 : index
    %39 = vector.load %arg5[%c0_29, %c0_30] : memref<176x128xf32, #tpu.memory_space<vmem>>, vector<176x128xf32>
    %40 = arith.addf %39, %37 : vector<176x128xf32>
    %c0_31 = arith.constant 0 : index
    %c0_32 = arith.constant 0 : index
    %41 = vector.load %arg5[%c0_31, %c0_32] : memref<176x128xf32, #tpu.memory_space<vmem>>, vector<176x128xf32>
    tpu.vector_store %arg5[%c0_31, %c0_32], %40 {strides = array<i32>} : memref<176x128xf32, #tpu.memory_space<vmem>>, vector<176x128xf32>,
    %c0_33 = arith.constant 0 : index
    %c0_34 = arith.constant 0 : index
    %42 = vector.load %arg6[%c0_33, %c0_34] : memref<176x128xf32, #tpu.memory_space<vmem>>, vector<176x128xf32>
    %43 = arith.addf %42, %38 : vector<176x128xf32>
    %c0_35 = arith.constant 0 : index
    %c0_36 = arith.constant 0 : index
    %44 = vector.load %arg6[%c0_35, %c0_36] : memref<176x128xf32, #tpu.memory_space<vmem>>, vector<176x128xf32>
    tpu.vector_store %arg6[%c0_35, %c0_36], %43 {strides = array<i32>} : memref<176x128xf32, #tpu.memory_space<vmem>>, vector<176x128xf32>,
    %c48_i32 = arith.constant 48 : i32
    %45 = arith.addi %1, %c48_i32 : i32
    %46 = tpu.assume_multiple %45, 16 : i32
    %c48 = arith.constant 48 : index
    %c0_37 = arith.constant 0 : index
    %47 = vector.load %arg2[%c48, %c0_37] : memref<144x128xbf16, #tpu.memory_space<vmem>>, vector<16x128xbf16>
    %c0_38 = arith.constant 0 : index
    %48 = arith.index_cast %46 : i32 to index
    %c0_39 = arith.constant 0 : index
    %49 = vector.load %arg1[%c0_38, %48, %c0_39] : memref<4x3600x16xbf16, #tpu.memory_space<vmem>>, vector<1x176x16xbf16>
    %50 = vector.shape_cast %49 : vector<1x176x16xbf16> to vector<176x16xbf16>
    %c1_40 = arith.constant 1 : index
    %51 = arith.index_cast %46 : i32 to index
    %c0_41 = arith.constant 0 : index
    %52 = vector.load %arg1[%c1_40, %51, %c0_41] : memref<4x3600x16xbf16, #tpu.memory_space<vmem>>, vector<1x176x16xbf16>
    %53 = vector.shape_cast %52 : vector<1x176x16xbf16> to vector<176x16xbf16>
    %cst_42 = arith.constant dense<0.000000e+00> : vector<176x128xf32>
    %54 = tpu.matmul %50, %47, %cst_42 {dimension_numbers = #tpu.dot_dimension_numbers<[1], [0], [0], [1], [0, 0, 1, 1], [], []>} : vector<176x16xbf16>, vector<16x128xbf16>, vector<176x128xf32> -> vector<176x128xf32>
    %cst_43 = arith.constant dense<0.000000e+00> : vector<176x128xf32>
    %55 = tpu.matmul %53, %47, %cst_43 {dimension_numbers = #tpu.dot_dimension_numbers<[1], [0], [0], [1], [0, 0, 1, 1], [], []>} : vector<176x16xbf16>, vector<16x128xbf16>, vector<176x128xf32> -> vector<176x128xf32>
    %c0_44 = arith.constant 0 : index
    %c0_45 = arith.constant 0 : index
    %56 = vector.load %arg5[%c0_44, %c0_45] : memref<176x128xf32, #tpu.memory_space<vmem>>, vector<176x128xf32>
    %57 = arith.addf %56, %54 : vector<176x128xf32>
    %c0_46 = arith.constant 0 : index
    %c0_47 = arith.constant 0 : index
    %58 = vector.load %arg5[%c0_46, %c0_47] : memref<176x128xf32, #tpu.memory_space<vmem>>, vector<176x128xf32>
    tpu.vector_store %arg5[%c0_46, %c0_47], %57 {strides = array<i32>} : memref<176x128xf32, #tpu.memory_space<vmem>>, vector<176x128xf32>,
    %c0_48 = arith.constant 0 : index
    %c0_49 = arith.constant 0 : index
    %59 = vector.load %arg6[%c0_48, %c0_49] : memref<176x128xf32, #tpu.memory_space<vmem>>, vector<176x128xf32>
    %60 = arith.addf %59, %55 : vector<176x128xf32>
    %c0_50 = arith.constant 0 : index
    %c0_51 = arith.constant 0 : index
    %61 = vector.load %arg6[%c0_50, %c0_51] : memref<176x128xf32, #tpu.memory_space<vmem>>, vector<176x128xf32>
    tpu.vector_store %arg6[%c0_50, %c0_51], %60 {strides = array<i32>} : memref<176x128xf32, #tpu.memory_space<vmem>>, vector<176x128xf32>,
    %c64 = arith.constant 64 : index
    %c0_52 = arith.constant 0 : index
    %62 = vector.load %arg2[%c64, %c0_52] : memref<144x128xbf16, #tpu.memory_space<vmem>>, vector<16x128xbf16>
    %c1_53 = arith.constant 1 : index
    %63 = arith.index_cast %46 : i32 to index
    %c0_54 = arith.constant 0 : index
    %64 = vector.load %arg1[%c1_53, %63, %c0_54] : memref<4x3600x16xbf16, #tpu.memory_space<vmem>>, vector<1x176x16xbf16>
    %65 = vector.shape_cast %64 : vector<1x176x16xbf16> to vector<176x16xbf16>
    %c2_55 = arith.constant 2 : index
    %66 = arith.index_cast %46 : i32 to index
    %c0_56 = arith.constant 0 : index
    %67 = vector.load %arg1[%c2_55, %66, %c0_56] : memref<4x3600x16xbf16, #tpu.memory_space<vmem>>, vector<1x176x16xbf16>
    %68 = vector.shape_cast %67 : vector<1x176x16xbf16> to vector<176x16xbf16>
    %cst_57 = arith.constant dense<0.000000e+00> : vector<176x128xf32>
    %69 = tpu.matmul %65, %62, %cst_57 {dimension_numbers = #tpu.dot_dimension_numbers<[1], [0], [0], [1], [0, 0, 1, 1], [], []>} : vector<176x16xbf16>, vector<16x128xbf16>, vector<176x128xf32> -> vector<176x128xf32>
    %cst_58 = arith.constant dense<0.000000e+00> : vector<176x128xf32>
    %70 = tpu.matmul %68, %62, %cst_58 {dimension_numbers = #tpu.dot_dimension_numbers<[1], [0], [0], [1], [0, 0, 1, 1], [], []>} : vector<176x16xbf16>, vector<16x128xbf16>, vector<176x128xf32> -> vector<176x128xf32>
    %c0_59 = arith.constant 0 : index
    %c0_60 = arith.constant 0 : index
    %71 = vector.load %arg5[%c0_59, %c0_60] : memref<176x128xf32, #tpu.memory_space<vmem>>, vector<176x128xf32>
    %72 = arith.addf %71, %69 : vector<176x128xf32>
    %c0_61 = arith.constant 0 : index
    %c0_62 = arith.constant 0 : index
    %73 = vector.load %arg5[%c0_61, %c0_62] : memref<176x128xf32, #tpu.memory_space<vmem>>, vector<176x128xf32>
    tpu.vector_store %arg5[%c0_61, %c0_62], %72 {strides = array<i32>} : memref<176x128xf32, #tpu.memory_space<vmem>>, vector<176x128xf32>,
    %c0_63 = arith.constant 0 : index
    %c0_64 = arith.constant 0 : index
    %74 = vector.load %arg6[%c0_63, %c0_64] : memref<176x128xf32, #tpu.memory_space<vmem>>, vector<176x128xf32>
    %75 = arith.addf %74, %70 : vector<176x128xf32>
    %c0_65 = arith.constant 0 : index
    %c0_66 = arith.constant 0 : index
    %76 = vector.load %arg6[%c0_65, %c0_66] : memref<176x128xf32, #tpu.memory_space<vmem>>, vector<176x128xf32>
    tpu.vector_store %arg6[%c0_65, %c0_66], %75 {strides = array<i32>} : memref<176x128xf32, #tpu.memory_space<vmem>>, vector<176x128xf32>,
    %c80 = arith.constant 80 : index
    %c0_67 = arith.constant 0 : index
    %77 = vector.load %arg2[%c80, %c0_67] : memref<144x128xbf16, #tpu.memory_space<vmem>>, vector<16x128xbf16>
    %c2_68 = arith.constant 2 : index
    %78 = arith.index_cast %46 : i32 to index
    %c0_69 = arith.constant 0 : index
    %79 = vector.load %arg1[%c2_68, %78, %c0_69] : memref<4x3600x16xbf16, #tpu.memory_space<vmem>>, vector<1x176x16xbf16>
    %80 = vector.shape_cast %79 : vector<1x176x16xbf16> to vector<176x16xbf16>
    %c3_70 = arith.constant 3 : index
    %81 = arith.index_cast %46 : i32 to index
    %c0_71 = arith.constant 0 : index
    %82 = vector.load %arg1[%c3_70, %81, %c0_71] : memref<4x3600x16xbf16, #tpu.memory_space<vmem>>, vector<1x176x16xbf16>
    %83 = vector.shape_cast %82 : vector<1x176x16xbf16> to vector<176x16xbf16>
    %cst_72 = arith.constant dense<0.000000e+00> : vector<176x128xf32>
    %84 = tpu.matmul %80, %77, %cst_72 {dimension_numbers = #tpu.dot_dimension_numbers<[1], [0], [0], [1], [0, 0, 1, 1], [], []>} : vector<176x16xbf16>, vector<16x128xbf16>, vector<176x128xf32> -> vector<176x128xf32>
    %cst_73 = arith.constant dense<0.000000e+00> : vector<176x128xf32>
    %85 = tpu.matmul %83, %77, %cst_73 {dimension_numbers = #tpu.dot_dimension_numbers<[1], [0], [0], [1], [0, 0, 1, 1], [], []>} : vector<176x16xbf16>, vector<16x128xbf16>, vector<176x128xf32> -> vector<176x128xf32>
    %c0_74 = arith.constant 0 : index
    %c0_75 = arith.constant 0 : index
    %86 = vector.load %arg5[%c0_74, %c0_75] : memref<176x128xf32, #tpu.memory_space<vmem>>, vector<176x128xf32>
    %87 = arith.addf %86, %84 : vector<176x128xf32>
    %c0_76 = arith.constant 0 : index
    %c0_77 = arith.constant 0 : index
    %88 = vector.load %arg5[%c0_76, %c0_77] : memref<176x128xf32, #tpu.memory_space<vmem>>, vector<176x128xf32>
    tpu.vector_store %arg5[%c0_76, %c0_77], %87 {strides = array<i32>} : memref<176x128xf32, #tpu.memory_space<vmem>>, vector<176x128xf32>,
    %c0_78 = arith.constant 0 : index
    %c0_79 = arith.constant 0 : index
    %89 = vector.load %arg6[%c0_78, %c0_79] : memref<176x128xf32, #tpu.memory_space<vmem>>, vector<176x128xf32>
    %90 = arith.addf %89, %85 : vector<176x128xf32>
    %c0_80 = arith.constant 0 : index
    %c0_81 = arith.constant 0 : index
    %91 = vector.load %arg6[%c0_80, %c0_81] : memref<176x128xf32, #tpu.memory_space<vmem>>, vector<176x128xf32>
    tpu.vector_store %arg6[%c0_80, %c0_81], %90 {strides = array<i32>} : memref<176x128xf32, #tpu.memory_space<vmem>>, vector<176x128xf32>,
    %c96_i32 = arith.constant 96 : i32
    %92 = arith.addi %1, %c96_i32 : i32
    %93 = tpu.assume_multiple %92, 16 : i32
    %c96 = arith.constant 96 : index
    %c0_82 = arith.constant 0 : index
    %94 = vector.load %arg2[%c96, %c0_82] : memref<144x128xbf16, #tpu.memory_space<vmem>>, vector<16x128xbf16>
    %c0_83 = arith.constant 0 : index
    %95 = arith.index_cast %93 : i32 to index
    %c0_84 = arith.constant 0 : index
    %96 = vector.load %arg1[%c0_83, %95, %c0_84] : memref<4x3600x16xbf16, #tpu.memory_space<vmem>>, vector<1x176x16xbf16>
    %97 = vector.shape_cast %96 : vector<1x176x16xbf16> to vector<176x16xbf16>
    %c1_85 = arith.constant 1 : index
    %98 = arith.index_cast %93 : i32 to index
    %c0_86 = arith.constant 0 : index
    %99 = vector.load %arg1[%c1_85, %98, %c0_86] : memref<4x3600x16xbf16, #tpu.memory_space<vmem>>, vector<1x176x16xbf16>
    %100 = vector.shape_cast %99 : vector<1x176x16xbf16> to vector<176x16xbf16>
    %cst_87 = arith.constant dense<0.000000e+00> : vector<176x128xf32>
    %101 = tpu.matmul %97, %94, %cst_87 {dimension_numbers = #tpu.dot_dimension_numbers<[1], [0], [0], [1], [0, 0, 1, 1], [], []>} : vector<176x16xbf16>, vector<16x128xbf16>, vector<176x128xf32> -> vector<176x128xf32>
    %cst_88 = arith.constant dense<0.000000e+00> : vector<176x128xf32>
    %102 = tpu.matmul %100, %94, %cst_88 {dimension_numbers = #tpu.dot_dimension_numbers<[1], [0], [0], [1], [0, 0, 1, 1], [], []>} : vector<176x16xbf16>, vector<16x128xbf16>, vector<176x128xf32> -> vector<176x128xf32>
    %c0_89 = arith.constant 0 : index
    %c0_90 = arith.constant 0 : index
    %103 = vector.load %arg5[%c0_89, %c0_90] : memref<176x128xf32, #tpu.memory_space<vmem>>, vector<176x128xf32>
    %104 = arith.addf %103, %101 : vector<176x128xf32>
    %c0_91 = arith.constant 0 : index
    %c0_92 = arith.constant 0 : index
    %105 = vector.load %arg5[%c0_91, %c0_92] : memref<176x128xf32, #tpu.memory_space<vmem>>, vector<176x128xf32>
    tpu.vector_store %arg5[%c0_91, %c0_92], %104 {strides = array<i32>} : memref<176x128xf32, #tpu.memory_space<vmem>>, vector<176x128xf32>,
    %c0_93 = arith.constant 0 : index
    %c0_94 = arith.constant 0 : index
    %106 = vector.load %arg6[%c0_93, %c0_94] : memref<176x128xf32, #tpu.memory_space<vmem>>, vector<176x128xf32>
    %107 = arith.addf %106, %102 : vector<176x128xf32>
    %c0_95 = arith.constant 0 : index
    %c0_96 = arith.constant 0 : index
    %108 = vector.load %arg6[%c0_95, %c0_96] : memref<176x128xf32, #tpu.memory_space<vmem>>, vector<176x128xf32>
    tpu.vector_store %arg6[%c0_95, %c0_96], %107 {strides = array<i32>} : memref<176x128xf32, #tpu.memory_space<vmem>>, vector<176x128xf32>,
    %c112 = arith.constant 112 : index
    %c0_97 = arith.constant 0 : index
    %109 = vector.load %arg2[%c112, %c0_97] : memref<144x128xbf16, #tpu.memory_space<vmem>>, vector<16x128xbf16>
    %c1_98 = arith.constant 1 : index
    %110 = arith.index_cast %93 : i32 to index
    %c0_99 = arith.constant 0 : index
    %111 = vector.load %arg1[%c1_98, %110, %c0_99] : memref<4x3600x16xbf16, #tpu.memory_space<vmem>>, vector<1x176x16xbf16>
    %112 = vector.shape_cast %111 : vector<1x176x16xbf16> to vector<176x16xbf16>
    %c2_100 = arith.constant 2 : index
    %113 = arith.index_cast %93 : i32 to index
    %c0_101 = arith.constant 0 : index
    %114 = vector.load %arg1[%c2_100, %113, %c0_101] : memref<4x3600x16xbf16, #tpu.memory_space<vmem>>, vector<1x176x16xbf16>
    %115 = vector.shape_cast %114 : vector<1x176x16xbf16> to vector<176x16xbf16>
    %cst_102 = arith.constant dense<0.000000e+00> : vector<176x128xf32>
    %116 = tpu.matmul %112, %109, %cst_102 {dimension_numbers = #tpu.dot_dimension_numbers<[1], [0], [0], [1], [0, 0, 1, 1], [], []>} : vector<176x16xbf16>, vector<16x128xbf16>, vector<176x128xf32> -> vector<176x128xf32>
    %cst_103 = arith.constant dense<0.000000e+00> : vector<176x128xf32>
    %117 = tpu.matmul %115, %109, %cst_103 {dimension_numbers = #tpu.dot_dimension_numbers<[1], [0], [0], [1], [0, 0, 1, 1], [], []>} : vector<176x16xbf16>, vector<16x128xbf16>, vector<176x128xf32> -> vector<176x128xf32>
    %c0_104 = arith.constant 0 : index
    %c0_105 = arith.constant 0 : index
    %118 = vector.load %arg5[%c0_104, %c0_105] : memref<176x128xf32, #tpu.memory_space<vmem>>, vector<176x128xf32>
    %119 = arith.addf %118, %116 : vector<176x128xf32>
    %c0_106 = arith.constant 0 : index
    %c0_107 = arith.constant 0 : index
    %120 = vector.load %arg5[%c0_106, %c0_107] : memref<176x128xf32, #tpu.memory_space<vmem>>, vector<176x128xf32>
    tpu.vector_store %arg5[%c0_106, %c0_107], %119 {strides = array<i32>} : memref<176x128xf32, #tpu.memory_space<vmem>>, vector<176x128xf32>,
    %c0_108 = arith.constant 0 : index
    %c0_109 = arith.constant 0 : index
    %121 = vector.load %arg6[%c0_108, %c0_109] : memref<176x128xf32, #tpu.memory_space<vmem>>, vector<176x128xf32>
    %122 = arith.addf %121, %117 : vector<176x128xf32>
    %c0_110 = arith.constant 0 : index
    %c0_111 = arith.constant 0 : index
    %123 = vector.load %arg6[%c0_110, %c0_111] : memref<176x128xf32, #tpu.memory_space<vmem>>, vector<176x128xf32>
    tpu.vector_store %arg6[%c0_110, %c0_111], %122 {strides = array<i32>} : memref<176x128xf32, #tpu.memory_space<vmem>>, vector<176x128xf32>,
    %c128 = arith.constant 128 : index
    %c0_112 = arith.constant 0 : index
    %124 = vector.load %arg2[%c128, %c0_112] : memref<144x128xbf16, #tpu.memory_space<vmem>>, vector<16x128xbf16>
    %c2_113 = arith.constant 2 : index
    %125 = arith.index_cast %93 : i32 to index
    %c0_114 = arith.constant 0 : index
    %126 = vector.load %arg1[%c2_113, %125, %c0_114] : memref<4x3600x16xbf16, #tpu.memory_space<vmem>>, vector<1x176x16xbf16>
    %127 = vector.shape_cast %126 : vector<1x176x16xbf16> to vector<176x16xbf16>
    %c3_115 = arith.constant 3 : index
    %128 = arith.index_cast %93 : i32 to index
    %c0_116 = arith.constant 0 : index
    %129 = vector.load %arg1[%c3_115, %128, %c0_116] : memref<4x3600x16xbf16, #tpu.memory_space<vmem>>, vector<1x176x16xbf16>
    %130 = vector.shape_cast %129 : vector<1x176x16xbf16> to vector<176x16xbf16>
    %cst_117 = arith.constant dense<0.000000e+00> : vector<176x128xf32>
    %131 = tpu.matmul %127, %124, %cst_117 {dimension_numbers = #tpu.dot_dimension_numbers<[1], [0], [0], [1], [0, 0, 1, 1], [], []>} : vector<176x16xbf16>, vector<16x128xbf16>, vector<176x128xf32> -> vector<176x128xf32>
    %cst_118 = arith.constant dense<0.000000e+00> : vector<176x128xf32>
    %132 = tpu.matmul %130, %124, %cst_118 {dimension_numbers = #tpu.dot_dimension_numbers<[1], [0], [0], [1], [0, 0, 1, 1], [], []>} : vector<176x16xbf16>, vector<16x128xbf16>, vector<176x128xf32> -> vector<176x128xf32>
    %c0_119 = arith.constant 0 : index
    %c0_120 = arith.constant 0 : index
    %133 = vector.load %arg5[%c0_119, %c0_120] : memref<176x128xf32, #tpu.memory_space<vmem>>, vector<176x128xf32>
    %134 = arith.addf %133, %131 : vector<176x128xf32>
    %c0_121 = arith.constant 0 : index
    %c0_122 = arith.constant 0 : index
    %135 = vector.load %arg5[%c0_121, %c0_122] : memref<176x128xf32, #tpu.memory_space<vmem>>, vector<176x128xf32>
    tpu.vector_store %arg5[%c0_121, %c0_122], %134 {strides = array<i32>} : memref<176x128xf32, #tpu.memory_space<vmem>>, vector<176x128xf32>,
    %c0_123 = arith.constant 0 : index
    %c0_124 = arith.constant 0 : index
    %136 = vector.load %arg6[%c0_123, %c0_124] : memref<176x128xf32, #tpu.memory_space<vmem>>, vector<176x128xf32>
    %137 = arith.addf %136, %132 : vector<176x128xf32>
    %c0_125 = arith.constant 0 : index
    %c0_126 = arith.constant 0 : index
    %138 = vector.load %arg6[%c0_125, %c0_126] : memref<176x128xf32, #tpu.memory_space<vmem>>, vector<176x128xf32>
    tpu.vector_store %arg6[%c0_125, %c0_126], %137 {strides = array<i32>} : memref<176x128xf32, #tpu.memory_space<vmem>>, vector<176x128xf32>,
    %c0_127 = arith.constant 0 : index
    %c0_128 = arith.constant 0 : index
    %139 = vector.load %arg5[%c0_127, %c0_128] : memref<176x128xf32, #tpu.memory_space<vmem>>, vector<176x128xf32>
    %c0_129 = arith.constant 0 : index
    %c0_130 = arith.constant 0 : index
    %140 = vector.load %arg6[%c0_129, %c0_130] : memref<176x128xf32, #tpu.memory_space<vmem>>, vector<176x128xf32>
    %141 = arith.maximumf %139, %140 : vector<176x128xf32>
    %142 = vector.extract_strided_slice %141 {offsets = [0, 0], sizes = [128, 128], strides = [1, 1]} : vector<176x128xf32> to vector<128x128xf32>
    %143 = vector.extract_strided_slice %141 {offsets = [48, 0], sizes = [128, 128], strides = [1, 1]} : vector<176x128xf32> to vector<128x128xf32>
    %144 = arith.maximumf %142, %143 : vector<128x128xf32>
    %c0_131 = arith.constant 0 : index
    %c0_132 = arith.constant 0 : index
    %145 = vector.load %arg3[%c0_131, %c0_132] : memref<1x128xf32, #tpu.memory_space<vmem>>, vector<1x128xf32>
    %146 = vector.broadcast %145 : vector<1x128xf32> to vector<128x128xf32>
    %147 = arith.addf %144, %146 : vector<128x128xf32>
    %cst_133 = arith.constant 0.000000e+00 : f32
    %148 = vector.broadcast %cst_133 : f32 to vector<128x128xf32>
    %149 = arith.maximumf %147, %148 : vector<128x128xf32>
    %150 = arith.truncf %149 : vector<128x128xf32> to vector<128x128xbf16>
    %c0_134 = arith.constant 0 : index
    %c0_135 = arith.constant 0 : index
    %151 = vector.load %arg4[%c0_134, %c0_135] : memref<128x128xbf16, #tpu.memory_space<vmem>>, vector<128x128xbf16>
    tpu.vector_store %arg4[%c0_134, %c0_135], %150 {strides = array<i32>} : memref<128x128xbf16, #tpu.memory_space<vmem>>, vector<128x128xbf16>,
    return
  }
  func.func @transform_0(%arg0: i32) -> (i32, i32, i32) {
    %c0_i32 = arith.constant 0 : i32
    %c0_i32_0 = arith.constant 0 : i32
    %c0_i32_1 = arith.constant 0 : i32
    %c0_i32_2 = arith.constant 0 : i32
    return %c0_i32, %c0_i32_0, %c0_i32_1 : i32, i32, i32
  }
  func.func @transform_1(%arg0: i32) -> (i32, i32) {
    %c0_i32 = arith.constant 0 : i32
    %c0_i32_0 = arith.constant 0 : i32
    %c0_i32_1 = arith.constant 0 : i32
    return %c0_i32, %c0_i32_0 : i32, i32
  }
  func.func @transform_2(%arg0: i32) -> (i32, i32) {
    %c0_i32 = arith.constant 0 : i32
    %c0_i32_0 = arith.constant 0 : i32
    %c0_i32_1 = arith.constant 0 : i32
    return %c0_i32, %c0_i32_0 : i32, i32
  }
  func.func @transform_3(%arg0: i32) -> (i32, i32) {
    %c0_i32 = arith.constant 0 : i32
    %c0_i32_0 = arith.constant 0 : i32
    return %arg0, %c0_i32 : i32, i32
  }
}

module attributes {stable_mosaic.version = 11 : i64} {
  func.func @kernel(%arg0: i32, %arg1: memref<4x1248x128xbf16, #tpu.memory_space<vmem>>, %arg2: memref<1152x128xbf16, #tpu.memory_space<vmem>>, %arg3: memref<1x128xf32, #tpu.memory_space<vmem>>, %arg4: memref<128x128xbf16, #tpu.memory_space<vmem>>, %arg5: memref<160x128xf32, #tpu.memory_space<vmem>>, %arg6: memref<160x128xf32, #tpu.memory_space<vmem>>) attributes {dimension_semantics = [#tpu.dimension_semantics<parallel>], iteration_bounds = array<i64: 9>, scalar_prefetch = 0 : i64, scratch_operands = 2 : i64, tpu.core_type = #tpu.core_type<tc>, window_params = [{pipeline_mode = #tpu.pipeline_mode<synchronous>, transform_indices = @transform_0, window_bounds = array<i64: 4, 1248, 128>}, {pipeline_mode = #tpu.pipeline_mode<synchronous>, transform_indices = @transform_1, window_bounds = array<i64: 1152, 128>}, {pipeline_mode = #tpu.pipeline_mode<synchronous>, transform_indices = @transform_2, window_bounds = array<i64: 1, 128>}, {transform_indices = @transform_3, window_bounds = array<i64: 128, 128>}]} {
    %c128_i32 = arith.constant 128 : i32
    %0 = arith.muli %arg0, %c128_i32 : i32
    %1 = tpu.assume_multiple %0, 16 : i32
    %c0_i32 = arith.constant 0 : i32
    %2 = arith.addi %1, %c0_i32 : i32
    %3 = tpu.assume_multiple %2, 16 : i32
    %c0 = arith.constant 0 : index
    %c0_0 = arith.constant 0 : index
    %4 = vector.load %arg2[%c0, %c0_0] : memref<1152x128xbf16, #tpu.memory_space<vmem>>, vector<128x128xbf16>
    %c0_1 = arith.constant 0 : index
    %5 = arith.index_cast %3 : i32 to index
    %c0_2 = arith.constant 0 : index
    %6 = vector.load %arg1[%c0_1, %5, %c0_2] : memref<4x1248x128xbf16, #tpu.memory_space<vmem>>, vector<1x160x128xbf16>
    %7 = vector.shape_cast %6 : vector<1x160x128xbf16> to vector<160x128xbf16>
    %c1 = arith.constant 1 : index
    %8 = arith.index_cast %3 : i32 to index
    %c0_3 = arith.constant 0 : index
    %9 = vector.load %arg1[%c1, %8, %c0_3] : memref<4x1248x128xbf16, #tpu.memory_space<vmem>>, vector<1x160x128xbf16>
    %10 = vector.shape_cast %9 : vector<1x160x128xbf16> to vector<160x128xbf16>
    %cst = arith.constant dense<0.000000e+00> : vector<160x128xf32>
    %11 = tpu.matmul %7, %4, %cst {dimension_numbers = #tpu.dot_dimension_numbers<[1], [0], [0], [1], [0, 0, 1, 1], [], []>} : vector<160x128xbf16>, vector<128x128xbf16>, vector<160x128xf32> -> vector<160x128xf32>
    %cst_4 = arith.constant dense<0.000000e+00> : vector<160x128xf32>
    %12 = tpu.matmul %10, %4, %cst_4 {dimension_numbers = #tpu.dot_dimension_numbers<[1], [0], [0], [1], [0, 0, 1, 1], [], []>} : vector<160x128xbf16>, vector<128x128xbf16>, vector<160x128xf32> -> vector<160x128xf32>
    %c0_5 = arith.constant 0 : index
    %c0_6 = arith.constant 0 : index
    %13 = vector.load %arg5[%c0_5, %c0_6] : memref<160x128xf32, #tpu.memory_space<vmem>>, vector<160x128xf32>
    tpu.vector_store %arg5[%c0_5, %c0_6], %11 {strides = array<i32>} : memref<160x128xf32, #tpu.memory_space<vmem>>, vector<160x128xf32>,
    %c0_7 = arith.constant 0 : index
    %c0_8 = arith.constant 0 : index
    %14 = vector.load %arg6[%c0_7, %c0_8] : memref<160x128xf32, #tpu.memory_space<vmem>>, vector<160x128xf32>
    tpu.vector_store %arg6[%c0_7, %c0_8], %12 {strides = array<i32>} : memref<160x128xf32, #tpu.memory_space<vmem>>, vector<160x128xf32>,
    %c128 = arith.constant 128 : index
    %c0_9 = arith.constant 0 : index
    %15 = vector.load %arg2[%c128, %c0_9] : memref<1152x128xbf16, #tpu.memory_space<vmem>>, vector<128x128xbf16>
    %c1_10 = arith.constant 1 : index
    %16 = arith.index_cast %3 : i32 to index
    %c0_11 = arith.constant 0 : index
    %17 = vector.load %arg1[%c1_10, %16, %c0_11] : memref<4x1248x128xbf16, #tpu.memory_space<vmem>>, vector<1x160x128xbf16>
    %18 = vector.shape_cast %17 : vector<1x160x128xbf16> to vector<160x128xbf16>
    %c2 = arith.constant 2 : index
    %19 = arith.index_cast %3 : i32 to index
    %c0_12 = arith.constant 0 : index
    %20 = vector.load %arg1[%c2, %19, %c0_12] : memref<4x1248x128xbf16, #tpu.memory_space<vmem>>, vector<1x160x128xbf16>
    %21 = vector.shape_cast %20 : vector<1x160x128xbf16> to vector<160x128xbf16>
    %cst_13 = arith.constant dense<0.000000e+00> : vector<160x128xf32>
    %22 = tpu.matmul %18, %15, %cst_13 {dimension_numbers = #tpu.dot_dimension_numbers<[1], [0], [0], [1], [0, 0, 1, 1], [], []>} : vector<160x128xbf16>, vector<128x128xbf16>, vector<160x128xf32> -> vector<160x128xf32>
    %cst_14 = arith.constant dense<0.000000e+00> : vector<160x128xf32>
    %23 = tpu.matmul %21, %15, %cst_14 {dimension_numbers = #tpu.dot_dimension_numbers<[1], [0], [0], [1], [0, 0, 1, 1], [], []>} : vector<160x128xbf16>, vector<128x128xbf16>, vector<160x128xf32> -> vector<160x128xf32>
    %c0_15 = arith.constant 0 : index
    %c0_16 = arith.constant 0 : index
    %24 = vector.load %arg5[%c0_15, %c0_16] : memref<160x128xf32, #tpu.memory_space<vmem>>, vector<160x128xf32>
    %25 = arith.addf %24, %22 : vector<160x128xf32>
    %c0_17 = arith.constant 0 : index
    %c0_18 = arith.constant 0 : index
    %26 = vector.load %arg5[%c0_17, %c0_18] : memref<160x128xf32, #tpu.memory_space<vmem>>, vector<160x128xf32>
    tpu.vector_store %arg5[%c0_17, %c0_18], %25 {strides = array<i32>} : memref<160x128xf32, #tpu.memory_space<vmem>>, vector<160x128xf32>,
    %c0_19 = arith.constant 0 : index
    %c0_20 = arith.constant 0 : index
    %27 = vector.load %arg6[%c0_19, %c0_20] : memref<160x128xf32, #tpu.memory_space<vmem>>, vector<160x128xf32>
    %28 = arith.addf %27, %23 : vector<160x128xf32>
    %c0_21 = arith.constant 0 : index
    %c0_22 = arith.constant 0 : index
    %29 = vector.load %arg6[%c0_21, %c0_22] : memref<160x128xf32, #tpu.memory_space<vmem>>, vector<160x128xf32>
    tpu.vector_store %arg6[%c0_21, %c0_22], %28 {strides = array<i32>} : memref<160x128xf32, #tpu.memory_space<vmem>>, vector<160x128xf32>,
    %c256 = arith.constant 256 : index
    %c0_23 = arith.constant 0 : index
    %30 = vector.load %arg2[%c256, %c0_23] : memref<1152x128xbf16, #tpu.memory_space<vmem>>, vector<128x128xbf16>
    %c2_24 = arith.constant 2 : index
    %31 = arith.index_cast %3 : i32 to index
    %c0_25 = arith.constant 0 : index
    %32 = vector.load %arg1[%c2_24, %31, %c0_25] : memref<4x1248x128xbf16, #tpu.memory_space<vmem>>, vector<1x160x128xbf16>
    %33 = vector.shape_cast %32 : vector<1x160x128xbf16> to vector<160x128xbf16>
    %c3 = arith.constant 3 : index
    %34 = arith.index_cast %3 : i32 to index
    %c0_26 = arith.constant 0 : index
    %35 = vector.load %arg1[%c3, %34, %c0_26] : memref<4x1248x128xbf16, #tpu.memory_space<vmem>>, vector<1x160x128xbf16>
    %36 = vector.shape_cast %35 : vector<1x160x128xbf16> to vector<160x128xbf16>
    %cst_27 = arith.constant dense<0.000000e+00> : vector<160x128xf32>
    %37 = tpu.matmul %33, %30, %cst_27 {dimension_numbers = #tpu.dot_dimension_numbers<[1], [0], [0], [1], [0, 0, 1, 1], [], []>} : vector<160x128xbf16>, vector<128x128xbf16>, vector<160x128xf32> -> vector<160x128xf32>
    %cst_28 = arith.constant dense<0.000000e+00> : vector<160x128xf32>
    %38 = tpu.matmul %36, %30, %cst_28 {dimension_numbers = #tpu.dot_dimension_numbers<[1], [0], [0], [1], [0, 0, 1, 1], [], []>} : vector<160x128xbf16>, vector<128x128xbf16>, vector<160x128xf32> -> vector<160x128xf32>
    %c0_29 = arith.constant 0 : index
    %c0_30 = arith.constant 0 : index
    %39 = vector.load %arg5[%c0_29, %c0_30] : memref<160x128xf32, #tpu.memory_space<vmem>>, vector<160x128xf32>
    %40 = arith.addf %39, %37 : vector<160x128xf32>
    %c0_31 = arith.constant 0 : index
    %c0_32 = arith.constant 0 : index
    %41 = vector.load %arg5[%c0_31, %c0_32] : memref<160x128xf32, #tpu.memory_space<vmem>>, vector<160x128xf32>
    tpu.vector_store %arg5[%c0_31, %c0_32], %40 {strides = array<i32>} : memref<160x128xf32, #tpu.memory_space<vmem>>, vector<160x128xf32>,
    %c0_33 = arith.constant 0 : index
    %c0_34 = arith.constant 0 : index
    %42 = vector.load %arg6[%c0_33, %c0_34] : memref<160x128xf32, #tpu.memory_space<vmem>>, vector<160x128xf32>
    %43 = arith.addf %42, %38 : vector<160x128xf32>
    %c0_35 = arith.constant 0 : index
    %c0_36 = arith.constant 0 : index
    %44 = vector.load %arg6[%c0_35, %c0_36] : memref<160x128xf32, #tpu.memory_space<vmem>>, vector<160x128xf32>
    tpu.vector_store %arg6[%c0_35, %c0_36], %43 {strides = array<i32>} : memref<160x128xf32, #tpu.memory_space<vmem>>, vector<160x128xf32>,
    %c32_i32 = arith.constant 32 : i32
    %45 = arith.addi %1, %c32_i32 : i32
    %46 = tpu.assume_multiple %45, 16 : i32
    %c384 = arith.constant 384 : index
    %c0_37 = arith.constant 0 : index
    %47 = vector.load %arg2[%c384, %c0_37] : memref<1152x128xbf16, #tpu.memory_space<vmem>>, vector<128x128xbf16>
    %c0_38 = arith.constant 0 : index
    %48 = arith.index_cast %46 : i32 to index
    %c0_39 = arith.constant 0 : index
    %49 = vector.load %arg1[%c0_38, %48, %c0_39] : memref<4x1248x128xbf16, #tpu.memory_space<vmem>>, vector<1x160x128xbf16>
    %50 = vector.shape_cast %49 : vector<1x160x128xbf16> to vector<160x128xbf16>
    %c1_40 = arith.constant 1 : index
    %51 = arith.index_cast %46 : i32 to index
    %c0_41 = arith.constant 0 : index
    %52 = vector.load %arg1[%c1_40, %51, %c0_41] : memref<4x1248x128xbf16, #tpu.memory_space<vmem>>, vector<1x160x128xbf16>
    %53 = vector.shape_cast %52 : vector<1x160x128xbf16> to vector<160x128xbf16>
    %cst_42 = arith.constant dense<0.000000e+00> : vector<160x128xf32>
    %54 = tpu.matmul %50, %47, %cst_42 {dimension_numbers = #tpu.dot_dimension_numbers<[1], [0], [0], [1], [0, 0, 1, 1], [], []>} : vector<160x128xbf16>, vector<128x128xbf16>, vector<160x128xf32> -> vector<160x128xf32>
    %cst_43 = arith.constant dense<0.000000e+00> : vector<160x128xf32>
    %55 = tpu.matmul %53, %47, %cst_43 {dimension_numbers = #tpu.dot_dimension_numbers<[1], [0], [0], [1], [0, 0, 1, 1], [], []>} : vector<160x128xbf16>, vector<128x128xbf16>, vector<160x128xf32> -> vector<160x128xf32>
    %c0_44 = arith.constant 0 : index
    %c0_45 = arith.constant 0 : index
    %56 = vector.load %arg5[%c0_44, %c0_45] : memref<160x128xf32, #tpu.memory_space<vmem>>, vector<160x128xf32>
    %57 = arith.addf %56, %54 : vector<160x128xf32>
    %c0_46 = arith.constant 0 : index
    %c0_47 = arith.constant 0 : index
    %58 = vector.load %arg5[%c0_46, %c0_47] : memref<160x128xf32, #tpu.memory_space<vmem>>, vector<160x128xf32>
    tpu.vector_store %arg5[%c0_46, %c0_47], %57 {strides = array<i32>} : memref<160x128xf32, #tpu.memory_space<vmem>>, vector<160x128xf32>,
    %c0_48 = arith.constant 0 : index
    %c0_49 = arith.constant 0 : index
    %59 = vector.load %arg6[%c0_48, %c0_49] : memref<160x128xf32, #tpu.memory_space<vmem>>, vector<160x128xf32>
    %60 = arith.addf %59, %55 : vector<160x128xf32>
    %c0_50 = arith.constant 0 : index
    %c0_51 = arith.constant 0 : index
    %61 = vector.load %arg6[%c0_50, %c0_51] : memref<160x128xf32, #tpu.memory_space<vmem>>, vector<160x128xf32>
    tpu.vector_store %arg6[%c0_50, %c0_51], %60 {strides = array<i32>} : memref<160x128xf32, #tpu.memory_space<vmem>>, vector<160x128xf32>,
    %c512 = arith.constant 512 : index
    %c0_52 = arith.constant 0 : index
    %62 = vector.load %arg2[%c512, %c0_52] : memref<1152x128xbf16, #tpu.memory_space<vmem>>, vector<128x128xbf16>
    %c1_53 = arith.constant 1 : index
    %63 = arith.index_cast %46 : i32 to index
    %c0_54 = arith.constant 0 : index
    %64 = vector.load %arg1[%c1_53, %63, %c0_54] : memref<4x1248x128xbf16, #tpu.memory_space<vmem>>, vector<1x160x128xbf16>
    %65 = vector.shape_cast %64 : vector<1x160x128xbf16> to vector<160x128xbf16>
    %c2_55 = arith.constant 2 : index
    %66 = arith.index_cast %46 : i32 to index
    %c0_56 = arith.constant 0 : index
    %67 = vector.load %arg1[%c2_55, %66, %c0_56] : memref<4x1248x128xbf16, #tpu.memory_space<vmem>>, vector<1x160x128xbf16>
    %68 = vector.shape_cast %67 : vector<1x160x128xbf16> to vector<160x128xbf16>
    %cst_57 = arith.constant dense<0.000000e+00> : vector<160x128xf32>
    %69 = tpu.matmul %65, %62, %cst_57 {dimension_numbers = #tpu.dot_dimension_numbers<[1], [0], [0], [1], [0, 0, 1, 1], [], []>} : vector<160x128xbf16>, vector<128x128xbf16>, vector<160x128xf32> -> vector<160x128xf32>
    %cst_58 = arith.constant dense<0.000000e+00> : vector<160x128xf32>
    %70 = tpu.matmul %68, %62, %cst_58 {dimension_numbers = #tpu.dot_dimension_numbers<[1], [0], [0], [1], [0, 0, 1, 1], [], []>} : vector<160x128xbf16>, vector<128x128xbf16>, vector<160x128xf32> -> vector<160x128xf32>
    %c0_59 = arith.constant 0 : index
    %c0_60 = arith.constant 0 : index
    %71 = vector.load %arg5[%c0_59, %c0_60] : memref<160x128xf32, #tpu.memory_space<vmem>>, vector<160x128xf32>
    %72 = arith.addf %71, %69 : vector<160x128xf32>
    %c0_61 = arith.constant 0 : index
    %c0_62 = arith.constant 0 : index
    %73 = vector.load %arg5[%c0_61, %c0_62] : memref<160x128xf32, #tpu.memory_space<vmem>>, vector<160x128xf32>
    tpu.vector_store %arg5[%c0_61, %c0_62], %72 {strides = array<i32>} : memref<160x128xf32, #tpu.memory_space<vmem>>, vector<160x128xf32>,
    %c0_63 = arith.constant 0 : index
    %c0_64 = arith.constant 0 : index
    %74 = vector.load %arg6[%c0_63, %c0_64] : memref<160x128xf32, #tpu.memory_space<vmem>>, vector<160x128xf32>
    %75 = arith.addf %74, %70 : vector<160x128xf32>
    %c0_65 = arith.constant 0 : index
    %c0_66 = arith.constant 0 : index
    %76 = vector.load %arg6[%c0_65, %c0_66] : memref<160x128xf32, #tpu.memory_space<vmem>>, vector<160x128xf32>
    tpu.vector_store %arg6[%c0_65, %c0_66], %75 {strides = array<i32>} : memref<160x128xf32, #tpu.memory_space<vmem>>, vector<160x128xf32>,
    %c640 = arith.constant 640 : index
    %c0_67 = arith.constant 0 : index
    %77 = vector.load %arg2[%c640, %c0_67] : memref<1152x128xbf16, #tpu.memory_space<vmem>>, vector<128x128xbf16>
    %c2_68 = arith.constant 2 : index
    %78 = arith.index_cast %46 : i32 to index
    %c0_69 = arith.constant 0 : index
    %79 = vector.load %arg1[%c2_68, %78, %c0_69] : memref<4x1248x128xbf16, #tpu.memory_space<vmem>>, vector<1x160x128xbf16>
    %80 = vector.shape_cast %79 : vector<1x160x128xbf16> to vector<160x128xbf16>
    %c3_70 = arith.constant 3 : index
    %81 = arith.index_cast %46 : i32 to index
    %c0_71 = arith.constant 0 : index
    %82 = vector.load %arg1[%c3_70, %81, %c0_71] : memref<4x1248x128xbf16, #tpu.memory_space<vmem>>, vector<1x160x128xbf16>
    %83 = vector.shape_cast %82 : vector<1x160x128xbf16> to vector<160x128xbf16>
    %cst_72 = arith.constant dense<0.000000e+00> : vector<160x128xf32>
    %84 = tpu.matmul %80, %77, %cst_72 {dimension_numbers = #tpu.dot_dimension_numbers<[1], [0], [0], [1], [0, 0, 1, 1], [], []>} : vector<160x128xbf16>, vector<128x128xbf16>, vector<160x128xf32> -> vector<160x128xf32>
    %cst_73 = arith.constant dense<0.000000e+00> : vector<160x128xf32>
    %85 = tpu.matmul %83, %77, %cst_73 {dimension_numbers = #tpu.dot_dimension_numbers<[1], [0], [0], [1], [0, 0, 1, 1], [], []>} : vector<160x128xbf16>, vector<128x128xbf16>, vector<160x128xf32> -> vector<160x128xf32>
    %c0_74 = arith.constant 0 : index
    %c0_75 = arith.constant 0 : index
    %86 = vector.load %arg5[%c0_74, %c0_75] : memref<160x128xf32, #tpu.memory_space<vmem>>, vector<160x128xf32>
    %87 = arith.addf %86, %84 : vector<160x128xf32>
    %c0_76 = arith.constant 0 : index
    %c0_77 = arith.constant 0 : index
    %88 = vector.load %arg5[%c0_76, %c0_77] : memref<160x128xf32, #tpu.memory_space<vmem>>, vector<160x128xf32>
    tpu.vector_store %arg5[%c0_76, %c0_77], %87 {strides = array<i32>} : memref<160x128xf32, #tpu.memory_space<vmem>>, vector<160x128xf32>,
    %c0_78 = arith.constant 0 : index
    %c0_79 = arith.constant 0 : index
    %89 = vector.load %arg6[%c0_78, %c0_79] : memref<160x128xf32, #tpu.memory_space<vmem>>, vector<160x128xf32>
    %90 = arith.addf %89, %85 : vector<160x128xf32>
    %c0_80 = arith.constant 0 : index
    %c0_81 = arith.constant 0 : index
    %91 = vector.load %arg6[%c0_80, %c0_81] : memref<160x128xf32, #tpu.memory_space<vmem>>, vector<160x128xf32>
    tpu.vector_store %arg6[%c0_80, %c0_81], %90 {strides = array<i32>} : memref<160x128xf32, #tpu.memory_space<vmem>>, vector<160x128xf32>,
    %c64_i32 = arith.constant 64 : i32
    %92 = arith.addi %1, %c64_i32 : i32
    %93 = tpu.assume_multiple %92, 16 : i32
    %c768 = arith.constant 768 : index
    %c0_82 = arith.constant 0 : index
    %94 = vector.load %arg2[%c768, %c0_82] : memref<1152x128xbf16, #tpu.memory_space<vmem>>, vector<128x128xbf16>
    %c0_83 = arith.constant 0 : index
    %95 = arith.index_cast %93 : i32 to index
    %c0_84 = arith.constant 0 : index
    %96 = vector.load %arg1[%c0_83, %95, %c0_84] : memref<4x1248x128xbf16, #tpu.memory_space<vmem>>, vector<1x160x128xbf16>
    %97 = vector.shape_cast %96 : vector<1x160x128xbf16> to vector<160x128xbf16>
    %c1_85 = arith.constant 1 : index
    %98 = arith.index_cast %93 : i32 to index
    %c0_86 = arith.constant 0 : index
    %99 = vector.load %arg1[%c1_85, %98, %c0_86] : memref<4x1248x128xbf16, #tpu.memory_space<vmem>>, vector<1x160x128xbf16>
    %100 = vector.shape_cast %99 : vector<1x160x128xbf16> to vector<160x128xbf16>
    %cst_87 = arith.constant dense<0.000000e+00> : vector<160x128xf32>
    %101 = tpu.matmul %97, %94, %cst_87 {dimension_numbers = #tpu.dot_dimension_numbers<[1], [0], [0], [1], [0, 0, 1, 1], [], []>} : vector<160x128xbf16>, vector<128x128xbf16>, vector<160x128xf32> -> vector<160x128xf32>
    %cst_88 = arith.constant dense<0.000000e+00> : vector<160x128xf32>
    %102 = tpu.matmul %100, %94, %cst_88 {dimension_numbers = #tpu.dot_dimension_numbers<[1], [0], [0], [1], [0, 0, 1, 1], [], []>} : vector<160x128xbf16>, vector<128x128xbf16>, vector<160x128xf32> -> vector<160x128xf32>
    %c0_89 = arith.constant 0 : index
    %c0_90 = arith.constant 0 : index
    %103 = vector.load %arg5[%c0_89, %c0_90] : memref<160x128xf32, #tpu.memory_space<vmem>>, vector<160x128xf32>
    %104 = arith.addf %103, %101 : vector<160x128xf32>
    %c0_91 = arith.constant 0 : index
    %c0_92 = arith.constant 0 : index
    %105 = vector.load %arg5[%c0_91, %c0_92] : memref<160x128xf32, #tpu.memory_space<vmem>>, vector<160x128xf32>
    tpu.vector_store %arg5[%c0_91, %c0_92], %104 {strides = array<i32>} : memref<160x128xf32, #tpu.memory_space<vmem>>, vector<160x128xf32>,
    %c0_93 = arith.constant 0 : index
    %c0_94 = arith.constant 0 : index
    %106 = vector.load %arg6[%c0_93, %c0_94] : memref<160x128xf32, #tpu.memory_space<vmem>>, vector<160x128xf32>
    %107 = arith.addf %106, %102 : vector<160x128xf32>
    %c0_95 = arith.constant 0 : index
    %c0_96 = arith.constant 0 : index
    %108 = vector.load %arg6[%c0_95, %c0_96] : memref<160x128xf32, #tpu.memory_space<vmem>>, vector<160x128xf32>
    tpu.vector_store %arg6[%c0_95, %c0_96], %107 {strides = array<i32>} : memref<160x128xf32, #tpu.memory_space<vmem>>, vector<160x128xf32>,
    %c896 = arith.constant 896 : index
    %c0_97 = arith.constant 0 : index
    %109 = vector.load %arg2[%c896, %c0_97] : memref<1152x128xbf16, #tpu.memory_space<vmem>>, vector<128x128xbf16>
    %c1_98 = arith.constant 1 : index
    %110 = arith.index_cast %93 : i32 to index
    %c0_99 = arith.constant 0 : index
    %111 = vector.load %arg1[%c1_98, %110, %c0_99] : memref<4x1248x128xbf16, #tpu.memory_space<vmem>>, vector<1x160x128xbf16>
    %112 = vector.shape_cast %111 : vector<1x160x128xbf16> to vector<160x128xbf16>
    %c2_100 = arith.constant 2 : index
    %113 = arith.index_cast %93 : i32 to index
    %c0_101 = arith.constant 0 : index
    %114 = vector.load %arg1[%c2_100, %113, %c0_101] : memref<4x1248x128xbf16, #tpu.memory_space<vmem>>, vector<1x160x128xbf16>
    %115 = vector.shape_cast %114 : vector<1x160x128xbf16> to vector<160x128xbf16>
    %cst_102 = arith.constant dense<0.000000e+00> : vector<160x128xf32>
    %116 = tpu.matmul %112, %109, %cst_102 {dimension_numbers = #tpu.dot_dimension_numbers<[1], [0], [0], [1], [0, 0, 1, 1], [], []>} : vector<160x128xbf16>, vector<128x128xbf16>, vector<160x128xf32> -> vector<160x128xf32>
    %cst_103 = arith.constant dense<0.000000e+00> : vector<160x128xf32>
    %117 = tpu.matmul %115, %109, %cst_103 {dimension_numbers = #tpu.dot_dimension_numbers<[1], [0], [0], [1], [0, 0, 1, 1], [], []>} : vector<160x128xbf16>, vector<128x128xbf16>, vector<160x128xf32> -> vector<160x128xf32>
    %c0_104 = arith.constant 0 : index
    %c0_105 = arith.constant 0 : index
    %118 = vector.load %arg5[%c0_104, %c0_105] : memref<160x128xf32, #tpu.memory_space<vmem>>, vector<160x128xf32>
    %119 = arith.addf %118, %116 : vector<160x128xf32>
    %c0_106 = arith.constant 0 : index
    %c0_107 = arith.constant 0 : index
    %120 = vector.load %arg5[%c0_106, %c0_107] : memref<160x128xf32, #tpu.memory_space<vmem>>, vector<160x128xf32>
    tpu.vector_store %arg5[%c0_106, %c0_107], %119 {strides = array<i32>} : memref<160x128xf32, #tpu.memory_space<vmem>>, vector<160x128xf32>,
    %c0_108 = arith.constant 0 : index
    %c0_109 = arith.constant 0 : index
    %121 = vector.load %arg6[%c0_108, %c0_109] : memref<160x128xf32, #tpu.memory_space<vmem>>, vector<160x128xf32>
    %122 = arith.addf %121, %117 : vector<160x128xf32>
    %c0_110 = arith.constant 0 : index
    %c0_111 = arith.constant 0 : index
    %123 = vector.load %arg6[%c0_110, %c0_111] : memref<160x128xf32, #tpu.memory_space<vmem>>, vector<160x128xf32>
    tpu.vector_store %arg6[%c0_110, %c0_111], %122 {strides = array<i32>} : memref<160x128xf32, #tpu.memory_space<vmem>>, vector<160x128xf32>,
    %c1024 = arith.constant 1024 : index
    %c0_112 = arith.constant 0 : index
    %124 = vector.load %arg2[%c1024, %c0_112] : memref<1152x128xbf16, #tpu.memory_space<vmem>>, vector<128x128xbf16>
    %c2_113 = arith.constant 2 : index
    %125 = arith.index_cast %93 : i32 to index
    %c0_114 = arith.constant 0 : index
    %126 = vector.load %arg1[%c2_113, %125, %c0_114] : memref<4x1248x128xbf16, #tpu.memory_space<vmem>>, vector<1x160x128xbf16>
    %127 = vector.shape_cast %126 : vector<1x160x128xbf16> to vector<160x128xbf16>
    %c3_115 = arith.constant 3 : index
    %128 = arith.index_cast %93 : i32 to index
    %c0_116 = arith.constant 0 : index
    %129 = vector.load %arg1[%c3_115, %128, %c0_116] : memref<4x1248x128xbf16, #tpu.memory_space<vmem>>, vector<1x160x128xbf16>
    %130 = vector.shape_cast %129 : vector<1x160x128xbf16> to vector<160x128xbf16>
    %cst_117 = arith.constant dense<0.000000e+00> : vector<160x128xf32>
    %131 = tpu.matmul %127, %124, %cst_117 {dimension_numbers = #tpu.dot_dimension_numbers<[1], [0], [0], [1], [0, 0, 1, 1], [], []>} : vector<160x128xbf16>, vector<128x128xbf16>, vector<160x128xf32> -> vector<160x128xf32>
    %cst_118 = arith.constant dense<0.000000e+00> : vector<160x128xf32>
    %132 = tpu.matmul %130, %124, %cst_118 {dimension_numbers = #tpu.dot_dimension_numbers<[1], [0], [0], [1], [0, 0, 1, 1], [], []>} : vector<160x128xbf16>, vector<128x128xbf16>, vector<160x128xf32> -> vector<160x128xf32>
    %c0_119 = arith.constant 0 : index
    %c0_120 = arith.constant 0 : index
    %133 = vector.load %arg5[%c0_119, %c0_120] : memref<160x128xf32, #tpu.memory_space<vmem>>, vector<160x128xf32>
    %134 = arith.addf %133, %131 : vector<160x128xf32>
    %c0_121 = arith.constant 0 : index
    %c0_122 = arith.constant 0 : index
    %135 = vector.load %arg5[%c0_121, %c0_122] : memref<160x128xf32, #tpu.memory_space<vmem>>, vector<160x128xf32>
    tpu.vector_store %arg5[%c0_121, %c0_122], %134 {strides = array<i32>} : memref<160x128xf32, #tpu.memory_space<vmem>>, vector<160x128xf32>,
    %c0_123 = arith.constant 0 : index
    %c0_124 = arith.constant 0 : index
    %136 = vector.load %arg6[%c0_123, %c0_124] : memref<160x128xf32, #tpu.memory_space<vmem>>, vector<160x128xf32>
    %137 = arith.addf %136, %132 : vector<160x128xf32>
    %c0_125 = arith.constant 0 : index
    %c0_126 = arith.constant 0 : index
    %138 = vector.load %arg6[%c0_125, %c0_126] : memref<160x128xf32, #tpu.memory_space<vmem>>, vector<160x128xf32>
    tpu.vector_store %arg6[%c0_125, %c0_126], %137 {strides = array<i32>} : memref<160x128xf32, #tpu.memory_space<vmem>>, vector<160x128xf32>,
    %c0_127 = arith.constant 0 : index
    %c0_128 = arith.constant 0 : index
    %139 = vector.load %arg5[%c0_127, %c0_128] : memref<160x128xf32, #tpu.memory_space<vmem>>, vector<160x128xf32>
    %c0_129 = arith.constant 0 : index
    %c0_130 = arith.constant 0 : index
    %140 = vector.load %arg6[%c0_129, %c0_130] : memref<160x128xf32, #tpu.memory_space<vmem>>, vector<160x128xf32>
    %141 = arith.maximumf %139, %140 : vector<160x128xf32>
    %142 = vector.extract_strided_slice %141 {offsets = [0, 0], sizes = [128, 128], strides = [1, 1]} : vector<160x128xf32> to vector<128x128xf32>
    %143 = vector.extract_strided_slice %141 {offsets = [32, 0], sizes = [128, 128], strides = [1, 1]} : vector<160x128xf32> to vector<128x128xf32>
    %144 = arith.maximumf %142, %143 : vector<128x128xf32>
    %c0_131 = arith.constant 0 : index
    %c0_132 = arith.constant 0 : index
    %145 = vector.load %arg3[%c0_131, %c0_132] : memref<1x128xf32, #tpu.memory_space<vmem>>, vector<1x128xf32>
    %146 = vector.broadcast %145 : vector<1x128xf32> to vector<128x128xf32>
    %147 = arith.addf %144, %146 : vector<128x128xf32>
    %cst_133 = arith.constant 0.000000e+00 : f32
    %148 = vector.broadcast %cst_133 : f32 to vector<128x128xf32>
    %149 = arith.maximumf %147, %148 : vector<128x128xf32>
    %150 = arith.truncf %149 : vector<128x128xf32> to vector<128x128xbf16>
    %c0_134 = arith.constant 0 : index
    %c0_135 = arith.constant 0 : index
    %151 = vector.load %arg4[%c0_134, %c0_135] : memref<128x128xbf16, #tpu.memory_space<vmem>>, vector<128x128xbf16>
    tpu.vector_store %arg4[%c0_134, %c0_135], %150 {strides = array<i32>} : memref<128x128xbf16, #tpu.memory_space<vmem>>, vector<128x128xbf16>,
    return
  }
  func.func @transform_0(%arg0: i32) -> (i32, i32, i32) {
    %c0_i32 = arith.constant 0 : i32
    %c0_i32_0 = arith.constant 0 : i32
    %c0_i32_1 = arith.constant 0 : i32
    %c0_i32_2 = arith.constant 0 : i32
    return %c0_i32, %c0_i32_0, %c0_i32_1 : i32, i32, i32
  }
  func.func @transform_1(%arg0: i32) -> (i32, i32) {
    %c0_i32 = arith.constant 0 : i32
    %c0_i32_0 = arith.constant 0 : i32
    %c0_i32_1 = arith.constant 0 : i32
    return %c0_i32, %c0_i32_0 : i32, i32
  }
  func.func @transform_2(%arg0: i32) -> (i32, i32) {
    %c0_i32 = arith.constant 0 : i32
    %c0_i32_0 = arith.constant 0 : i32
    %c0_i32_1 = arith.constant 0 : i32
    return %c0_i32, %c0_i32_0 : i32, i32
  }
  func.func @transform_3(%arg0: i32) -> (i32, i32) {
    %c0_i32 = arith.constant 0 : i32
    %c0_i32_0 = arith.constant 0 : i32
    return %arg0, %c0_i32 : i32, i32
  }
}

module attributes {stable_mosaic.version = 11 : i64} {
  func.func @_linear_kernel(%arg0: i32, %arg1: memref<8x6272xbf16, #tpu.memory_space<vmem>>, %arg2: memref<6272x128xbf16, #tpu.memory_space<vmem>>, %arg3: memref<1x128xf32, #tpu.memory_space<vmem>>, %arg4: memref<8x128xf32, #tpu.memory_space<vmem>>) attributes {dimension_semantics = [#tpu.dimension_semantics<arbitrary>], iteration_bounds = array<i64: 1>, scalar_prefetch = 0 : i64, scratch_operands = 0 : i64, tpu.core_type = #tpu.core_type<tc>, window_params = [{pipeline_mode = #tpu.pipeline_mode<synchronous>, transform_indices = @transform_0, window_bounds = array<i64: 8, 6272>}, {pipeline_mode = #tpu.pipeline_mode<synchronous>, transform_indices = @transform_1, window_bounds = array<i64: 6272, 128>}, {pipeline_mode = #tpu.pipeline_mode<synchronous>, transform_indices = @transform_2, window_bounds = array<i64: 1, 128>}, {pipeline_mode = #tpu.pipeline_mode<synchronous>, transform_indices = @transform_3, window_bounds = array<i64: 8, 128>}]} {
    %c0 = arith.constant 0 : index
    %c0_0 = arith.constant 0 : index
    %0 = vector.load %arg1[%c0, %c0_0] : memref<8x6272xbf16, #tpu.memory_space<vmem>>, vector<8x6272xbf16>
    %c0_1 = arith.constant 0 : index
    %c0_2 = arith.constant 0 : index
    %1 = vector.load %arg2[%c0_1, %c0_2] : memref<6272x128xbf16, #tpu.memory_space<vmem>>, vector<6272x128xbf16>
    %cst = arith.constant dense<0.000000e+00> : vector<8x128xf32>
    %2 = tpu.matmul %0, %1, %cst {dimension_numbers = #tpu.dot_dimension_numbers<[1], [0], [0], [1], [0, 0, 1, 1], [], []>} : vector<8x6272xbf16>, vector<6272x128xbf16>, vector<8x128xf32> -> vector<8x128xf32>
    %c0_3 = arith.constant 0 : index
    %c0_4 = arith.constant 0 : index
    %3 = vector.load %arg3[%c0_3, %c0_4] : memref<1x128xf32, #tpu.memory_space<vmem>>, vector<1x128xf32>
    %4 = vector.broadcast %3 : vector<1x128xf32> to vector<8x128xf32>
    %5 = arith.addf %2, %4 : vector<8x128xf32>
    %c0_5 = arith.constant 0 : index
    %c0_6 = arith.constant 0 : index
    %6 = vector.load %arg4[%c0_5, %c0_6] : memref<8x128xf32, #tpu.memory_space<vmem>>, vector<8x128xf32>
    tpu.vector_store %arg4[%c0_5, %c0_6], %5 {strides = array<i32>} : memref<8x128xf32, #tpu.memory_space<vmem>>, vector<8x128xf32>,
    return
  }
  func.func @transform_0(%arg0: i32) -> (i32, i32) {
    %c0_i32 = arith.constant 0 : i32
    %c0_i32_0 = arith.constant 0 : i32
    %c0_i32_1 = arith.constant 0 : i32
    return %c0_i32, %c0_i32_0 : i32, i32
  }
  func.func @transform_1(%arg0: i32) -> (i32, i32) {
    %c0_i32 = arith.constant 0 : i32
    %c0_i32_0 = arith.constant 0 : i32
    %c0_i32_1 = arith.constant 0 : i32
    return %c0_i32, %c0_i32_0 : i32, i32
  }
  func.func @transform_2(%arg0: i32) -> (i32, i32) {
    %c0_i32 = arith.constant 0 : i32
    %c0_i32_0 = arith.constant 0 : i32
    %c0_i32_1 = arith.constant 0 : i32
    return %c0_i32, %c0_i32_0 : i32, i32
  }
  func.func @transform_3(%arg0: i32) -> (i32, i32) {
    %c0_i32 = arith.constant 0 : i32
    %c0_i32_0 = arith.constant 0 : i32
    %c0_i32_1 = arith.constant 0 : i32
    return %c0_i32, %c0_i32_0 : i32, i32
  }
}

</mosaic_0001>

<bundles_post_ra>
// kernel: dcnn_simple_forward.3
= control target key start
LH: loop header
LB: loop body
LE: loop exit
PB: predicated region body
PF: predicated region fallthrough
CT: control target
= control target key end

     0   :  { %s8635_s12 = smov 0   ;;  %s9549_s0 = inlined_call_operand.vmem [shape: bf16[4,3600,16], index: 0, kind: input, shape index: {}]   ;;  %s9550_s1 = inlined_call_operand.vmem [shape: bf16[144,128], index: 1, kind: input, shape index: {}]   ;;  %s9551_s2 = inlined_call_operand.vmem [shape: f32[1,128], index: 2, kind: input, shape index: {}]   ;;  %s9552_s3 = inlined_call_operand.vmem [shape: bf16[3456,128], index: 3, kind: output, shape index: {}]  }
   0x1 LB: > { %s5804_s13 = sadd.s32 4294967295, %s8611_s12   ;;  %p5807_p0 = scmp.ge.s32.totalorder %s8611_s12, 1  ;;  %s8611_s12 = sphi %s8635_s12, %s13_s12  }
   0x2   : > { %p127_p1 = scmp.lt.s32.totalorder %s8611_s12, 28 }
   0x4   : > { %p128_p2 = pnand %p5807_p0, %p127_p1 }
   0x5   : > { %v8398_v0 = vld [vmem:[%s9550_s1] sm:$0xff] (!%p128_p2)   ;;  %v8613_v1 = vmov (!%p128_p2), 0.0   ;;  %s8650_s16 = sshll.u32 (!%p128_p2), %s5804_s13, 7  ;;  %vm8614_vm0 = vmmov (!%p128_p2), 0   ;;  %vm268_vm1 = vcmask (!%p128_p2), 130048   ;;  %v8401_v2 = vld [vmem:[%s9550_s1 + $0x8] sm:$0xff] (!%p128_p2)  }
   0x6   : > { %131 = sbr.rel (%p128_p2) target bundleno = 1019 (0x3fb), region = 32  ;;  %6856 = vmatprep.subr.bf16.mxu0 (!%p128_p2), %v8613_v1  ;;  %6902 = vmatprep.subr.bf16.mxu1 (!%p128_p2), %v8613_v1  ;;  %s156_s17 = sshra.s32 (!%p128_p2), %s8650_s16, 3  ;;  %v8424_v27 = vld [vmem:[%s9550_s1 + $0x10] sm:$0xff] (!%p128_p2)   ;;  %v8447_v50 = vld [vmem:[%s9550_s1 + $0x18] sm:$0xff] (!%p128_p2)  }
   0x7   : > { %6857 = vmatpush3.bf16.msra.mxu0 (!%p128_p2), %v8398_v0  ;;  %6903 = vmatpush3.bf16.msra.mxu1 (!%p128_p2), %v8398_v0  ;;  %s5811_s18 = sshll.u32 (!%p128_p2), %s156_s17, 2  ;;  %s1886_s24 = sadd.s32 (!%p128_p2), 48, %s8650_s16 }
   0x8   : > { %6858 = vmatprep.mubr.msk.bf16.mxu0 (!%p128_p2), %vm8614_vm0, %v8613_v1  ;;  %6904 = vmatprep.mubr.msk.bf16.mxu1 (!%p128_p2), %vm8614_vm0, %v8613_v1  ;;  %s8662_s21 = scalar_lea.vmem (!%p128_p2), %s9549_s0, %s5811_s18  ;;  %s1889_s25 = sshra.s32 (!%p128_p2), %s1886_s24, 3 }
   0x9   : > { %6948 = vmatprep.subr.bf16.mxu0 (!%p128_p2), %v8613_v1  ;;  %6994 = vmatprep.subr.bf16.mxu1 (!%p128_p2), %v8613_v1  ;;  %v8399_v3 = vld [vmem:[%s8662_s21] sm:$0xff] (!%p128_p2)   ;;  %v8400_v4 = vld [vmem:[%s8662_s21 + $0x708] sm:$0xff] (!%p128_p2)   ;;  %v8403_v6 = vld [vmem:[%s8662_s21 + $0x710] sm:$0xff] (!%p128_p2)   ;;  %s6060_s26 = sshll.u32 (!%p128_p2), %s1889_s25, 2  ;;  %s3706_s5 = sadd.s32 (!%p128_p2), 96, %s8650_s16 }
   0xa   : > { %6859 = vmatmul.mubr.msk.bf16.vlgmr.msra.gmra.mrb[0].mxu0 (!%p128_p2), %vm268_vm1, %v8399_v3  ;;  %6905 = vmatmul.mubr.msk.bf16.vlgmr.msra.gmra.mrb[0].mxu1 (!%p128_p2), %vm268_vm1, %v8400_v4  ;;  %v8402_v5 = vld [vmem:[%s8662_s21 + $0x8] sm:$0xff] (!%p128_p2)   ;;  %v8404_v7 = vld [vmem:[%s8662_s21 + $0x10] sm:$0xff] (!%p128_p2)   ;;  %v8405_v8 = vld [vmem:[%s8662_s21 + $0x718] sm:$0xff] (!%p128_p2)   ;;  %s8732_s29 = scalar_lea.vmem (!%p128_p2), %s9549_s0, %s6060_s26  ;;  %s3709_s6 = sshra.s32 (!%p128_p2), %s3706_s5, 3 }
   0xb   : > { %6949 = vmatpush3.bf16.msra.mxu0 (!%p128_p2), %v8401_v2  ;;  %6995 = vmatpush3.bf16.msra.mxu1 (!%p128_p2), %v8401_v2  ;;  %v8406_v9 = vld [vmem:[%s8662_s21 + $0x18] sm:$0xff] (!%p128_p2)   ;;  %v8407_v10 = vld [vmem:[%s8662_s21 + $0x720] sm:$0xff] (!%p128_p2)   ;;  %v8409_v12 = vld [vmem:[%s8662_s21 + $0x728] sm:$0xff] (!%p128_p2)   ;;  %s6309_s7 = sshll.u32 (!%p128_p2), %s3709_s6, 2  ;;  %s5808_s25 = sshll.u32 (!%p128_p2), %s5804_s13, 4 }
   0xc   : > { %6862 = vmatprep.mubr.msk.bf16.mxu0 (!%p128_p2), %vm8614_vm0, %v8613_v1  ;;  %6908 = vmatprep.mubr.msk.bf16.mxu1 (!%p128_p2), %vm8614_vm0, %v8613_v1  ;;  %v8408_v11 = vld [vmem:[%s8662_s21 + $0x20] sm:$0xff] (!%p128_p2)   ;;  %v8410_v13 = vld [vmem:[%s8662_s21 + $0x28] sm:$0xff] (!%p128_p2)   ;;  %v8411_v14 = vld [vmem:[%s8662_s21 + $0x730] sm:$0xff] (!%p128_p2)   ;;  %s8797_s10 = scalar_lea.vmem (!%p128_p2), %s9549_s0, %s6309_s7  ;;  %p147_p3 = scmp.lt.s32.totalorder (!%p128_p2), %s5808_s25, 431 }
   0xd   : > { %7040 = vmatprep.subr.bf16.mxu0 %v8613_v1  ;;  %7086 = vmatprep.subr.bf16.mxu1 %v8613_v1  ;;  %v8412_v15 = vld [vmem:[%s8662_s21 + $0x30] sm:$0xff]   ;;  %v8413_v16 = vld [vmem:[%s8662_s21 + $0x738] sm:$0xff]   ;;  %v8415_v18 = vld [vmem:[%s8662_s21 + $0x740] sm:$0xff]  }
   0xe   : > { %v8414_v17 = vld [vmem:[%s8662_s21 + $0x38] sm:$0xff]   ;;  %v8416_v19 = vld [vmem:[%s8662_s21 + $0x40] sm:$0xff]   ;;  %v8417_v20 = vld [vmem:[%s8662_s21 + $0x748] sm:$0xff]   ;;  %s9554_s25 = smov (!%p147_p3, %s5808_s25), 431 }
   0xf   : > { %v8418_v21 = vld [vmem:[%s8662_s21 + $0x48] sm:$0xff]   ;;  %v8419_v22 = vld [vmem:[%s8662_s21 + $0x750] sm:$0xff]   ;;  %v8421_v24 = vld [vmem:[%s8662_s21 + $0x758] sm:$0xff]   ;;  %s5809_s13 = sshll.u32 %s9554_s25, 2 }
  0x10   : > { %v8420_v23 = vld [vmem:[%s8662_s21 + $0x50] sm:$0xff]   ;;  %v8422_v25 = vld [vmem:[%s8662_s21 + $0x708] sm:$0xff]   ;;  %v8426_v29 = vld [vmem:[%s8662_s21 + $0xe18] sm:$0xff]   ;;  %s9519_s30 = scalar_lea.vmem %s9552_s3, %s5809_s13 }
  0x11   : > { %v8423_v26 = vld [vmem:[%s8662_s21 + $0xe10] sm:$0xff]   ;;  %v8427_v30 = vld [vmem:[%s8662_s21 + $0x718] sm:$0xff]   ;;  %v8428_v31 = vld [vmem:[%s8662_s21 + $0xe20] sm:$0xff]  }
  0x12   : > { %6863 = vmatmul.mubr.msk.bf16.gmra.mrb[4].mxu0 %vm268_vm1, %v8402_v5  ;;  %6909 = vmatmul.mubr.msk.bf16.gmra.mrb[4].mxu1 %vm268_vm1, %v8403_v6  ;;  %v8425_v28 = vld [vmem:[%s8662_s21 + $0x710] sm:$0xff]   ;;  %v8429_v32 = vld [vmem:[%s8662_s21 + $0x720] sm:$0xff]   ;;  %v8430_v33 = vld [vmem:[%s8662_s21 + $0xe28] sm:$0xff]  }
  0x13   : > { %6866 = vmatprep.mubr.msk.bf16.mxu0 %vm8614_vm0, %v8613_v1  ;;  %6912 = vmatprep.mubr.msk.bf16.mxu1 %vm8614_vm0, %v8613_v1  ;;  %v8431_v34 = vld [vmem:[%s8662_s21 + $0x728] sm:$0xff]   ;;  %v8432_v35 = vld [vmem:[%s8662_s21 + $0xe30] sm:$0xff]   ;;  %v8434_v37 = vld [vmem:[%s8662_s21 + $0xe38] sm:$0xff]  }
  0x14   : > { %v8433_v36 = vld [vmem:[%s8662_s21 + $0x730] sm:$0xff]   ;;  %v8435_v38 = vld [vmem:[%s8662_s21 + $0x738] sm:$0xff]   ;;  %v8436_v39 = vld [vmem:[%s8662_s21 + $0xe40] sm:$0xff]  }
  0x15   : > { %v8437_v40 = vld [vmem:[%s8662_s21 + $0x740] sm:$0xff]   ;;  %v8438_v41 = vld [vmem:[%s8662_s21 + $0xe48] sm:$0xff]   ;;  %v8440_v43 = vld [vmem:[%s8662_s21 + $0xe50] sm:$0xff]  }
  0x16   : > { %v8439_v42 = vld [vmem:[%s8662_s21 + $0x748] sm:$0xff]   ;;  %v8441_v44 = vld [vmem:[%s8662_s21 + $0x750] sm:$0xff]   ;;  %v8442_v45 = vld [vmem:[%s8662_s21 + $0xe58] sm:$0xff]  }
  0x17   : > { %v8443_v46 = vld [vmem:[%s8662_s21 + $0x758] sm:$0xff]   ;;  %v8444_v47 = vld [vmem:[%s8662_s21 + $0xe60] sm:$0xff]   ;;  %v8445_v48 = vld [vmem:[%s8662_s21 + $0xe10] sm:$0xff]  }
  0x18   : > { %v8446_v49 = vld [vmem:[%s8662_s21 + $0x1518] sm:$0xff]   ;;  %v8449_v52 = vld [vmem:[%s8662_s21 + $0x1520] sm:$0xff]   ;;  %v8451_v54 = vld [vmem:[%s8662_s21 + $0x1528] sm:$0xff]  }
  0x19   : > { %v8448_v51 = vld [vmem:[%s8662_s21 + $0xe18] sm:$0xff]   ;;  %v8450_v53 = vld [vmem:[%s8662_s21 + $0xe20] sm:$0xff]   ;;  %v8452_v55 = vld [vmem:[%s8662_s21 + $0xe28] sm:$0xff]  }
  0x1a   : > { %6867 = vmatmul.mubr.msk.bf16.gmra.mrb[8].mxu0 %vm268_vm1, %v8404_v7  ;;  %6913 = vmatmul.mubr.msk.bf16.gmra.mrb[8].mxu1 %vm268_vm1, %v8405_v8  ;;  %v8453_v56 = vld [vmem:[%s8662_s21 + $0x1530] sm:$0xff]   ;;  %v8455_v58 = vld [vmem:[%s8662_s21 + $0x1538] sm:$0xff]   ;;  %v8457_v60 = vld [vmem:[%s8662_s21 + $0x1540] sm:$0xff]  }
  0x1b   : > { %6870 = vmatprep.mubr.msk.bf16.mxu0 %vm8614_vm0, %v8613_v1  ;;  %6916 = vmatprep.mubr.msk.bf16.mxu1 %vm8614_vm0, %v8613_v1  ;;  %v8454_v57 = vld [vmem:[%s8662_s21 + $0xe30] sm:$0xff]   ;;  %v8456_v59 = vld [vmem:[%s8662_s21 + $0xe38] sm:$0xff]   ;;  %v8458_v61 = vld [vmem:[%s8662_s21 + $0xe40] sm:$0xff]  }
  0x1c   : > { %v8459_v62 = vld [vmem:[%s8662_s21 + $0x1548] sm:$0xff]   ;;  %v8461_v0 = vld [vmem:[%s8662_s21 + $0x1550] sm:$0xff]   ;;  %v8463_v3 = vld [vmem:[%s8662_s21 + $0x1558] sm:$0xff]  }
  0x1d   : > { %v8460_v63 = vld [vmem:[%s8662_s21 + $0xe48] sm:$0xff]   ;;  %v8462_v2 = vld [vmem:[%s8662_s21 + $0xe50] sm:$0xff]   ;;  %v8464_v4 = vld [vmem:[%s8662_s21 + $0xe58] sm:$0xff]  }
  0x1e   : > { %v8465_v5 = vld [vmem:[%s8662_s21 + $0x1560] sm:$0xff]   ;;  %v8467_v7 = vld [vmem:[%s8662_s21 + $0x1568] sm:$0xff]  }
  0x1f   : > { %v8466_v6 = vld [vmem:[%s8662_s21 + $0xe60] sm:$0xff]  }
  0x20   : > { %v8468_v8 = vld [vmem:[%s8732_s29] sm:$0xff]  }
  0x22   : > { %6871 = vmatmul.mubr.msk.bf16.gmra.mrb[12].mxu0 %vm268_vm1, %v8406_v9  ;;  %6917 = vmatmul.mubr.msk.bf16.gmra.mrb[12].mxu1 %vm268_vm1, %v8407_v10  ;;  %v8469_v9 = vld [vmem:[%s8732_s29 + $0x708] sm:$0xff]   ;;  %v8470_v10 = vld [vmem:[%s9550_s1 + $0x20] sm:$0xff]  }
  0x23   : > { %6874 = vmatprep.mubr.msk.bf16.mxu0 %vm8614_vm0, %v8613_v1  ;;  %6920 = vmatprep.mubr.msk.bf16.mxu1 %vm8614_vm0, %v8613_v1 }
  0x2a   : > { %6875 = vmatmul.mubr.msk.bf16.gmra.mrb[16].mxu0 %vm268_vm1, %v8408_v11  ;;  %6921 = vmatmul.mubr.msk.bf16.gmra.mrb[16].mxu1 %vm268_vm1, %v8409_v12  ;;  %v8471_v11 = vld [vmem:[%s8732_s29 + $0x8] sm:$0xff]   ;;  %v8472_v12 = vld [vmem:[%s8732_s29 + $0x710] sm:$0xff]  }
  0x2b   : > { %6878 = vmatprep.mubr.msk.bf16.mxu0 %vm8614_vm0, %v8613_v1  ;;  %6924 = vmatprep.mubr.msk.bf16.mxu1 %vm8614_vm0, %v8613_v1 }
  0x32   : > { %6879 = vmatmul.mubr.msk.bf16.gmra.mrb[20].mxu0 %vm268_vm1, %v8410_v13  ;;  %6925 = vmatmul.mubr.msk.bf16.gmra.mrb[20].mxu1 %vm268_vm1, %v8411_v14  ;;  %v8473_v13 = vld [vmem:[%s8732_s29 + $0x10] sm:$0xff]   ;;  %v8474_v14 = vld [vmem:[%s8732_s29 + $0x718] sm:$0xff]  }
  0x33   : > { %6882 = vmatprep.mubr.msk.bf16.mxu0 %vm8614_vm0, %v8613_v1  ;;  %6928 = vmatprep.mubr.msk.bf16.mxu1 %vm8614_vm0, %v8613_v1 }
  0x3a   : > { %6883 = vmatmul.mubr.msk.bf16.gmra.mrb[24].mxu0 %vm268_vm1, %v8412_v15  ;;  %6929 = vmatmul.mubr.msk.bf16.gmra.mrb[24].mxu1 %vm268_vm1, %v8413_v16  ;;  %v8475_v15 = vld [vmem:[%s8732_s29 + $0x18] sm:$0xff]   ;;  %v8476_v16 = vld [vmem:[%s8732_s29 + $0x720] sm:$0xff]  }
  0x3b   : > { %6886 = vmatprep.mubr.msk.bf16.mxu0 %vm8614_vm0, %v8613_v1  ;;  %6932 = vmatprep.mubr.msk.bf16.mxu1 %vm8614_vm0, %v8613_v1 }
  0x42   : > { %6887 = vmatmul.mubr.msk.bf16.gmra.mrb[28].mxu0 %vm268_vm1, %v8414_v17  ;;  %6933 = vmatmul.mubr.msk.bf16.gmra.mrb[28].mxu1 %vm268_vm1, %v8415_v18  ;;  %v8477_v17 = vld [vmem:[%s8732_s29 + $0x20] sm:$0xff]   ;;  %v8478_v18 = vld [vmem:[%s8732_s29 + $0x728] sm:$0xff]  }
  0x43   : > { %6890 = vmatprep.mubr.msk.bf16.mxu0 %vm8614_vm0, %v8613_v1  ;;  %6936 = vmatprep.mubr.msk.bf16.mxu1 %vm8614_vm0, %v8613_v1 }
  0x4a   : > { %6891 = vmatmul.mubr.msk.bf16.gmra.mrb[32].mxu0 %vm268_vm1, %v8416_v19  ;;  %6937 = vmatmul.mubr.msk.bf16.gmra.mrb[32].mxu1 %vm268_vm1, %v8417_v20  ;;  %v8479_v19 = vld [vmem:[%s8732_s29 + $0x28] sm:$0xff]   ;;  %v8480_v20 = vld [vmem:[%s8732_s29 + $0x730] sm:$0xff]  }
  0x4b   : > { %6894 = vmatprep.mubr.msk.bf16.mxu0 %vm8614_vm0, %v8613_v1  ;;  %6940 = vmatprep.mubr.msk.bf16.mxu1 %vm8614_vm0, %v8613_v1 }
  0x52   : > { %6895 = vmatmul.mubr.msk.bf16.gmra.mrb[36].mxu0 %vm268_vm1, %v8418_v21  ;;  %6941 = vmatmul.mubr.msk.bf16.gmra.mrb[36].mxu1 %vm268_vm1, %v8419_v22  ;;  %v8481_v21 = vld [vmem:[%s8732_s29 + $0x30] sm:$0xff]   ;;  %v8482_v22 = vld [vmem:[%s8732_s29 + $0x738] sm:$0xff]  }
  0x53   : > { %6898 = vmatprep.mubr.msk.bf16.mxu0 %vm8614_vm0, %v8613_v1  ;;  %6944 = vmatprep.mubr.msk.bf16.mxu1 %vm8614_vm0, %v8613_v1 }
  0x5a   : > { %6899 = vmatmul.mubr.msk.bf16.gmra.mrb[40].mxu0 %vm268_vm1, %v8420_v23  ;;  %6945 = vmatmul.mubr.msk.bf16.gmra.mrb[40].mxu1 %vm268_vm1, %v8421_v24  ;;  %v8483_v23 = vld [vmem:[%s8732_s29 + $0x38] sm:$0xff]   ;;  %v8484_v24 = vld [vmem:[%s8732_s29 + $0x740] sm:$0xff]  }
  0x5b   : > { %6950 = vmatprep.mubr.msk.bf16.mxu0 %vm8614_vm0, %v8613_v1  ;;  %6996 = vmatprep.mubr.msk.bf16.mxu1 %vm8614_vm0, %v8613_v1 }
  0x62   : > { %6951 = vmatmul.mubr.msk.bf16.vlgmr.msra.gmra.mrb[0].mxu0 %vm268_vm1, %v8422_v25  ;;  %6997 = vmatmul.mubr.msk.bf16.vlgmr.msra.gmra.mrb[0].mxu1 %vm268_vm1, %v8423_v26  ;;  %v8485_v25 = vld [vmem:[%s8732_s29 + $0x40] sm:$0xff]   ;;  %v8486_v26 = vld [vmem:[%s8732_s29 + $0x748] sm:$0xff]  }
  0x63   : > { %7041 = vmatpush3.bf16.msra.mxu0 %v8424_v27  ;;  %7087 = vmatpush3.bf16.msra.mxu1 %v8424_v27  ;;  %v8487_v27 = vld [vmem:[%s8732_s29 + $0x48] sm:$0xff]  }
  0x64   : > { %6954 = vmatprep.mubr.msk.bf16.mxu0 %vm8614_vm0, %v8613_v1  ;;  %7000 = vmatprep.mubr.msk.bf16.mxu1 %vm8614_vm0, %v8613_v1 }
  0x65   : > { %7132 = vmatprep.subr.bf16.mxu0 %v8613_v1  ;;  %7178 = vmatprep.subr.bf16.mxu1 %v8613_v1 }
  0x6a   : > { %6955 = vmatmul.mubr.msk.bf16.gmra.mrb[4].mxu0 %vm268_vm1, %v8425_v28  ;;  %7001 = vmatmul.mubr.msk.bf16.gmra.mrb[4].mxu1 %vm268_vm1, %v8426_v29  ;;  %v8488_v28 = vld [vmem:[%s8732_s29 + $0x750] sm:$0xff]  }
  0x6b   : > { %6958 = vmatprep.mubr.msk.bf16.mxu0 %vm8614_vm0, %v8613_v1  ;;  %7004 = vmatprep.mubr.msk.bf16.mxu1 %vm8614_vm0, %v8613_v1  ;;  %v8489_v29 = vld [vmem:[%s8732_s29 + $0x50] sm:$0xff]  }
  0x72   : > { %6959 = vmatmul.mubr.msk.bf16.gmra.mrb[8].mxu0 %vm268_vm1, %v8427_v30  ;;  %7005 = vmatmul.mubr.msk.bf16.gmra.mrb[8].mxu1 %vm268_vm1, %v8428_v31  ;;  %v8490_v30 = vld [vmem:[%s8732_s29 + $0x758] sm:$0xff]   ;;  %v8491_v31 = vld [vmem:[%s8732_s29 + $0x708] sm:$0xff]  }
  0x73   : > { %6962 = vmatprep.mubr.msk.bf16.mxu0 %vm8614_vm0, %v8613_v1  ;;  %7008 = vmatprep.mubr.msk.bf16.mxu1 %vm8614_vm0, %v8613_v1 }
  0x7a   : > { %6963 = vmatmul.mubr.msk.bf16.gmra.mrb[12].mxu0 %vm268_vm1, %v8429_v32  ;;  %7009 = vmatmul.mubr.msk.bf16.gmra.mrb[12].mxu1 %vm268_vm1, %v8430_v33  ;;  %v8492_v32 = vld [vmem:[%s8732_s29 + $0xe10] sm:$0xff]   ;;  %v8493_v33 = vld [vmem:[%s9550_s1 + $0x28] sm:$0xff]  }
  0x7b   : > { %6966 = vmatprep.mubr.msk.bf16.mxu0 %vm8614_vm0, %v8613_v1  ;;  %7012 = vmatprep.mubr.msk.bf16.mxu1 %vm8614_vm0, %v8613_v1 }
  0x82   : > { %6967 = vmatmul.mubr.msk.bf16.gmra.mrb[16].mxu0 %vm268_vm1, %v8431_v34  ;;  %7013 = vmatmul.mubr.msk.bf16.gmra.mrb[16].mxu1 %vm268_vm1, %v8432_v35  ;;  %v8494_v34 = vld [vmem:[%s8732_s29 + $0x710] sm:$0xff]   ;;  %v8495_v35 = vld [vmem:[%s8732_s29 + $0xe18] sm:$0xff]  }
  0x83   : > { %6970 = vmatprep.mubr.msk.bf16.mxu0 %vm8614_vm0, %v8613_v1  ;;  %7016 = vmatprep.mubr.msk.bf16.mxu1 %vm8614_vm0, %v8613_v1 }
  0x8a   : > { %6971 = vmatmul.mubr.msk.bf16.gmra.mrb[20].mxu0 %vm268_vm1, %v8433_v36  ;;  %7017 = vmatmul.mubr.msk.bf16.gmra.mrb[20].mxu1 %vm268_vm1, %v8434_v37  ;;  %v8496_v36 = vld [vmem:[%s8732_s29 + $0x718] sm:$0xff]   ;;  %v8497_v37 = vld [vmem:[%s8732_s29 + $0xe20] sm:$0xff]  }
  0x8b   : > { %6974 = vmatprep.mubr.msk.bf16.mxu0 %vm8614_vm0, %v8613_v1  ;;  %7020 = vmatprep.mubr.msk.bf16.mxu1 %vm8614_vm0, %v8613_v1 }
  0x92   : > { %6975 = vmatmul.mubr.msk.bf16.gmra.mrb[24].mxu0 %vm268_vm1, %v8435_v38  ;;  %7021 = vmatmul.mubr.msk.bf16.gmra.mrb[24].mxu1 %vm268_vm1, %v8436_v39  ;;  %v8498_v38 = vld [vmem:[%s8732_s29 + $0x720] sm:$0xff]   ;;  %v8499_v39 = vld [vmem:[%s8732_s29 + $0xe28] sm:$0xff]  }
  0x93   : > { %6978 = vmatprep.mubr.msk.bf16.mxu0 %vm8614_vm0, %v8613_v1  ;;  %7024 = vmatprep.mubr.msk.bf16.mxu1 %vm8614_vm0, %v8613_v1 }
  0x9a   : > { %6979 = vmatmul.mubr.msk.bf16.gmra.mrb[28].mxu0 %vm268_vm1, %v8437_v40  ;;  %7025 = vmatmul.mubr.msk.bf16.gmra.mrb[28].mxu1 %vm268_vm1, %v8438_v41  ;;  %v8500_v40 = vld [vmem:[%s8732_s29 + $0x728] sm:$0xff]   ;;  %v8501_v41 = vld [vmem:[%s8732_s29 + $0xe30] sm:$0xff]  }
  0x9b   : > { %6982 = vmatprep.mubr.msk.bf16.mxu0 %vm8614_vm0, %v8613_v1  ;;  %7028 = vmatprep.mubr.msk.bf16.mxu1 %vm8614_vm0, %v8613_v1 }
  0xa2   : > { %6983 = vmatmul.mubr.msk.bf16.gmra.mrb[32].mxu0 %vm268_vm1, %v8439_v42  ;;  %7029 = vmatmul.mubr.msk.bf16.gmra.mrb[32].mxu1 %vm268_vm1, %v8440_v43  ;;  %v8502_v42 = vld [vmem:[%s8732_s29 + $0x730] sm:$0xff]   ;;  %v8503_v43 = vld [vmem:[%s8732_s29 + $0xe38] sm:$0xff]  }
  0xa3   : > { %6986 = vmatprep.mubr.msk.bf16.mxu0 %vm8614_vm0, %v8613_v1  ;;  %7032 = vmatprep.mubr.msk.bf16.mxu1 %vm8614_vm0, %v8613_v1 }
  0xaa   : > { %6987 = vmatmul.mubr.msk.bf16.gmra.mrb[36].mxu0 %vm268_vm1, %v8441_v44  ;;  %7033 = vmatmul.mubr.msk.bf16.gmra.mrb[36].mxu1 %vm268_vm1, %v8442_v45  ;;  %v8504_v44 = vld [vmem:[%s8732_s29 + $0x738] sm:$0xff]   ;;  %v8505_v45 = vld [vmem:[%s8732_s29 + $0xe40] sm:$0xff]  }
  0xab   : > { %6990 = vmatprep.mubr.msk.bf16.mxu0 %vm8614_vm0, %v8613_v1  ;;  %7036 = vmatprep.mubr.msk.bf16.mxu1 %vm8614_vm0, %v8613_v1 }
  0xb2   : > { %6991 = vmatmul.mubr.msk.bf16.gmra.mrb[40].mxu0 %vm268_vm1, %v8443_v46  ;;  %7037 = vmatmul.mubr.msk.bf16.gmra.mrb[40].mxu1 %vm268_vm1, %v8444_v47  ;;  %v8506_v46 = vld [vmem:[%s8732_s29 + $0x740] sm:$0xff]   ;;  %v8507_v47 = vld [vmem:[%s8732_s29 + $0xe48] sm:$0xff]  }
  0xb3   : > { %7042 = vmatprep.mubr.msk.bf16.mxu0 %vm8614_vm0, %v8613_v1  ;;  %7088 = vmatprep.mubr.msk.bf16.mxu1 %vm8614_vm0, %v8613_v1 }
  0xba   : > { %7043 = vmatmul.mubr.msk.bf16.vlgmr.msra.gmra.mrb[0].mxu0 %vm268_vm1, %v8445_v48  ;;  %7089 = vmatmul.mubr.msk.bf16.vlgmr.msra.gmra.mrb[0].mxu1 %vm268_vm1, %v8446_v49  ;;  %v8508_v48 = vld [vmem:[%s8732_s29 + $0x748] sm:$0xff]   ;;  %v8509_v49 = vld [vmem:[%s8732_s29 + $0xe50] sm:$0xff]  }
  0xbb   : > { %7133 = vmatpush3.bf16.msra.mxu0 %v8447_v50  ;;  %7179 = vmatpush3.bf16.msra.mxu1 %v8447_v50  ;;  %v8510_v50 = vld [vmem:[%s8732_s29 + $0x750] sm:$0xff]  }
  0xbc   : > { %7046 = vmatprep.mubr.msk.bf16.mxu0 %vm8614_vm0, %v8613_v1  ;;  %7092 = vmatprep.mubr.msk.bf16.mxu1 %vm8614_vm0, %v8613_v1 }
  0xbd   : > { %7224 = vmatprep.subr.bf16.mxu0 %v8613_v1  ;;  %7270 = vmatprep.subr.bf16.mxu1 %v8613_v1 }
  0xc2   : > { %7047 = vmatmul.mubr.msk.bf16.gmra.mrb[4].mxu0 %vm268_vm1, %v8448_v51  ;;  %7093 = vmatmul.mubr.msk.bf16.gmra.mrb[4].mxu1 %vm268_vm1, %v8449_v52  ;;  %v8511_v51 = vld [vmem:[%s8732_s29 + $0xe58] sm:$0xff]  }
  0xc3   : > { %7050 = vmatprep.mubr.msk.bf16.mxu0 %vm8614_vm0, %v8613_v1  ;;  %7096 = vmatprep.mubr.msk.bf16.mxu1 %vm8614_vm0, %v8613_v1  ;;  %v8512_v52 = vld [vmem:[%s8732_s29 + $0x758] sm:$0xff]  }
  0xca   : > { %7051 = vmatmul.mubr.msk.bf16.gmra.mrb[8].mxu0 %vm268_vm1, %v8450_v53  ;;  %7097 = vmatmul.mubr.msk.bf16.gmra.mrb[8].mxu1 %vm268_vm1, %v8451_v54  ;;  %v8513_v53 = vld [vmem:[%s8732_s29 + $0xe60] sm:$0xff]   ;;  %v8514_v54 = vld [vmem:[%s8732_s29 + $0xe10] sm:$0xff]  }
  0xcb   : > { %7054 = vmatprep.mubr.msk.bf16.mxu0 %vm8614_vm0, %v8613_v1  ;;  %7100 = vmatprep.mubr.msk.bf16.mxu1 %vm8614_vm0, %v8613_v1 }
  0xd2   : > { %7055 = vmatmul.mubr.msk.bf16.gmra.mrb[12].mxu0 %vm268_vm1, %v8452_v55  ;;  %7101 = vmatmul.mubr.msk.bf16.gmra.mrb[12].mxu1 %vm268_vm1, %v8453_v56  ;;  %v8515_v55 = vld [vmem:[%s8732_s29 + $0x1518] sm:$0xff]   ;;  %v8516_v56 = vld [vmem:[%s9550_s1 + $0x30] sm:$0xff]  }
  0xd3   : > { %7058 = vmatprep.mubr.msk.bf16.mxu0 %vm8614_vm0, %v8613_v1  ;;  %7104 = vmatprep.mubr.msk.bf16.mxu1 %vm8614_vm0, %v8613_v1 }
  0xda   : > { %7059 = vmatmul.mubr.msk.bf16.gmra.mrb[16].mxu0 %vm268_vm1, %v8454_v57  ;;  %7105 = vmatmul.mubr.msk.bf16.gmra.mrb[16].mxu1 %vm268_vm1, %v8455_v58  ;;  %v8517_v57 = vld [vmem:[%s8732_s29 + $0xe18] sm:$0xff]   ;;  %v8518_v58 = vld [vmem:[%s8732_s29 + $0x1520] sm:$0xff]  }
  0xdb   : > { %7062 = vmatprep.mubr.msk.bf16.mxu0 %vm8614_vm0, %v8613_v1  ;;  %7108 = vmatprep.mubr.msk.bf16.mxu1 %vm8614_vm0, %v8613_v1 }
  0xe2   : > { %7063 = vmatmul.mubr.msk.bf16.gmra.mrb[20].mxu0 %vm268_vm1, %v8456_v59  ;;  %7109 = vmatmul.mubr.msk.bf16.gmra.mrb[20].mxu1 %vm268_vm1, %v8457_v60  ;;  %v8519_v59 = vld [vmem:[%s8732_s29 + $0xe20] sm:$0xff]   ;;  %v8520_v60 = vld [vmem:[%s8732_s29 + $0x1528] sm:$0xff]  }
  0xe3   : > { %7066 = vmatprep.mubr.msk.bf16.mxu0 %vm8614_vm0, %v8613_v1  ;;  %7112 = vmatprep.mubr.msk.bf16.mxu1 %vm8614_vm0, %v8613_v1 }
  0xea   : > { %7067 = vmatmul.mubr.msk.bf16.gmra.mrb[24].mxu0 %vm268_vm1, %v8458_v61  ;;  %7113 = vmatmul.mubr.msk.bf16.gmra.mrb[24].mxu1 %vm268_vm1, %v8459_v62  ;;  %v8521_v61 = vld [vmem:[%s8732_s29 + $0xe28] sm:$0xff]   ;;  %v8522_v62 = vld [vmem:[%s8732_s29 + $0x1530] sm:$0xff]  }
  0xeb   : > { %7070 = vmatprep.mubr.msk.bf16.mxu0 %vm8614_vm0, %v8613_v1  ;;  %7116 = vmatprep.mubr.msk.bf16.mxu1 %vm8614_vm0, %v8613_v1 }
  0xf2   : > { %7071 = vmatmul.mubr.msk.bf16.gmra.mrb[28].mxu0 %vm268_vm1, %v8460_v63  ;;  %7117 = vmatmul.mubr.msk.bf16.gmra.mrb[28].mxu1 %vm268_vm1, %v8461_v0  ;;  %v8523_v63 = vld [vmem:[%s8732_s29 + $0xe30] sm:$0xff]   ;;  %v8524_v0 = vld [vmem:[%s8732_s29 + $0x1538] sm:$0xff]  }
  0xf3   : > { %7074 = vmatprep.mubr.msk.bf16.mxu0 %vm8614_vm0, %v8613_v1  ;;  %7120 = vmatprep.mubr.msk.bf16.mxu1 %vm8614_vm0, %v8613_v1 }
  0xfa   : > { %7075 = vmatmul.mubr.msk.bf16.gmra.mrb[32].mxu0 %vm268_vm1, %v8462_v2  ;;  %7121 = vmatmul.mubr.msk.bf16.gmra.mrb[32].mxu1 %vm268_vm1, %v8463_v3  ;;  %v8525_v2 = vld [vmem:[%s8732_s29 + $0xe38] sm:$0xff]   ;;  %v8526_v3 = vld [vmem:[%s8732_s29 + $0x1540] sm:$0xff]  }
  0xfb   : > { %7078 = vmatprep.mubr.msk.bf16.mxu0 %vm8614_vm0, %v8613_v1  ;;  %7124 = vmatprep.mubr.msk.bf16.mxu1 %vm8614_vm0, %v8613_v1 }
 0x102   : > { %7079 = vmatmul.mubr.msk.bf16.gmra.mrb[36].mxu0 %vm268_vm1, %v8464_v4  ;;  %7125 = vmatmul.mubr.msk.bf16.gmra.mrb[36].mxu1 %vm268_vm1, %v8465_v5  ;;  %v8527_v4 = vld [vmem:[%s8732_s29 + $0xe40] sm:$0xff]   ;;  %v8528_v5 = vld [vmem:[%s8732_s29 + $0x1548] sm:$0xff]  }
 0x103   : > { %7082 = vmatprep.mubr.msk.bf16.mxu0 %vm8614_vm0, %v8613_v1  ;;  %7128 = vmatprep.mubr.msk.bf16.mxu1 %vm8614_vm0, %v8613_v1 }
 0x10a   : > { %7083 = vmatmul.mubr.msk.bf16.gmra.mrb[40].mxu0 %vm268_vm1, %v8466_v6  ;;  %7129 = vmatmul.mubr.msk.bf16.gmra.mrb[40].mxu1 %vm268_vm1, %v8467_v7  ;;  %v8529_v6 = vld [vmem:[%s8732_s29 + $0xe48] sm:$0xff]   ;;  %v8530_v7 = vld [vmem:[%s8732_s29 + $0x1550] sm:$0xff]  }
 0x10b   : > { %7134 = vmatprep.mubr.msk.bf16.mxu0 %vm8614_vm0, %v8613_v1  ;;  %7180 = vmatprep.mubr.msk.bf16.mxu1 %vm8614_vm0, %v8613_v1 }
 0x112   : > { %7135 = vmatmul.mubr.msk.bf16.vlgmr.msra.gmra.mrb[0].mxu0 %vm268_vm1, %v8468_v8  ;;  %7181 = vmatmul.mubr.msk.bf16.vlgmr.msra.gmra.mrb[0].mxu1 %vm268_vm1, %v8469_v9  ;;  %v8531_v8 = vld [vmem:[%s8732_s29 + $0xe50] sm:$0xff]   ;;  %v8532_v9 = vld [vmem:[%s8732_s29 + $0x1558] sm:$0xff]  }
 0x113   : > { %7225 = vmatpush3.bf16.msra.mxu0 %v8470_v10  ;;  %7271 = vmatpush3.bf16.msra.mxu1 %v8470_v10  ;;  %v8533_v10 = vld [vmem:[%s8732_s29 + $0xe58] sm:$0xff]  }
 0x114   : > { %7138 = vmatprep.mubr.msk.bf16.mxu0 %vm8614_vm0, %v8613_v1  ;;  %7184 = vmatprep.mubr.msk.bf16.mxu1 %vm8614_vm0, %v8613_v1 }
 0x115   : > { %7316 = vmatprep.subr.bf16.mxu0 %v8613_v1  ;;  %7362 = vmatprep.subr.bf16.mxu1 %v8613_v1 }
 0x11a   : > { %7139 = vmatmul.mubr.msk.bf16.gmra.mrb[4].mxu0 %vm268_vm1, %v8471_v11  ;;  %7185 = vmatmul.mubr.msk.bf16.gmra.mrb[4].mxu1 %vm268_vm1, %v8472_v12  ;;  %v8534_v11 = vld [vmem:[%s8732_s29 + $0x1560] sm:$0xff]  }
 0x11b   : > { %7142 = vmatprep.mubr.msk.bf16.mxu0 %vm8614_vm0, %v8613_v1  ;;  %7188 = vmatprep.mubr.msk.bf16.mxu1 %vm8614_vm0, %v8613_v1  ;;  %v8535_v12 = vld [vmem:[%s8732_s29 + $0xe60] sm:$0xff]  }
 0x122   : > { %7143 = vmatmul.mubr.msk.bf16.gmra.mrb[8].mxu0 %vm268_vm1, %v8473_v13  ;;  %7189 = vmatmul.mubr.msk.bf16.gmra.mrb[8].mxu1 %vm268_vm1, %v8474_v14  ;;  %v8536_v13 = vld [vmem:[%s8732_s29 + $0x1568] sm:$0xff]   ;;  %v8537_v14 = vld [vmem:[%s8797_s10] sm:$0xff]  }
 0x123   : > { %7146 = vmatprep.mubr.msk.bf16.mxu0 %vm8614_vm0, %v8613_v1  ;;  %7192 = vmatprep.mubr.msk.bf16.mxu1 %vm8614_vm0, %v8613_v1 }
 0x12a   : > { %7147 = vmatmul.mubr.msk.bf16.gmra.mrb[12].mxu0 %vm268_vm1, %v8475_v15  ;;  %7193 = vmatmul.mubr.msk.bf16.gmra.mrb[12].mxu1 %vm268_vm1, %v8476_v16  ;;  %v8538_v15 = vld [vmem:[%s8797_s10 + $0x708] sm:$0xff]   ;;  %v8539_v16 = vld [vmem:[%s9550_s1 + $0x38] sm:$0xff]  }
 0x12b   : > { %7150 = vmatprep.mubr.msk.bf16.mxu0 %vm8614_vm0, %v8613_v1  ;;  %7196 = vmatprep.mubr.msk.bf16.mxu1 %vm8614_vm0, %v8613_v1 }
 0x132   : > { %7151 = vmatmul.mubr.msk.bf16.gmra.mrb[16].mxu0 %vm268_vm1, %v8477_v17  ;;  %7197 = vmatmul.mubr.msk.bf16.gmra.mrb[16].mxu1 %vm268_vm1, %v8478_v18  ;;  %v8540_v17 = vld [vmem:[%s8797_s10 + $0x8] sm:$0xff]   ;;  %v8541_v18 = vld [vmem:[%s8797_s10 + $0x710] sm:$0xff]  }
 0x133   : > { %7154 = vmatprep.mubr.msk.bf16.mxu0 %vm8614_vm0, %v8613_v1  ;;  %7200 = vmatprep.mubr.msk.bf16.mxu1 %vm8614_vm0, %v8613_v1 }
 0x13a   : > { %7155 = vmatmul.mubr.msk.bf16.gmra.mrb[20].mxu0 %vm268_vm1, %v8479_v19  ;;  %7201 = vmatmul.mubr.msk.bf16.gmra.mrb[20].mxu1 %vm268_vm1, %v8480_v20  ;;  %v8542_v19 = vld [vmem:[%s8797_s10 + $0x10] sm:$0xff]   ;;  %v8543_v20 = vld [vmem:[%s8797_s10 + $0x718] sm:$0xff]  }
 0x13b   : > { %7158 = vmatprep.mubr.msk.bf16.mxu0 %vm8614_vm0, %v8613_v1  ;;  %7204 = vmatprep.mubr.msk.bf16.mxu1 %vm8614_vm0, %v8613_v1 }
 0x142   : > { %7159 = vmatmul.mubr.msk.bf16.gmra.mrb[24].mxu0 %vm268_vm1, %v8481_v21  ;;  %7205 = vmatmul.mubr.msk.bf16.gmra.mrb[24].mxu1 %vm268_vm1, %v8482_v22  ;;  %v8544_v21 = vld [vmem:[%s8797_s10 + $0x18] sm:$0xff]   ;;  %v8545_v22 = vld [vmem:[%s8797_s10 + $0x720] sm:$0xff]  }
 0x143   : > { %7162 = vmatprep.mubr.msk.bf16.mxu0 %vm8614_vm0, %v8613_v1  ;;  %7208 = vmatprep.mubr.msk.bf16.mxu1 %vm8614_vm0, %v8613_v1 }
 0x14a   : > { %7163 = vmatmul.mubr.msk.bf16.gmra.mrb[28].mxu0 %vm268_vm1, %v8483_v23  ;;  %7209 = vmatmul.mubr.msk.bf16.gmra.mrb[28].mxu1 %vm268_vm1, %v8484_v24  ;;  %v8546_v23 = vld [vmem:[%s8797_s10 + $0x20] sm:$0xff]   ;;  %v8547_v24 = vld [vmem:[%s8797_s10 + $0x728] sm:$0xff]  }
 0x14b   : > { %7166 = vmatprep.mubr.msk.bf16.mxu0 %vm8614_vm0, %v8613_v1  ;;  %7212 = vmatprep.mubr.msk.bf16.mxu1 %vm8614_vm0, %v8613_v1 }
 0x152   : > { %7167 = vmatmul.mubr.msk.bf16.gmra.mrb[32].mxu0 %vm268_vm1, %v8485_v25  ;;  %7213 = vmatmul.mubr.msk.bf16.gmra.mrb[32].mxu1 %vm268_vm1, %v8486_v26  ;;  %v8548_v25 = vld [vmem:[%s8797_s10 + $0x28] sm:$0xff]   ;;  %v8549_v26 = vld [vmem:[%s8797_s10 + $0x730] sm:$0xff]  }
 0x153   : > { %7170 = vmatprep.mubr.msk.bf16.mxu0 %vm8614_vm0, %v8613_v1  ;;  %7216 = vmatprep.mubr.msk.bf16.mxu1 %vm8614_vm0, %v8613_v1 }
 0x15a   : > { %7171 = vmatmul.mubr.msk.bf16.gmra.mrb[36].mxu0 %vm268_vm1, %v8487_v27  ;;  %7217 = vmatmul.mubr.msk.bf16.gmra.mrb[36].mxu1 %vm268_vm1, %v8488_v28  ;;  %v8550_v27 = vld [vmem:[%s8797_s10 + $0x30] sm:$0xff]   ;;  %v8551_v28 = vld [vmem:[%s8797_s10 + $0x738] sm:$0xff]  }
 0x15b   : > { %7174 = vmatprep.mubr.msk.bf16.mxu0 %vm8614_vm0, %v8613_v1  ;;  %7220 = vmatprep.mubr.msk.bf16.mxu1 %vm8614_vm0, %v8613_v1 }
 0x162   : > { %7175 = vmatmul.mubr.msk.bf16.gmra.mrb[40].mxu0 %vm268_vm1, %v8489_v29  ;;  %7221 = vmatmul.mubr.msk.bf16.gmra.mrb[40].mxu1 %vm268_vm1, %v8490_v30  ;;  %v8552_v29 = vld [vmem:[%s8797_s10 + $0x38] sm:$0xff]   ;;  %v8553_v30 = vld [vmem:[%s8797_s10 + $0x740] sm:$0xff]  }
 0x163   : > { %7226 = vmatprep.mubr.msk.bf16.mxu0 %vm8614_vm0, %v8613_v1  ;;  %7272 = vmatprep.mubr.msk.bf16.mxu1 %vm8614_vm0, %v8613_v1 }
 0x16a   : > { %7227 = vmatmul.mubr.msk.bf16.vlgmr.msra.gmra.mrb[0].mxu0 %vm268_vm1, %v8491_v31  ;;  %7273 = vmatmul.mubr.msk.bf16.vlgmr.msra.gmra.mrb[0].mxu1 %vm268_vm1, %v8492_v32  ;;  %v8554_v31 = vld [vmem:[%s8797_s10 + $0x40] sm:$0xff]   ;;  %v8555_v32 = vld [vmem:[%s8797_s10 + $0x748] sm:$0xff]  }
 0x16b   : > { %7317 = vmatpush3.bf16.msra.mxu0 %v8493_v33  ;;  %7363 = vmatpush3.bf16.msra.mxu1 %v8493_v33  ;;  %v8556_v33 = vld [vmem:[%s8797_s10 + $0x48] sm:$0xff]  }
 0x16c   : > { %7230 = vmatprep.mubr.msk.bf16.mxu0 %vm8614_vm0, %v8613_v1  ;;  %7276 = vmatprep.mubr.msk.bf16.mxu1 %vm8614_vm0, %v8613_v1 }
 0x16d   : > { %7408 = vmatprep.subr.bf16.mxu0 %v8613_v1  ;;  %7454 = vmatprep.subr.bf16.mxu1 %v8613_v1 }
 0x172   : > { %7231 = vmatmul.mubr.msk.bf16.gmra.mrb[4].mxu0 %vm268_vm1, %v8494_v34  ;;  %7277 = vmatmul.mubr.msk.bf16.gmra.mrb[4].mxu1 %vm268_vm1, %v8495_v35  ;;  %v8557_v34 = vld [vmem:[%s8797_s10 + $0x750] sm:$0xff]  }
 0x173   : > { %7234 = vmatprep.mubr.msk.bf16.mxu0 %vm8614_vm0, %v8613_v1  ;;  %7280 = vmatprep.mubr.msk.bf16.mxu1 %vm8614_vm0, %v8613_v1  ;;  %v8558_v35 = vld [vmem:[%s8797_s10 + $0x50] sm:$0xff]  }
 0x17a   : > { %7235 = vmatmul.mubr.msk.bf16.gmra.mrb[8].mxu0 %vm268_vm1, %v8496_v36  ;;  %7281 = vmatmul.mubr.msk.bf16.gmra.mrb[8].mxu1 %vm268_vm1, %v8497_v37  ;;  %v8559_v36 = vld [vmem:[%s8797_s10 + $0x758] sm:$0xff]   ;;  %v8560_v37 = vld [vmem:[%s8797_s10 + $0x708] sm:$0xff]  }
 0x17b   : > { %7238 = vmatprep.mubr.msk.bf16.mxu0 %vm8614_vm0, %v8613_v1  ;;  %7284 = vmatprep.mubr.msk.bf16.mxu1 %vm8614_vm0, %v8613_v1 }
 0x182   : > { %7239 = vmatmul.mubr.msk.bf16.gmra.mrb[12].mxu0 %vm268_vm1, %v8498_v38  ;;  %7285 = vmatmul.mubr.msk.bf16.gmra.mrb[12].mxu1 %vm268_vm1, %v8499_v39  ;;  %v8561_v38 = vld [vmem:[%s8797_s10 + $0xe10] sm:$0xff]   ;;  %v8562_v39 = vld [vmem:[%s9550_s1 + $0x40] sm:$0xff]  }
 0x183   : > { %7242 = vmatprep.mubr.msk.bf16.mxu0 %vm8614_vm0, %v8613_v1  ;;  %7288 = vmatprep.mubr.msk.bf16.mxu1 %vm8614_vm0, %v8613_v1 }
 0x18a   : > { %7243 = vmatmul.mubr.msk.bf16.gmra.mrb[16].mxu0 %vm268_vm1, %v8500_v40  ;;  %7289 = vmatmul.mubr.msk.bf16.gmra.mrb[16].mxu1 %vm268_vm1, %v8501_v41  ;;  %v8563_v40 = vld [vmem:[%s8797_s10 + $0x710] sm:$0xff]   ;;  %v8564_v41 = vld [vmem:[%s8797_s10 + $0xe18] sm:$0xff]  }
 0x18b   : > { %7246 = vmatprep.mubr.msk.bf16.mxu0 %vm8614_vm0, %v8613_v1  ;;  %7292 = vmatprep.mubr.msk.bf16.mxu1 %vm8614_vm0, %v8613_v1 }
 0x192   : > { %7247 = vmatmul.mubr.msk.bf16.gmra.mrb[20].mxu0 %vm268_vm1, %v8502_v42  ;;  %7293 = vmatmul.mubr.msk.bf16.gmra.mrb[20].mxu1 %vm268_vm1, %v8503_v43  ;;  %v8565_v42 = vld [vmem:[%s8797_s10 + $0x718] sm:$0xff]   ;;  %v8566_v43 = vld [vmem:[%s8797_s10 + $0xe20] sm:$0xff]  }
 0x193   : > { %7250 = vmatprep.mubr.msk.bf16.mxu0 %vm8614_vm0, %v8613_v1  ;;  %7296 = vmatprep.mubr.msk.bf16.mxu1 %vm8614_vm0, %v8613_v1 }
 0x19a   : > { %7251 = vmatmul.mubr.msk.bf16.gmra.mrb[24].mxu0 %vm268_vm1, %v8504_v44  ;;  %7297 = vmatmul.mubr.msk.bf16.gmra.mrb[24].mxu1 %vm268_vm1, %v8505_v45  ;;  %v8567_v44 = vld [vmem:[%s8797_s10 + $0x720] sm:$0xff]   ;;  %v8568_v45 = vld [vmem:[%s8797_s10 + $0xe28] sm:$0xff]  }
 0x19b   : > { %7254 = vmatprep.mubr.msk.bf16.mxu0 %vm8614_vm0, %v8613_v1  ;;  %7300 = vmatprep.mubr.msk.bf16.mxu1 %vm8614_vm0, %v8613_v1 }
 0x1a2   : > { %7255 = vmatmul.mubr.msk.bf16.gmra.mrb[28].mxu0 %vm268_vm1, %v8506_v46  ;;  %7301 = vmatmul.mubr.msk.bf16.gmra.mrb[28].mxu1 %vm268_vm1, %v8507_v47  ;;  %v8569_v46 = vld [vmem:[%s8797_s10 + $0x728] sm:$0xff]   ;;  %v8570_v47 = vld [vmem:[%s8797_s10 + $0xe30] sm:$0xff]  }
 0x1a3   : > { %7258 = vmatprep.mubr.msk.bf16.mxu0 %vm8614_vm0, %v8613_v1  ;;  %7304 = vmatprep.mubr.msk.bf16.mxu1 %vm8614_vm0, %v8613_v1 }
 0x1aa   : > { %7259 = vmatmul.mubr.msk.bf16.gmra.mrb[32].mxu0 %vm268_vm1, %v8508_v48  ;;  %7305 = vmatmul.mubr.msk.bf16.gmra.mrb[32].mxu1 %vm268_vm1, %v8509_v49  ;;  %v8571_v48 = vld [vmem:[%s8797_s10 + $0x730] sm:$0xff]   ;;  %v8572_v49 = vld [vmem:[%s8797_s10 + $0xe38] sm:$0xff]  }
 0x1ab   : > { %7262 = vmatprep.mubr.msk.bf16.mxu0 %vm8614_vm0, %v8613_v1  ;;  %7308 = vmatprep.mubr.msk.bf16.mxu1 %vm8614_vm0, %v8613_v1 }
 0x1b2   : > { %7263 = vmatmul.mubr.msk.bf16.gmra.mrb[36].mxu0 %vm268_vm1, %v8510_v50  ;;  %7309 = vmatmul.mubr.msk.bf16.gmra.mrb[36].mxu1 %vm268_vm1, %v8511_v51  ;;  %v8573_v50 = vld [vmem:[%s8797_s10 + $0x738] sm:$0xff]   ;;  %v8574_v51 = vld [vmem:[%s8797_s10 + $0xe40] sm:$0xff]  }
 0x1b3   : > { %7266 = vmatprep.mubr.msk.bf16.mxu0 %vm8614_vm0, %v8613_v1  ;;  %7312 = vmatprep.mubr.msk.bf16.mxu1 %vm8614_vm0, %v8613_v1 }
 0x1ba   : > { %7267 = vmatmul.mubr.msk.bf16.gmra.mrb[40].mxu0 %vm268_vm1, %v8512_v52  ;;  %7313 = vmatmul.mubr.msk.bf16.gmra.mrb[40].mxu1 %vm268_vm1, %v8513_v53  ;;  %v8575_v52 = vld [vmem:[%s8797_s10 + $0x740] sm:$0xff]   ;;  %v8576_v53 = vld [vmem:[%s8797_s10 + $0xe48] sm:$0xff]  }
 0x1bb   : > { %7318 = vmatprep.mubr.msk.bf16.mxu0 %vm8614_vm0, %v8613_v1  ;;  %7364 = vmatprep.mubr.msk.bf16.mxu1 %vm8614_vm0, %v8613_v1 }
 0x1c2   : > { %7319 = vmatmul.mubr.msk.bf16.vlgmr.msra.gmra.mrb[0].mxu0 %vm268_vm1, %v8514_v54  ;;  %7365 = vmatmul.mubr.msk.bf16.vlgmr.msra.gmra.mrb[0].mxu1 %vm268_vm1, %v8515_v55  ;;  %v8577_v54 = vld [vmem:[%s8797_s10 + $0x748] sm:$0xff]   ;;  %v8578_v55 = vld [vmem:[%s8797_s10 + $0xe50] sm:$0xff]  }
 0x1c3   : > { %7409 = vmatpush3.bf16.msra.mxu0 %v8516_v56  ;;  %7455 = vmatpush3.bf16.msra.mxu1 %v8516_v56  ;;  %v8579_v56 = vld [vmem:[%s8797_s10 + $0x750] sm:$0xff]  }
 0x1c4   : > { %7322 = vmatprep.mubr.msk.bf16.mxu0 %vm8614_vm0, %v8613_v1  ;;  %7368 = vmatprep.mubr.msk.bf16.mxu1 %vm8614_vm0, %v8613_v1 }
 0x1c5   : > { %7500 = vmatprep.subr.bf16.mxu0 %v8613_v1  ;;  %7546 = vmatprep.subr.bf16.mxu1 %v8613_v1 }
 0x1ca   : > { %7323 = vmatmul.mubr.msk.bf16.gmra.mrb[4].mxu0 %vm268_vm1, %v8517_v57  ;;  %7369 = vmatmul.mubr.msk.bf16.gmra.mrb[4].mxu1 %vm268_vm1, %v8518_v58  ;;  %v8580_v57 = vld [vmem:[%s8797_s10 + $0xe58] sm:$0xff]  }
 0x1cb   : > { %7326 = vmatprep.mubr.msk.bf16.mxu0 %vm8614_vm0, %v8613_v1  ;;  %7372 = vmatprep.mubr.msk.bf16.mxu1 %vm8614_vm0, %v8613_v1  ;;  %v8581_v58 = vld [vmem:[%s8797_s10 + $0x758] sm:$0xff]  }
 0x1d2   : > { %7327 = vmatmul.mubr.msk.bf16.gmra.mrb[8].mxu0 %vm268_vm1, %v8519_v59  ;;  %7373 = vmatmul.mubr.msk.bf16.gmra.mrb[8].mxu1 %vm268_vm1, %v8520_v60  ;;  %v8582_v59 = vld [vmem:[%s8797_s10 + $0xe60] sm:$0xff]   ;;  %v8583_v60 = vld [vmem:[%s8797_s10 + $0xe10] sm:$0xff]  }
 0x1d3   : > { %7330 = vmatprep.mubr.msk.bf16.mxu0 %vm8614_vm0, %v8613_v1  ;;  %7376 = vmatprep.mubr.msk.bf16.mxu1 %vm8614_vm0, %v8613_v1 }
 0x1da   : > { %7331 = vmatmul.mubr.msk.bf16.gmra.mrb[12].mxu0 %vm268_vm1, %v8521_v61  ;;  %7377 = vmatmul.mubr.msk.bf16.gmra.mrb[12].mxu1 %vm268_vm1, %v8522_v62  ;;  %v8584_v61 = vld [vmem:[%s8797_s10 + $0x1518] sm:$0xff]  }
 0x1db   : > { %7334 = vmatprep.mubr.msk.bf16.mxu0 %vm8614_vm0, %v8613_v1  ;;  %7380 = vmatprep.mubr.msk.bf16.mxu1 %vm8614_vm0, %v8613_v1  ;;  %v8585_v62 = vld [vmem:[%s8797_s10 + $0xe18] sm:$0xff]  }
 0x1e2   : > { %7335 = vmatmul.mubr.msk.bf16.gmra.mrb[16].mxu0 %vm268_vm1, %v8523_v63  ;;  %7381 = vmatmul.mubr.msk.bf16.gmra.mrb[16].mxu1 %vm268_vm1, %v8524_v0  ;;  %v8586_v63 = vld [vmem:[%s8797_s10 + $0x1520] sm:$0xff]  }
 0x1e3   : > { %7338 = vmatprep.mubr.msk.bf16.mxu0 %vm8614_vm0, %v8613_v1  ;;  %7384 = vmatprep.mubr.msk.bf16.mxu1 %vm8614_vm0, %v8613_v1  ;;  %v8587_v0 = vld [vmem:[%s8797_s10 + $0xe20] sm:$0xff]  }
 0x1ea   : > { %7339 = vmatmul.mubr.msk.bf16.gmra.mrb[20].mxu0 %vm268_vm1, %v8525_v2  ;;  %7385 = vmatmul.mubr.msk.bf16.gmra.mrb[20].mxu1 %vm268_vm1, %v8526_v3  ;;  %v8588_v2 = vld [vmem:[%s8797_s10 + $0x1528] sm:$0xff]  }
 0x1eb   : > { %7342 = vmatprep.mubr.msk.bf16.mxu0 %vm8614_vm0, %v8613_v1  ;;  %7388 = vmatprep.mubr.msk.bf16.mxu1 %vm8614_vm0, %v8613_v1  ;;  %v8589_v3 = vld [vmem:[%s8797_s10 + $0xe28] sm:$0xff]  }
 0x1f2   : > { %7343 = vmatmul.mubr.msk.bf16.gmra.mrb[24].mxu0 %vm268_vm1, %v8527_v4  ;;  %7389 = vmatmul.mubr.msk.bf16.gmra.mrb[24].mxu1 %vm268_vm1, %v8528_v5  ;;  %v8590_v4 = vld [vmem:[%s8797_s10 + $0x1530] sm:$0xff]  }
 0x1f3   : > { %7346 = vmatprep.mubr.msk.bf16.mxu0 %vm8614_vm0, %v8613_v1  ;;  %7392 = vmatprep.mubr.msk.bf16.mxu1 %vm8614_vm0, %v8613_v1  ;;  %v8591_v5 = vld [vmem:[%s8797_s10 + $0xe30] sm:$0xff]  }
 0x1fa   : > { %7347 = vmatmul.mubr.msk.bf16.gmra.mrb[28].mxu0 %vm268_vm1, %v8529_v6  ;;  %7393 = vmatmul.mubr.msk.bf16.gmra.mrb[28].mxu1 %vm268_vm1, %v8530_v7  ;;  %v8592_v6 = vld [vmem:[%s8797_s10 + $0x1538] sm:$0xff]  }
 0x1fb   : > { %7350 = vmatprep.mubr.msk.bf16.mxu0 %vm8614_vm0, %v8613_v1  ;;  %7396 = vmatprep.mubr.msk.bf16.mxu1 %vm8614_vm0, %v8613_v1  ;;  %v8593_v7 = vld [vmem:[%s8797_s10 + $0xe38] sm:$0xff]  }
 0x202   : > { %7351 = vmatmul.mubr.msk.bf16.gmra.mrb[32].mxu0 %vm268_vm1, %v8531_v8  ;;  %7397 = vmatmul.mubr.msk.bf16.gmra.mrb[32].mxu1 %vm268_vm1, %v8532_v9  ;;  %v8594_v8 = vld [vmem:[%s8797_s10 + $0x1540] sm:$0xff]  }
 0x203   : > { %7354 = vmatprep.mubr.msk.bf16.mxu0 %vm8614_vm0, %v8613_v1  ;;  %7400 = vmatprep.mubr.msk.bf16.mxu1 %vm8614_vm0, %v8613_v1  ;;  %v8595_v9 = vld [vmem:[%s8797_s10 + $0xe40] sm:$0xff]  }
 0x20a   : > { %7355 = vmatmul.mubr.msk.bf16.gmra.mrb[36].mxu0 %vm268_vm1, %v8533_v10  ;;  %7401 = vmatmul.mubr.msk.bf16.gmra.mrb[36].mxu1 %vm268_vm1, %v8534_v11  ;;  %v8596_v10 = vld [vmem:[%s8797_s10 + $0x1548] sm:$0xff]  }
 0x20b   : > { %7358 = vmatprep.mubr.msk.bf16.mxu0 %vm8614_vm0, %v8613_v1  ;;  %7404 = vmatprep.mubr.msk.bf16.mxu1 %vm8614_vm0, %v8613_v1  ;;  %v8597_v11 = vld [vmem:[%s8797_s10 + $0xe48] sm:$0xff]  }
 0x212   : > { %7359 = vmatmul.mubr.msk.bf16.gmra.mrb[40].mxu0 %vm268_vm1, %v8535_v12  ;;  %7405 = vmatmul.mubr.msk.bf16.gmra.mrb[40].mxu1 %vm268_vm1, %v8536_v13  ;;  %v8598_v12 = vld [vmem:[%s8797_s10 + $0x1550] sm:$0xff]  }
 0x213   : > { %7410 = vmatprep.mubr.msk.bf16.mxu0 %vm8614_vm0, %v8613_v1  ;;  %7456 = vmatprep.mubr.msk.bf16.mxu1 %vm8614_vm0, %v8613_v1  ;;  %v8599_v13 = vld [vmem:[%s8797_s10 + $0xe50] sm:$0xff]  }
 0x21a   : > { %7411 = vmatmul.mubr.msk.bf16.vlgmr.msra.gmra.mrb[0].mxu0 %vm268_vm1, %v8537_v14  ;;  %7457 = vmatmul.mubr.msk.bf16.vlgmr.msra.gmra.mrb[0].mxu1 %vm268_vm1, %v8538_v15  ;;  %v8600_v14 = vld [vmem:[%s8797_s10 + $0x1558] sm:$0xff]  }
 0x21b   : > { %7501 = vmatpush3.bf16.msra.mxu0 %v8539_v16  ;;  %7547 = vmatpush3.bf16.msra.mxu1 %v8539_v16  ;;  %v8601_v15 = vld [vmem:[%s8797_s10 + $0xe58] sm:$0xff]   ;;  %v8602_v16 = vld [vmem:[%s8797_s10 + $0x1560] sm:$0xff]  }
 0x21c   : > { %7414 = vmatprep.mubr.msk.bf16.mxu0 %vm8614_vm0, %v8613_v1  ;;  %7460 = vmatprep.mubr.msk.bf16.mxu1 %vm8614_vm0, %v8613_v1 }
 0x21d   : > { %7592 = vmatprep.subr.bf16.mxu0 %v8613_v1  ;;  %7638 = vmatprep.subr.bf16.mxu1 %v8613_v1 }
 0x222   : > { %7415 = vmatmul.mubr.msk.bf16.gmra.mrb[4].mxu0 %vm268_vm1, %v8540_v17  ;;  %7461 = vmatmul.mubr.msk.bf16.gmra.mrb[4].mxu1 %vm268_vm1, %v8541_v18  ;;  %v8603_v17 = vld [vmem:[%s8797_s10 + $0xe60] sm:$0xff]   ;;  %v8604_v18 = vld [vmem:[%s8797_s10 + $0x1568] sm:$0xff]  }
 0x223   : > { %7418 = vmatprep.mubr.msk.bf16.mxu0 %vm8614_vm0, %v8613_v1  ;;  %7464 = vmatprep.mubr.msk.bf16.mxu1 %vm8614_vm0, %v8613_v1 }
 0x22a   : > { %7419 = vmatmul.mubr.msk.bf16.gmra.mrb[8].mxu0 %vm268_vm1, %v8542_v19  ;;  %7465 = vmatmul.mubr.msk.bf16.gmra.mrb[8].mxu1 %vm268_vm1, %v8543_v20 }
 0x22b   : > { %7422 = vmatprep.mubr.msk.bf16.mxu0 %vm8614_vm0, %v8613_v1  ;;  %7468 = vmatprep.mubr.msk.bf16.mxu1 %vm8614_vm0, %v8613_v1 }
 0x232   : > { %7423 = vmatmul.mubr.msk.bf16.gmra.mrb[12].mxu0 %vm268_vm1, %v8544_v21  ;;  %7469 = vmatmul.mubr.msk.bf16.gmra.mrb[12].mxu1 %vm268_vm1, %v8545_v22 }
 0x233   : > { %7426 = vmatprep.mubr.msk.bf16.mxu0 %vm8614_vm0, %v8613_v1  ;;  %7472 = vmatprep.mubr.msk.bf16.mxu1 %vm8614_vm0, %v8613_v1 }
 0x23a   : > { %7427 = vmatmul.mubr.msk.bf16.gmra.mrb[16].mxu0 %vm268_vm1, %v8546_v23  ;;  %7473 = vmatmul.mubr.msk.bf16.gmra.mrb[16].mxu1 %vm268_vm1, %v8547_v24 }
 0x23b   : > { %7430 = vmatprep.mubr.msk.bf16.mxu0 %vm8614_vm0, %v8613_v1  ;;  %7476 = vmatprep.mubr.msk.bf16.mxu1 %vm8614_vm0, %v8613_v1 }
 0x242   : > { %7431 = vmatmul.mubr.msk.bf16.gmra.mrb[20].mxu0 %vm268_vm1, %v8548_v25  ;;  %7477 = vmatmul.mubr.msk.bf16.gmra.mrb[20].mxu1 %vm268_vm1, %v8549_v26 }
 0x243   : > { %7434 = vmatprep.mubr.msk.bf16.mxu0 %vm8614_vm0, %v8613_v1  ;;  %7480 = vmatprep.mubr.msk.bf16.mxu1 %vm8614_vm0, %v8613_v1 }
 0x24a   : > { %7435 = vmatmul.mubr.msk.bf16.gmra.mrb[24].mxu0 %vm268_vm1, %v8550_v27  ;;  %7481 = vmatmul.mubr.msk.bf16.gmra.mrb[24].mxu1 %vm268_vm1, %v8551_v28 }
 0x24b   : > { %7438 = vmatprep.mubr.msk.bf16.mxu0 %vm8614_vm0, %v8613_v1  ;;  %7484 = vmatprep.mubr.msk.bf16.mxu1 %vm8614_vm0, %v8613_v1 }
 0x252   : > { %7439 = vmatmul.mubr.msk.bf16.gmra.mrb[28].mxu0 %vm268_vm1, %v8552_v29  ;;  %7485 = vmatmul.mubr.msk.bf16.gmra.mrb[28].mxu1 %vm268_vm1, %v8553_v30 }
 0x253   : > { %7442 = vmatprep.mubr.msk.bf16.mxu0 %vm8614_vm0, %v8613_v1  ;;  %7488 = vmatprep.mubr.msk.bf16.mxu1 %vm8614_vm0, %v8613_v1 }
 0x25a   : > { %7443 = vmatmul.mubr.msk.bf16.gmra.mrb[32].mxu0 %vm268_vm1, %v8554_v31  ;;  %7489 = vmatmul.mubr.msk.bf16.gmra.mrb[32].mxu1 %vm268_vm1, %v8555_v32 }
 0x25b   : > { %7446 = vmatprep.mubr.msk.bf16.mxu0 %vm8614_vm0, %v8613_v1  ;;  %7492 = vmatprep.mubr.msk.bf16.mxu1 %vm8614_vm0, %v8613_v1 }
 0x262   : > { %7447 = vmatmul.mubr.msk.bf16.gmra.mrb[36].mxu0 %vm268_vm1, %v8556_v33  ;;  %7493 = vmatmul.mubr.msk.bf16.gmra.mrb[36].mxu1 %vm268_vm1, %v8557_v34 }
 0x263   : > { %7450 = vmatprep.mubr.msk.bf16.mxu0 %vm8614_vm0, %v8613_v1  ;;  %7496 = vmatprep.mubr.msk.bf16.mxu1 %vm8614_vm0, %v8613_v1 }
 0x26a   : > { %7451 = vmatmul.mubr.msk.bf16.gmra.mrb[40].mxu0 %vm268_vm1, %v8558_v35  ;;  %7497 = vmatmul.mubr.msk.bf16.gmra.mrb[40].mxu1 %vm268_vm1, %v8559_v36 }
 0x26b   : > { %7502 = vmatprep.mubr.msk.bf16.mxu0 %vm8614_vm0, %v8613_v1  ;;  %7548 = vmatprep.mubr.msk.bf16.mxu1 %vm8614_vm0, %v8613_v1 }
 0x272   : > { %7503 = vmatmul.mubr.msk.bf16.vlgmr.msra.gmra.mrb[0].mxu0 %vm268_vm1, %v8560_v37  ;;  %7549 = vmatmul.mubr.msk.bf16.vlgmr.msra.gmra.mrb[0].mxu1 %vm268_vm1, %v8561_v38 }
 0x273   : > { %7593 = vmatpush3.bf16.msra.mxu0 %v8562_v39  ;;  %7639 = vmatpush3.bf16.msra.mxu1 %v8562_v39 }
 0x274   : > { %7506 = vmatprep.mubr.msk.bf16.mxu0 %vm8614_vm0, %v8613_v1  ;;  %7552 = vmatprep.mubr.msk.bf16.mxu1 %vm8614_vm0, %v8613_v1 }
 0x27a   : > { %7507 = vmatmul.mubr.msk.bf16.gmra.mrb[4].mxu0 %vm268_vm1, %v8563_v40  ;;  %7553 = vmatmul.mubr.msk.bf16.gmra.mrb[4].mxu1 %vm268_vm1, %v8564_v41 }
 0x27b   : > { %7510 = vmatprep.mubr.msk.bf16.mxu0 %vm8614_vm0, %v8613_v1  ;;  %7556 = vmatprep.mubr.msk.bf16.mxu1 %vm8614_vm0, %v8613_v1 }
 0x282   : > { %7511 = vmatmul.mubr.msk.bf16.gmra.mrb[8].mxu0 %vm268_vm1, %v8565_v42  ;;  %7557 = vmatmul.mubr.msk.bf16.gmra.mrb[8].mxu1 %vm268_vm1, %v8566_v43 }
 0x283   : > { %7514 = vmatprep.mubr.msk.bf16.mxu0 %vm8614_vm0, %v8613_v1  ;;  %7560 = vmatprep.mubr.msk.bf16.mxu1 %vm8614_vm0, %v8613_v1 }
 0x28a   : > { %7515 = vmatmul.mubr.msk.bf16.gmra.mrb[12].mxu0 %vm268_vm1, %v8567_v44  ;;  %7561 = vmatmul.mubr.msk.bf16.gmra.mrb[12].mxu1 %vm268_vm1, %v8568_v45 }
 0x28b   : > { %7518 = vmatprep.mubr.msk.bf16.mxu0 %vm8614_vm0, %v8613_v1  ;;  %7564 = vmatprep.mubr.msk.bf16.mxu1 %vm8614_vm0, %v8613_v1 }
 0x292   : > { %7519 = vmatmul.mubr.msk.bf16.gmra.mrb[16].mxu0 %vm268_vm1, %v8569_v46  ;;  %7565 = vmatmul.mubr.msk.bf16.gmra.mrb[16].mxu1 %vm268_vm1, %v8570_v47 }
 0x293   : > { %7522 = vmatprep.mubr.msk.bf16.mxu0 %vm8614_vm0, %v8613_v1  ;;  %7568 = vmatprep.mubr.msk.bf16.mxu1 %vm8614_vm0, %v8613_v1 }
 0x29a   : > { %7523 = vmatmul.mubr.msk.bf16.gmra.mrb[20].mxu0 %vm268_vm1, %v8571_v48  ;;  %7569 = vmatmul.mubr.msk.bf16.gmra.mrb[20].mxu1 %vm268_vm1, %v8572_v49 }
 0x29b   : > { %7526 = vmatprep.mubr.msk.bf16.mxu0 %vm8614_vm0, %v8613_v1  ;;  %7572 = vmatprep.mubr.msk.bf16.mxu1 %vm8614_vm0, %v8613_v1 }
 0x2a2   : > { %7527 = vmatmul.mubr.msk.bf16.gmra.mrb[24].mxu0 %vm268_vm1, %v8573_v50  ;;  %7573 = vmatmul.mubr.msk.bf16.gmra.mrb[24].mxu1 %vm268_vm1, %v8574_v51 }
 0x2a3   : > { %7530 = vmatprep.mubr.msk.bf16.mxu0 %vm8614_vm0, %v8613_v1  ;;  %7576 = vmatprep.mubr.msk.bf16.mxu1 %vm8614_vm0, %v8613_v1 }
 0x2aa   : > { %7531 = vmatmul.mubr.msk.bf16.gmra.mrb[28].mxu0 %vm268_vm1, %v8575_v52  ;;  %7577 = vmatmul.mubr.msk.bf16.gmra.mrb[28].mxu1 %vm268_vm1, %v8576_v53 }
 0x2ab   : > { %7534 = vmatprep.mubr.msk.bf16.mxu0 %vm8614_vm0, %v8613_v1  ;;  %7580 = vmatprep.mubr.msk.bf16.mxu1 %vm8614_vm0, %v8613_v1 }
 0x2b2   : > { %7535 = vmatmul.mubr.msk.bf16.gmra.mrb[32].mxu0 %vm268_vm1, %v8577_v54  ;;  %7581 = vmatmul.mubr.msk.bf16.gmra.mrb[32].mxu1 %vm268_vm1, %v8578_v55  ;;  %v9509_v54 = vld [vmem:[%s9551_s2] ss:$0 sm:$0xff] }
 0x2b3   : > { %7538 = vmatprep.mubr.msk.bf16.mxu0 %vm8614_vm0, %v8613_v1  ;;  %7584 = vmatprep.mubr.msk.bf16.mxu1 %vm8614_vm0, %v8613_v1 }
 0x2ba   : > { %7539 = vmatmul.mubr.msk.bf16.gmra.mrb[36].mxu0 %vm268_vm1, %v8579_v56  ;;  %7585 = vmatmul.mubr.msk.bf16.gmra.mrb[36].mxu1 %vm268_vm1, %v8580_v57 }
 0x2bb   : > { %7542 = vmatprep.mubr.msk.bf16.mxu0 %vm8614_vm0, %v8613_v1  ;;  %7588 = vmatprep.mubr.msk.bf16.mxu1 %vm8614_vm0, %v8613_v1 }
 0x2c2   : > { %7543 = vmatmul.mubr.msk.bf16.gmra.mrb[40].mxu0 %vm268_vm1, %v8581_v58  ;;  %7589 = vmatmul.mubr.msk.bf16.gmra.mrb[40].mxu1 %vm268_vm1, %v8582_v59 }
 0x2c3   : > { %7594 = vmatprep.mubr.msk.bf16.mxu0 %vm8614_vm0, %v8613_v1  ;;  %7640 = vmatprep.mubr.msk.bf16.mxu1 %vm8614_vm0, %v8613_v1 }
 0x2ca   : > { %7595 = vmatmul.mubr.msk.bf16.vlgmr.msra.gmra.mrb[0].mxu0 %vm268_vm1, %v8583_v60  ;;  %7641 = vmatmul.mubr.msk.bf16.vlgmr.msra.gmra.mrb[0].mxu1 %vm268_vm1, %v8584_v61 }
 0x2cb   : > { %7598 = vmatprep.mubr.msk.bf16.mxu0 %vm8614_vm0, %v8613_v1  ;;  %7644 = vmatprep.mubr.msk.bf16.mxu1 %vm8614_vm0, %v8613_v1 }
 0x2d2   : > { %7599 = vmatmul.mubr.msk.bf16.gmra.mrb[4].mxu0 %vm268_vm1, %v8585_v62  ;;  %7645 = vmatmul.mubr.msk.bf16.gmra.mrb[4].mxu1 %vm268_vm1, %v8586_v63 }
 0x2d3   : > { %7602 = vmatprep.mubr.msk.bf16.mxu0 %vm8614_vm0, %v8613_v1  ;;  %7648 = vmatprep.mubr.msk.bf16.mxu1 %vm8614_vm0, %v8613_v1 }
 0x2da   : > { %7603 = vmatmul.mubr.msk.bf16.gmra.mrb[8].mxu0 %vm268_vm1, %v8587_v0  ;;  %7649 = vmatmul.mubr.msk.bf16.gmra.mrb[8].mxu1 %vm268_vm1, %v8588_v2 }
 0x2db   : > { %7606 = vmatprep.mubr.msk.bf16.mxu0 %vm8614_vm0, %v8613_v1  ;;  %7652 = vmatprep.mubr.msk.bf16.mxu1 %vm8614_vm0, %v8613_v1 }
 0x2e2   : > { %7607 = vmatmul.mubr.msk.bf16.gmra.mrb[12].mxu0 %vm268_vm1, %v8589_v3  ;;  %7653 = vmatmul.mubr.msk.bf16.gmra.mrb[12].mxu1 %vm268_vm1, %v8590_v4 }
 0x2e3   : > { %7610 = vmatprep.mubr.msk.bf16.mxu0 %vm8614_vm0, %v8613_v1  ;;  %7656 = vmatprep.mubr.msk.bf16.mxu1 %vm8614_vm0, %v8613_v1 }
 0x2ea   : > { %7611 = vmatmul.mubr.msk.bf16.gmra.mrb[16].mxu0 %vm268_vm1, %v8591_v5  ;;  %7657 = vmatmul.mubr.msk.bf16.gmra.mrb[16].mxu1 %vm268_vm1, %v8592_v6 }
 0x2eb   : > { %7614 = vmatprep.mubr.msk.bf16.mxu0 %vm8614_vm0, %v8613_v1  ;;  %7660 = vmatprep.mubr.msk.bf16.mxu1 %vm8614_vm0, %v8613_v1 }
 0x2f2   : > { %7615 = vmatmul.mubr.msk.bf16.gmra.mrb[20].mxu0 %vm268_vm1, %v8593_v7  ;;  %7661 = vmatmul.mubr.msk.bf16.gmra.mrb[20].mxu1 %vm268_vm1, %v8594_v8 }
 0x2f3   : > { %7618 = vmatprep.mubr.msk.bf16.mxu0 %vm8614_vm0, %v8613_v1  ;;  %7664 = vmatprep.mubr.msk.bf16.mxu1 %vm8614_vm0, %v8613_v1 }
 0x2fa   : > { %7619 = vmatmul.mubr.msk.bf16.gmra.mrb[24].mxu0 %vm268_vm1, %v8595_v9  ;;  %7665 = vmatmul.mubr.msk.bf16.gmra.mrb[24].mxu1 %vm268_vm1, %v8596_v10 }
 0x2fb   : > { %7622 = vmatprep.mubr.msk.bf16.mxu0 %vm8614_vm0, %v8613_v1  ;;  %7668 = vmatprep.mubr.msk.bf16.mxu1 %vm8614_vm0, %v8613_v1 }
 0x302   : > { %7623 = vmatmul.mubr.msk.bf16.gmra.mrb[28].mxu0 %vm268_vm1, %v8597_v11  ;;  %7669 = vmatmul.mubr.msk.bf16.gmra.mrb[28].mxu1 %vm268_vm1, %v8598_v12 }
 0x303   : > { %7626 = vmatprep.mubr.msk.bf16.mxu0 %vm8614_vm0, %v8613_v1  ;;  %7672 = vmatprep.mubr.msk.bf16.mxu1 %vm8614_vm0, %v8613_v1 }
 0x30a   : > { %7627 = vmatmul.mubr.msk.bf16.gmra.mrb[32].mxu0 %vm268_vm1, %v8599_v13  ;;  %7673 = vmatmul.mubr.msk.bf16.gmra.mrb[32].mxu1 %vm268_vm1, %v8600_v14 }
 0x30b   : > { %7630 = vmatprep.mubr.msk.bf16.mxu0 %vm8614_vm0, %v8613_v1  ;;  %7676 = vmatprep.mubr.msk.bf16.mxu1 %vm8614_vm0, %v8613_v1 }
 0x312   : > { %7631 = vmatmul.mubr.msk.bf16.gmra.mrb[36].mxu0 %vm268_vm1, %v8601_v15  ;;  %7677 = vmatmul.mubr.msk.bf16.gmra.mrb[36].mxu1 %vm268_vm1, %v8602_v16 }
 0x313   : > { %7634 = vmatprep.mubr.msk.bf16.mxu0 %vm8614_vm0, %v8613_v1  ;;  %7680 = vmatprep.mubr.msk.bf16.mxu1 %vm8614_vm0, %v8613_v1 }
 0x31a   : > { %7635 = vmatmul.mubr.msk.bf16.gmra.mrb[40].mxu0 %vm268_vm1, %v8603_v17  ;;  %7681 = vmatmul.mubr.msk.bf16.gmra.mrb[40].mxu1 %vm268_vm1, %v8604_v18 }
 0x39d   : > { %v5098_v19 = vpop.f32.mrb[0].mxu0  ;;  %v5307_v20 = vpop.f32.mrb[0].mxu1 }
 0x39e   : > { %v7596_v21 = vpop.f32.mrb[1].mxu0  ;;  %v5570_v22 = vmax.f32 %v5098_v19, %v5307_v20  ;;  %v7642_v23 = vpop.f32.mrb[1].mxu1 }
 0x39f   : > { %v5101_v24 = vpop.f32.mrb[2].mxu0  ;;  %v5310_v25 = vpop.f32.mrb[2].mxu1 }
 0x3a0   : > { %v7597_v26 = vpop.f32.mrb[3].mxu0  ;;  %v5571_v27 = vmax.f32 %v5101_v24, %v5310_v25  ;;  %v7643_v28 = vpop.f32.mrb[3].mxu1 }
 0x3a5   : > { %v5106_v29 = vpop.f32.mrb[4].mxu0  ;;  %v5315_v30 = vpop.f32.mrb[4].mxu1 }
 0x3a6   : > { %v7600_v31 = vpop.f32.mrb[5].mxu0  ;;  %v5572_v1 = vmax.f32 %v5106_v29, %v5315_v30  ;;  %v7646_v32 = vpop.f32.mrb[5].mxu1 }
 0x3a7   : > { %v5109_v33 = vpop.f32.mrb[6].mxu0  ;;  %v5318_v34 = vpop.f32.mrb[6].mxu1 }
 0x3a8   : > { %v7601_v35 = vpop.f32.mrb[7].mxu0  ;;  %v5573_v36 = vmax.f32 %v5109_v33, %v5318_v34  ;;  %v7647_v37 = vpop.f32.mrb[7].mxu1 }
 0x3ad   : > { %v5114_v38 = vpop.f32.mrb[8].mxu0  ;;  %v5323_v39 = vpop.f32.mrb[8].mxu1 }
 0x3ae   : > { %v7604_v40 = vpop.f32.mrb[9].mxu0  ;;  %v5574_v41 = vmax.f32 %v5114_v38, %v5323_v39  ;;  %v7650_v42 = vpop.f32.mrb[9].mxu1 }
 0x3af   : > { %v5117_v43 = vpop.f32.mrb[10].mxu0  ;;  %v5326_v44 = vpop.f32.mrb[10].mxu1 }
 0x3b0   : > { %v7605_v45 = vpop.f32.mrb[11].mxu0  ;;  %v5575_v46 = vmax.f32 %v5117_v43, %v5326_v44  ;;  %v7651_v47 = vpop.f32.mrb[11].mxu1 }
 0x3b5   : > { %v5122_v48 = vpop.f32.mrb[12].mxu0  ;;  %v5331_v49 = vpop.f32.mrb[12].mxu1 }
 0x3b6   : > { %v7608_v50 = vpop.f32.mrb[13].mxu0  ;;  %v9504_v51 = vmax.f32 %v5122_v48, %v5331_v49  ;;  %v7654_v52 = vpop.f32.mrb[13].mxu1 }
 0x3b7   : > { %v5125_v53 = vpop.f32.mrb[14].mxu0  ;;  %v5334_v55 = vpop.f32.mrb[14].mxu1 }
 0x3b8   : > { %v7609_v56 = vpop.f32.mrb[15].mxu0  ;;  %v5592_v57 = vmax.f32 %v5570_v22, %v9504_v51  ;;  %v5577_v58 = vmax.f32 %v5125_v53, %v5334_v55  ;;  %v7655_v59 = vpop.f32.mrb[15].mxu1 }
 0x3ba   : > { %v5615_v60 = vadd.f32 %v9509_v54, %v5592_v57  ;;  %v5593_v61 = vmax.f32 %v5571_v27, %v5577_v58 }
 0x3bc   : > { %v5616_v62 = vadd.f32 %v9509_v54, %v5593_v61  ;;  %v5631_v3 = vmax.f32 %v5615_v60, 0.0 }
 0x3bd   : > { %v5130_v63 = vpop.f32.mrb[16].mxu0  ;;  %v5339_v0 = vpop.f32.mrb[16].mxu1 }
 0x3be   : > { %v7612_v2 = vpop.f32.mrb[17].mxu0  ;;  %v5632_v4 = vmax.f32 %v5616_v62, 0.0  ;;  %v9514_v5 = vmax.f32 %v5130_v63, %v5339_v0  ;;  %v7658_v6 = vpop.f32.mrb[17].mxu1 }
 0x3bf   : > { %v5133_v7 = vpop.f32.mrb[18].mxu0  ;;  %v5342_v8 = vpop.f32.mrb[18].mxu1 }
 0x3c0   : > { %v7613_v9 = vpop.f32.mrb[19].mxu0  ;;  %v6596_v10 = vpack.c.bf16 %v5632_v4, %v5631_v3  ;;  %v5594_v11 = vmax.f32 %v5572_v1, %v9514_v5  ;;  %v5579_v12 = vmax.f32 %v5133_v7, %v5342_v8  ;;  %v7659_v13 = vpop.f32.mrb[19].mxu1 }
 0x3c2   : > { %6597 = vst [vmem:[%s9519_s30] sm:$0xff] %v6596_v10   ;;  %v5617_v14 = vadd.f32 %v9509_v54, %v5594_v11  ;;  %v5595_v15 = vmax.f32 %v5573_v36, %v5579_v12 }
 0x3c4   : > { %v5618_v16 = vadd.f32 %v9509_v54, %v5595_v15  ;;  %v5633_v20 = vmax.f32 %v5617_v14, 0.0 }
 0x3c5   : > { %v5138_v17 = vpop.f32.mrb[20].mxu0  ;;  %v5347_v18 = vpop.f32.mrb[20].mxu1 }
 0x3c6   : > { %v7616_v19 = vpop.f32.mrb[21].mxu0  ;;  %v5634_v21 = vmax.f32 %v5618_v16, 0.0  ;;  %v5580_v22 = vmax.f32 %v5138_v17, %v5347_v18  ;;  %v7662_v23 = vpop.f32.mrb[21].mxu1 }
 0x3c7   : > { %v5141_v24 = vpop.f32.mrb[22].mxu0  ;;  %v5350_v25 = vpop.f32.mrb[22].mxu1 }
 0x3c8   : > { %v7617_v26 = vpop.f32.mrb[23].mxu0  ;;  %v6601_v27 = vpack.c.bf16 %v5634_v21, %v5633_v20  ;;  %v5596_v28 = vmax.f32 %v5574_v41, %v5580_v22  ;;  %v5581_v29 = vmax.f32 %v5141_v24, %v5350_v25  ;;  %v7663_v30 = vpop.f32.mrb[23].mxu1 }
 0x3ca   : > { %6633 = vst [vmem:[%s9519_s30 + $0x8] sm:$0xff] %v6601_v27   ;;  %v5619_v31 = vadd.f32 %v9509_v54, %v5596_v28  ;;  %v5597_v1 = vmax.f32 %v5575_v46, %v5581_v29 }
 0x3cc   : > { %v5620_v32 = vadd.f32 %v9509_v54, %v5597_v1  ;;  %v5635_v36 = vmax.f32 %v5619_v31, 0.0 }
 0x3cd   : > { %v5146_v33 = vpop.f32.mrb[24].mxu0  ;;  %v5355_v34 = vpop.f32.mrb[24].mxu1 }
 0x3ce   : > { %v7620_v35 = vpop.f32.mrb[25].mxu0  ;;  %v5636_v37 = vmax.f32 %v5620_v32, 0.0  ;;  %v5582_v38 = vmax.f32 %v5146_v33, %v5355_v34  ;;  %v7666_v39 = vpop.f32.mrb[25].mxu1 }
 0x3cf   : > { %v5149_v40 = vpop.f32.mrb[26].mxu0  ;;  %v5358_v42 = vpop.f32.mrb[26].mxu1 }
 0x3d0   : > { %v7621_v43 = vpop.f32.mrb[27].mxu0  ;;  %v6606_v41 = vpack.c.bf16 %v5636_v37, %v5635_v36  ;;  %v5598_v44 = vmax.f32 %v9504_v51, %v5582_v38  ;;  %v5583_v45 = vmax.f32 %v5149_v40, %v5358_v42  ;;  %v7667_v47 = vpop.f32.mrb[27].mxu1 }
 0x3d2   : > { %6634 = vst [vmem:[%s9519_s30 + $0x10] sm:$0xff] %v6606_v41   ;;  %v5621_v46 = vadd.f32 %v9509_v54, %v5598_v44  ;;  %v5599_v48 = vmax.f32 %v5577_v58, %v5583_v45 }
 0x3d4   : > { %v5622_v49 = vadd.f32 %v9509_v54, %v5599_v48  ;;  %v5637_v55 = vmax.f32 %v5621_v46, 0.0 }
 0x3d5   : > { %v5154_v50 = vpop.f32.mrb[28].mxu0  ;;  %v5363_v52 = vpop.f32.mrb[28].mxu1 }
 0x3d6   : > { %v7624_v53 = vpop.f32.mrb[29].mxu0  ;;  %v5638_v56 = vmax.f32 %v5622_v49, 0.0  ;;  %v5584_v57 = vmax.f32 %v5154_v50, %v5363_v52  ;;  %v7670_v59 = vpop.f32.mrb[29].mxu1 }
 0x3d7   : > { %v5157_v60 = vpop.f32.mrb[30].mxu0  ;;  %v5366_v61 = vpop.f32.mrb[30].mxu1 }
 0x3d8   : > { %v7625_v62 = vpop.f32.mrb[31].mxu0  ;;  %v6611_v51 = vpack.c.bf16 %v5638_v56, %v5637_v55  ;;  %v5600_v63 = vmax.f32 %v9514_v5, %v5584_v57  ;;  %v5585_v0 = vmax.f32 %v5157_v60, %v5366_v61  ;;  %v7671_v2 = vpop.f32.mrb[31].mxu1 }
 0x3da   : > { %6635 = vst [vmem:[%s9519_s30 + $0x18] sm:$0xff] %v6611_v51   ;;  %v5623_v58 = vadd.f32 %v9509_v54, %v5600_v63  ;;  %v5601_v3 = vmax.f32 %v5579_v12, %v5585_v0 }
 0x3dc   : > { %v5624_v4 = vadd.f32 %v9509_v54, %v5601_v3  ;;  %v5639_v9 = vmax.f32 %v5623_v58, 0.0 }
 0x3dd   : > { %v5162_v6 = vpop.f32.mrb[32].mxu0  ;;  %v5371_v7 = vpop.f32.mrb[32].mxu1 }
 0x3de   : > { %v7628_v8 = vpop.f32.mrb[33].mxu0  ;;  %v5640_v10 = vmax.f32 %v5624_v4, 0.0  ;;  %v5586_v11 = vmax.f32 %v5162_v6, %v5371_v7  ;;  %v7674_v13 = vpop.f32.mrb[33].mxu1 }
 0x3df   : > { %v5165_v14 = vpop.f32.mrb[34].mxu0  ;;  %v5374_v15 = vpop.f32.mrb[34].mxu1 }
 0x3e0   : > { %v7629_v16 = vpop.f32.mrb[35].mxu0  ;;  %v6616_v5 = vpack.c.bf16 %v5640_v10, %v5639_v9  ;;  %v5602_v17 = vmax.f32 %v5580_v22, %v5586_v11  ;;  %v5587_v18 = vmax.f32 %v5165_v14, %v5374_v15  ;;  %v7675_v19 = vpop.f32.mrb[35].mxu1 }
 0x3e2   : > { %6636 = vst [vmem:[%s9519_s30 + $0x20] sm:$0xff] %v6616_v5   ;;  %v5625_v12 = vadd.f32 %v9509_v54, %v5602_v17  ;;  %v5603_v20 = vmax.f32 %v5581_v29, %v5587_v18 }
 0x3e4   : > { %v5626_v21 = vadd.f32 %v9509_v54, %v5603_v20  ;;  %v5641_v26 = vmax.f32 %v5625_v12, 0.0 }
 0x3e5   : > { %v5170_v23 = vpop.f32.mrb[36].mxu0  ;;  %v5379_v24 = vpop.f32.mrb[36].mxu1 }
 0x3e6   : > { %v7632_v25 = vpop.f32.mrb[37].mxu0  ;;  %v5642_v27 = vmax.f32 %v5626_v21, 0.0  ;;  %v5588_v28 = vmax.f32 %v5170_v23, %v5379_v24  ;;  %v7678_v30 = vpop.f32.mrb[37].mxu1 }
 0x3e7   : > { %v5173_v31 = vpop.f32.mrb[38].mxu0  ;;  %v5382_v1 = vpop.f32.mrb[38].mxu1 }
 0x3e8   : > { %v7633_v32 = vpop.f32.mrb[39].mxu0  ;;  %v6621_v22 = vpack.c.bf16 %v5642_v27, %v5641_v26  ;;  %v5604_v33 = vmax.f32 %v5582_v38, %v5588_v28  ;;  %v5589_v34 = vmax.f32 %v5173_v31, %v5382_v1  ;;  %v7679_v35 = vpop.f32.mrb[39].mxu1 }
 0x3ea   : > { %6637 = vst [vmem:[%s9519_s30 + $0x28] sm:$0xff] %v6621_v22   ;;  %v5627_v29 = vadd.f32 %v9509_v54, %v5604_v33  ;;  %v5605_v36 = vmax.f32 %v5583_v45, %v5589_v34 }
 0x3ec   : > { %v5628_v37 = vadd.f32 %v9509_v54, %v5605_v36  ;;  %v5643_v43 = vmax.f32 %v5627_v29, 0.0 }
 0x3ed   : > { %v5178_v39 = vpop.f32.mrb[40].mxu0  ;;  %v5387_v40 = vpop.f32.mrb[40].mxu1 }
 0x3ee   : > { %v7636_v42 = vpop.f32.mrb[41].mxu0  ;;  %v5644_v41 = vmax.f32 %v5628_v37, 0.0  ;;  %v5590_v44 = vmax.f32 %v5178_v39, %v5387_v40  ;;  %v7682_v47 = vpop.f32.mrb[41].mxu1 }
 0x3ef   : > { %v5181_v46 = vpop.f32.mrb[42].mxu0  ;;  %v5390_v48 = vpop.f32.mrb[42].mxu1 }
 0x3f0   : > { %v7637_v38 = vpop.f32.mrb[43].mxu0  ;;  %v6626_v49 = vpack.c.bf16 %v5644_v41, %v5643_v43  ;;  %v5606_v50 = vmax.f32 %v5584_v57, %v5590_v44  ;;  %v5591_v52 = vmax.f32 %v5181_v46, %v5390_v48  ;;  %v7683_v53 = vpop.f32.mrb[43].mxu1 }
 0x3f2   : > { %6638 = vst [vmem:[%s9519_s30 + $0x30] sm:$0xff] %v6626_v49   ;;  %v5629_v45 = vadd.f32 %v9509_v54, %v5606_v50  ;;  %v5607_v55 = vmax.f32 %v5585_v0, %v5591_v52 }
 0x3f4   : > { %v5630_v56 = vadd.f32 %v9509_v54, %v5607_v55  ;;  %v5645_v59 = vmax.f32 %v5629_v45, 0.0 }
 0x3f6   : > { %v5646_v60 = vmax.f32 %v5630_v56, 0.0 }
 0x3f8   : > { %v6631_v61 = vpack.c.bf16 %v5646_v60, %v5645_v59 }
 0x3fa   : > { %6639 = vst [vmem:[%s9519_s30 + $0x38] sm:$0xff] %v6631_v61  }
 0x3fb PF: > { %s13_s12 = sadd.s32 1, %s8611_s12  }
 0x3fc   : > { %p10_p4 = scmp.ge.s32.totalorder %s13_s12, 29  }
 0x3fe   :  { %12 = sbr.rel (!%p10_p4) target bundleno = 1 (0x1), region = 71 }

// kernel: dcnn_simple_forward.4
= control target key start
LH: loop header
LB: loop body
LE: loop exit
PB: predicated region body
PF: predicated region fallthrough
CT: control target
= control target key end

     0   :  { %s7750_s12 = smov 0   ;;  %s8215_s0 = inlined_call_operand.vmem [shape: bf16[4,1248,128], index: 0, kind: input, shape index: {}]   ;;  %s8216_s1 = inlined_call_operand.vmem [shape: bf16[1152,128], index: 1, kind: input, shape index: {}]   ;;  %s8217_s2 = inlined_call_operand.vmem [shape: f32[1,128], index: 2, kind: input, shape index: {}]   ;;  %s8218_s3 = inlined_call_operand.vmem [shape: bf16[1152,128], index: 3, kind: output, shape index: {}]  }
   0x1 LB: > { %s5517_s13 = sadd.s32 4294967295, %s7728_s12   ;;  %p5520_p0 = scmp.ge.s32.totalorder %s7728_s12, 1  ;;  %s7728_s12 = sphi %s7750_s12, %s13_s12  }
   0x2   : > { %p127_p1 = scmp.lt.s32.totalorder %s7728_s12, 10 }
   0x4   : > { %p128_p2 = pnand %p5520_p0, %p127_p1 }
   0x5   : > { %v7470_v0 = vld [vmem:[%s8216_s1] sm:$0xff] (!%p128_p2)   ;;  %s7763_s16 = sshll.u32 (!%p128_p2), %s5517_s13, 7  ;;  %v7471_v1 = vld [vmem:[%s8216_s1 + $0x8] sm:$0xff] (!%p128_p2)   ;;  %v7472_v2 = vld [vmem:[%s8216_s1 + $0x10] sm:$0xff] (!%p128_p2)  }
   0x6   : > { %131 = sbr.rel (%p128_p2) target bundleno = 616 (0x268), region = 32  ;;  %s170_s19 = sshra.s32 (!%p128_p2), %s7763_s16, 3  ;;  %6494 = vmatprep.subr.bf16.mxu0 (!%p128_p2), %v7470_v0  ;;  %6530 = vmatprep.subr.bf16.mxu1 (!%p128_p2), %v7470_v0  ;;  %v7473_v3 = vld [vmem:[%s8216_s1 + $0x18] sm:$0xff] (!%p128_p2)   ;;  %v7474_v6 = vld [vmem:[%s8216_s1 + $0x20] sm:$0xff] (!%p128_p2)   ;;  %v7475_v7 = vld [vmem:[%s8216_s1 + $0x28] sm:$0xff] (!%p128_p2)  }
   0x7   : > { %s5524_s20 = sshll.u32 (!%p128_p2), %s170_s19, 2  ;;  %6495 = vmatpush3.bf16.msra.mxu0 (!%p128_p2), %v7470_v0  ;;  %6531 = vmatpush3.bf16.msra.mxu1 (!%p128_p2), %v7470_v0  ;;  %v7476_v8 = vld [vmem:[%s8216_s1 + $0x30] sm:$0xff] (!%p128_p2)   ;;  %v7477_v9 = vld [vmem:[%s8216_s1 + $0x38] sm:$0xff] (!%p128_p2)   ;;  %v7482_v10 = vld [vmem:[%s8216_s1 + $0x40] sm:$0xff] (!%p128_p2)   ;;  %s1797_s10 = sadd.s32 (!%p128_p2), 32, %s7763_s16 }
   0x8   : > { %6496 = vmatprep.subr.bf16.mxu0 (!%p128_p2), %v7471_v1  ;;  %6532 = vmatprep.subr.bf16.mxu1 (!%p128_p2), %v7471_v1  ;;  %s7775_s25 = scalar_lea.vmem (!%p128_p2), %s8215_s0, %s5524_s20  ;;  %v7483_v13 = vld [vmem:[%s8216_s1 + $0x48] sm:$0xff] (!%p128_p2)   ;;  %v7488_v16 = vld [vmem:[%s8216_s1 + $0x50] sm:$0xff] (!%p128_p2)   ;;  %v7491_v21 = vld [vmem:[%s8216_s1 + $0x58] sm:$0xff] (!%p128_p2)   ;;  %s1814_s15 = sshra.s32 (!%p128_p2), %s1797_s10, 3 }
   0x9   : > { %v7478_v4 = vld [vmem:[%s7775_s25] sm:$0xff] (!%p128_p2)   ;;  %v7479_v5 = vld [vmem:[%s7775_s25 + $0x270] sm:$0xff] (!%p128_p2)   ;;  %v7480_v11 = vld [vmem:[%s7775_s25 + $0x8] sm:$0xff] (!%p128_p2)   ;;  %s5712_s17 = sshll.u32 (!%p128_p2), %s1814_s15, 2  ;;  %s3521_s4 = sadd.s32 (!%p128_p2), 64, %s7763_s16 }
   0xa   : > { %6510 = vmatprep.mubr.bf16.mxu0 (!%p128_p2), %v7478_v4  ;;  %6546 = vmatprep.mubr.bf16.mxu1 (!%p128_p2), %v7479_v5  ;;  %v7481_v12 = vld [vmem:[%s7775_s25 + $0x278] sm:$0xff] (!%p128_p2)   ;;  %v7484_v14 = vld [vmem:[%s7775_s25 + $0x10] sm:$0xff] (!%p128_p2)   ;;  %v7485_v15 = vld [vmem:[%s7775_s25 + $0x280] sm:$0xff] (!%p128_p2)   ;;  %s7872_s22 = scalar_lea.vmem (!%p128_p2), %s8215_s0, %s5712_s17  ;;  %s3538_s7 = sshra.s32 (!%p128_p2), %s3521_s4, 3 }
   0xb   : > { %6497 = vmatpush3.bf16.msra.mxu0 (!%p128_p2), %v7471_v1  ;;  %6533 = vmatpush3.bf16.msra.mxu1 (!%p128_p2), %v7471_v1  ;;  %v7486_v17 = vld [vmem:[%s7775_s25 + $0x18] sm:$0xff] (!%p128_p2)   ;;  %v7487_v18 = vld [vmem:[%s7775_s25 + $0x288] sm:$0xff] (!%p128_p2)   ;;  %v7489_v19 = vld [vmem:[%s7775_s25 + $0x20] sm:$0xff] (!%p128_p2)   ;;  %s5900_s9 = sshll.u32 (!%p128_p2), %s3538_s7, 2  ;;  %s5521_s16 = sshll.u32 (!%p128_p2), %s5517_s13, 4 }
   0xc   : > { %6498 = vmatprep.subr.bf16.mxu0 (!%p128_p2), %v7472_v2  ;;  %6534 = vmatprep.subr.bf16.mxu1 (!%p128_p2), %v7472_v2  ;;  %v7490_v20 = vld [vmem:[%s7775_s25 + $0x290] sm:$0xff] (!%p128_p2)   ;;  %v7494_v22 = vld [vmem:[%s8216_s1 + $0x60] sm:$0xff] (!%p128_p2)   ;;  %v7492_v23 = vld [vmem:[%s7775_s25 + $0x28] sm:$0xff] (!%p128_p2)   ;;  %s7973_s14 = scalar_lea.vmem (!%p128_p2), %s8215_s0, %s5900_s9  ;;  %p147_p3 = scmp.lt.s32.totalorder (!%p128_p2), %s5521_s16, 143 }
   0xd   : > { %v7493_v24 = vld [vmem:[%s7775_s25 + $0x298] sm:$0xff]   ;;  %v7495_v25 = vld [vmem:[%s7775_s25 + $0x30] sm:$0xff]   ;;  %v7496_v26 = vld [vmem:[%s7775_s25 + $0x2a0] sm:$0xff]  }
   0xe   : > { %v7499_v27 = vld [vmem:[%s8216_s1 + $0x68] sm:$0xff]   ;;  %v7497_v28 = vld [vmem:[%s7775_s25 + $0x38] sm:$0xff]   ;;  %v7500_v29 = vld [vmem:[%s8216_s1 + $0x70] sm:$0xff]   ;;  %s8220_s16 = smov (!%p147_p3, %s5521_s16), 143 }
   0xf   : > { %6499 = vmatpush3.bf16.msra.mxu0 %v7472_v2  ;;  %6535 = vmatpush3.bf16.msra.mxu1 %v7472_v2  ;;  %v7498_v30 = vld [vmem:[%s7775_s25 + $0x2a8] sm:$0xff]   ;;  %v7501_v31 = vld [vmem:[%s7775_s25 + $0x40] sm:$0xff]   ;;  %v7502_v32 = vld [vmem:[%s7775_s25 + $0x2b0] sm:$0xff]   ;;  %s5522_s13 = sshll.u32 %s8220_s16, 2 }
  0x10   : > { %6500 = vmatprep.subr.bf16.mxu0 %v7473_v3  ;;  %6536 = vmatprep.subr.bf16.mxu1 %v7473_v3  ;;  %v7505_v33 = vld [vmem:[%s8216_s1 + $0x78] sm:$0xff]   ;;  %v7503_v34 = vld [vmem:[%s7775_s25 + $0x48] sm:$0xff]   ;;  %v7510_v36 = vld [vmem:[%s8216_s1 + $0x80] sm:$0xff]   ;;  %s8190_s11 = scalar_lea.vmem %s8218_s3, %s5522_s13 }
  0x11   : > { %v7504_v35 = vld [vmem:[%s7775_s25 + $0x2b8] sm:$0xff]   ;;  %v7506_v37 = vld [vmem:[%s7775_s25 + $0x270] sm:$0xff]   ;;  %v7507_v38 = vld [vmem:[%s7775_s25 + $0x4e0] sm:$0xff]  }
  0x12   : > { %v7508_v39 = vld [vmem:[%s7775_s25 + $0x278] sm:$0xff]   ;;  %v7509_v40 = vld [vmem:[%s7775_s25 + $0x4e8] sm:$0xff]   ;;  %v7512_v42 = vld [vmem:[%s7775_s25 + $0x280] sm:$0xff]  }
  0x13   : > { %6501 = vmatpush3.bf16.msra.mxu0 %v7473_v3  ;;  %6537 = vmatpush3.bf16.msra.mxu1 %v7473_v3  ;;  %v7511_v41 = vld [vmem:[%s8216_s1 + $0x88] sm:$0xff]   ;;  %v7513_v43 = vld [vmem:[%s7775_s25 + $0x4f0] sm:$0xff]   ;;  %v7515_v46 = vld [vmem:[%s7775_s25 + $0x4f8] sm:$0xff]  }
  0x14   : > { %6502 = vmatprep.subr.bf16.mxu0 %v7474_v6  ;;  %6538 = vmatprep.subr.bf16.mxu1 %v7474_v6  ;;  %v7516_v44 = vld [vmem:[%s8216_s1 + $0x90] sm:$0xff]   ;;  %v7514_v45 = vld [vmem:[%s7775_s25 + $0x288] sm:$0xff]   ;;  %v7518_v48 = vld [vmem:[%s7775_s25 + $0x500] sm:$0xff]  }
  0x15   : > { %v7517_v47 = vld [vmem:[%s7775_s25 + $0x290] sm:$0xff]   ;;  %v7519_v49 = vld [vmem:[%s8216_s1 + $0x98] sm:$0xff]   ;;  %v7522_v50 = vld [vmem:[%s8216_s1 + $0xa0] sm:$0xff]  }
  0x16   : > { %v7520_v51 = vld [vmem:[%s7775_s25 + $0x298] sm:$0xff]   ;;  %v7521_v52 = vld [vmem:[%s7775_s25 + $0x508] sm:$0xff]   ;;  %v7523_v53 = vld [vmem:[%s7775_s25 + $0x2a0] sm:$0xff]  }
  0x17   : > { %6503 = vmatpush3.bf16.msra.mxu0 %v7474_v6  ;;  %6539 = vmatpush3.bf16.msra.mxu1 %v7474_v6  ;;  %v7524_v54 = vld [vmem:[%s7775_s25 + $0x510] sm:$0xff]   ;;  %v7527_v55 = vld [vmem:[%s8216_s1 + $0xa8] sm:$0xff]   ;;  %v7526_v58 = vld [vmem:[%s7775_s25 + $0x518] sm:$0xff]  }
  0x18   : > { %6504 = vmatprep.subr.bf16.mxu0 %v7475_v7  ;;  %6540 = vmatprep.subr.bf16.mxu1 %v7475_v7  ;;  %v7525_v56 = vld [vmem:[%s7775_s25 + $0x2a8] sm:$0xff]   ;;  %v7528_v57 = vld [vmem:[%s8216_s1 + $0xb0] sm:$0xff]   ;;  %v7530_v60 = vld [vmem:[%s7775_s25 + $0x520] sm:$0xff]  }
  0x19   : > { %v7529_v59 = vld [vmem:[%s7775_s25 + $0x2b0] sm:$0xff]   ;;  %v7533_v61 = vld [vmem:[%s8216_s1 + $0xb8] sm:$0xff]   ;;  %v7532_v63 = vld [vmem:[%s7775_s25 + $0x528] sm:$0xff]  }
  0x1a   : > { %v7531_v62 = vld [vmem:[%s7775_s25 + $0x2b8] sm:$0xff]   ;;  %v7538_v0 = vld [vmem:[%s8216_s1 + $0xc0] sm:$0xff]   ;;  %v7535_v2 = vld [vmem:[%s7775_s25 + $0x750] sm:$0xff]  }
  0x1b   : > { %6505 = vmatpush3.bf16.msra.mxu0 %v7475_v7  ;;  %6541 = vmatpush3.bf16.msra.mxu1 %v7475_v7  ;;  %v7534_v1 = vld [vmem:[%s7775_s25 + $0x4e0] sm:$0xff]   ;;  %v7536_v3 = vld [vmem:[%s7775_s25 + $0x4e8] sm:$0xff]   ;;  %v7537_v4 = vld [vmem:[%s7775_s25 + $0x758] sm:$0xff]  }
  0x1c   : > { %6506 = vmatprep.subr.bf16.mxu0 %v7476_v8  ;;  %6542 = vmatprep.subr.bf16.mxu1 %v7476_v8  ;;  %v7539_v5 = vld [vmem:[%s8216_s1 + $0xc8] sm:$0xff]   ;;  %v7540_v6 = vld [vmem:[%s7775_s25 + $0x4f0] sm:$0xff]   ;;  %v7541_v7 = vld [vmem:[%s7775_s25 + $0x760] sm:$0xff]  }
  0x1f   : > { %6507 = vmatpush3.bf16.msra.mxu0 %v7476_v8  ;;  %6543 = vmatpush3.bf16.msra.mxu1 %v7476_v8  ;;  %v7544_v8 = vld [vmem:[%s8216_s1 + $0xd0] sm:$0xff]  }
  0x20   : > { %6508 = vmatprep.subr.bf16.mxu0 %v7477_v9  ;;  %6544 = vmatprep.subr.bf16.mxu1 %v7477_v9 }
  0x23   : > { %6509 = vmatpush3.bf16.msra.mxu0 %v7477_v9  ;;  %6545 = vmatpush3.bf16.msra.mxu1 %v7477_v9  ;;  %v7542_v9 = vld [vmem:[%s7775_s25 + $0x4f8] sm:$0xff]  }
  0x24   : > { %6566 = vmatprep.subr.bf16.mxu0 %v7482_v10  ;;  %6602 = vmatprep.subr.bf16.mxu1 %v7482_v10 }
  0x26   : > { %6511 = vmatmul.mubr.bf16.vlgmr.msra.gmra.mrb[0].mxu0 %v7480_v11  ;;  %6547 = vmatmul.mubr.bf16.vlgmr.msra.gmra.mrb[0].mxu1 %v7481_v12  ;;  %v7545_v11 = vld [vmem:[%s7775_s25 + $0x500] sm:$0xff]   ;;  %v7546_v12 = vld [vmem:[%s7775_s25 + $0x770] sm:$0xff]  }
  0x27   : > { %6567 = vmatpush3.bf16.msra.mxu0 %v7482_v10  ;;  %6603 = vmatpush3.bf16.msra.mxu1 %v7482_v10  ;;  %v7543_v10 = vld [vmem:[%s7775_s25 + $0x768] sm:$0xff]  }
  0x28   : > { %6568 = vmatprep.subr.bf16.mxu0 %v7483_v13  ;;  %6604 = vmatprep.subr.bf16.mxu1 %v7483_v13 }
  0x29   : > { %6514 = vmatprep.mubr.bf16.mxu0 %v7484_v14  ;;  %6550 = vmatprep.mubr.bf16.mxu1 %v7485_v15  ;;  %v7550_v14 = vld [vmem:[%s8216_s1 + $0xe0] sm:$0xff]   ;;  %v7548_v15 = vld [vmem:[%s7775_s25 + $0x508] sm:$0xff]  }
  0x2b   : > { %6569 = vmatpush3.bf16.msra.mxu0 %v7483_v13  ;;  %6605 = vmatpush3.bf16.msra.mxu1 %v7483_v13  ;;  %v7547_v13 = vld [vmem:[%s8216_s1 + $0xd8] sm:$0xff]  }
  0x2c   : > { %6570 = vmatprep.subr.bf16.mxu0 %v7488_v16  ;;  %6606 = vmatprep.subr.bf16.mxu1 %v7488_v16 }
  0x2e   : > { %6515 = vmatmul.mubr.bf16.gmra.mrb[4].mxu0 %v7486_v17  ;;  %6551 = vmatmul.mubr.bf16.gmra.mrb[4].mxu1 %v7487_v18  ;;  %v7551_v17 = vld [vmem:[%s7775_s25 + $0x510] sm:$0xff]   ;;  %v7552_v18 = vld [vmem:[%s7775_s25 + $0x780] sm:$0xff]  }
  0x2f   : > { %6571 = vmatpush3.bf16.msra.mxu0 %v7488_v16  ;;  %6607 = vmatpush3.bf16.msra.mxu1 %v7488_v16  ;;  %v7549_v16 = vld [vmem:[%s7775_s25 + $0x778] sm:$0xff]  }
  0x30   : > { %6518 = vmatprep.mubr.bf16.mxu0 %v7489_v19  ;;  %6554 = vmatprep.mubr.bf16.mxu1 %v7490_v20  ;;  %v7555_v19 = vld [vmem:[%s8216_s1 + $0xe8] sm:$0xff]   ;;  %v7553_v20 = vld [vmem:[%s7775_s25 + $0x518] sm:$0xff]  }
  0x31   : > { %6572 = vmatprep.subr.bf16.mxu0 %v7491_v21  ;;  %6608 = vmatprep.subr.bf16.mxu1 %v7491_v21 }
  0x33   : > { %6573 = vmatpush3.bf16.msra.mxu0 %v7491_v21  ;;  %6609 = vmatpush3.bf16.msra.mxu1 %v7491_v21  ;;  %v7556_v21 = vld [vmem:[%s8216_s1 + $0xf0] sm:$0xff]  }
  0x34   : > { %6574 = vmatprep.subr.bf16.mxu0 %v7494_v22  ;;  %6610 = vmatprep.subr.bf16.mxu1 %v7494_v22 }
  0x36   : > { %6519 = vmatmul.mubr.bf16.gmra.mrb[8].mxu0 %v7492_v23  ;;  %6555 = vmatmul.mubr.bf16.gmra.mrb[8].mxu1 %v7493_v24  ;;  %v7557_v23 = vld [vmem:[%s7775_s25 + $0x520] sm:$0xff]   ;;  %v7558_v24 = vld [vmem:[%s7775_s25 + $0x790] sm:$0xff]  }
  0x37   : > { %6575 = vmatpush3.bf16.msra.mxu0 %v7494_v22  ;;  %6611 = vmatpush3.bf16.msra.mxu1 %v7494_v22  ;;  %v7554_v22 = vld [vmem:[%s7775_s25 + $0x788] sm:$0xff]  }
  0x38   : > { %6522 = vmatprep.mubr.bf16.mxu0 %v7495_v25  ;;  %6558 = vmatprep.mubr.bf16.mxu1 %v7496_v26  ;;  %v7561_v25 = vld [vmem:[%s8216_s1 + $0xf8] sm:$0xff]   ;;  %v7559_v26 = vld [vmem:[%s7775_s25 + $0x528] sm:$0xff]  }
  0x39   : > { %6576 = vmatprep.subr.bf16.mxu0 %v7499_v27  ;;  %6612 = vmatprep.subr.bf16.mxu1 %v7499_v27 }
  0x3b   : > { %6577 = vmatpush3.bf16.msra.mxu0 %v7499_v27  ;;  %6613 = vmatpush3.bf16.msra.mxu1 %v7499_v27  ;;  %v7560_v27 = vld [vmem:[%s7775_s25 + $0x798] sm:$0xff]  }
  0x3c   : > { %6578 = vmatprep.subr.bf16.mxu0 %v7500_v29  ;;  %6614 = vmatprep.subr.bf16.mxu1 %v7500_v29 }
  0x3e   : > { %6523 = vmatmul.mubr.bf16.gmra.mrb[12].mxu0 %v7497_v28  ;;  %6559 = vmatmul.mubr.bf16.gmra.mrb[12].mxu1 %v7498_v30  ;;  %v7566_v28 = vld [vmem:[%s8216_s1 + $0x100] sm:$0xff]   ;;  %v7563_v30 = vld [vmem:[%s7872_s22 + $0x270] sm:$0xff]  }
  0x3f   : > { %6526 = vmatprep.mubr.bf16.mxu0 %v7501_v31  ;;  %6562 = vmatprep.mubr.bf16.mxu1 %v7502_v32  ;;  %v7564_v31 = vld [vmem:[%s7872_s22 + $0x8] sm:$0xff]   ;;  %v7565_v32 = vld [vmem:[%s7872_s22 + $0x278] sm:$0xff]  }
  0x40   : > { %6579 = vmatpush3.bf16.msra.mxu0 %v7500_v29  ;;  %6615 = vmatpush3.bf16.msra.mxu1 %v7500_v29  ;;  %v7562_v29 = vld [vmem:[%s7872_s22] sm:$0xff]  }
  0x41   : > { %6580 = vmatprep.subr.bf16.mxu0 %v7505_v33  ;;  %6616 = vmatprep.subr.bf16.mxu1 %v7505_v33 }
  0x44   : > { %6581 = vmatpush3.bf16.msra.mxu0 %v7505_v33  ;;  %6617 = vmatpush3.bf16.msra.mxu1 %v7505_v33  ;;  %v7567_v33 = vld [vmem:[%s8216_s1 + $0x108] sm:$0xff]  }
  0x45   : > { %6638 = vmatprep.subr.bf16.mxu0 %v7510_v36  ;;  %6674 = vmatprep.subr.bf16.mxu1 %v7510_v36 }
  0x46   : > { %6527 = vmatmul.mubr.bf16.gmra.mrb[16].mxu0 %v7503_v34  ;;  %6563 = vmatmul.mubr.bf16.gmra.mrb[16].mxu1 %v7504_v35  ;;  %v7568_v34 = vld [vmem:[%s7872_s22 + $0x10] sm:$0xff]   ;;  %v7569_v35 = vld [vmem:[%s7872_s22 + $0x280] sm:$0xff]  }
  0x47   : > { %6582 = vmatprep.mubr.bf16.mxu0 %v7506_v37  ;;  %6618 = vmatprep.mubr.bf16.mxu1 %v7507_v38  ;;  %v7570_v37 = vld [vmem:[%s7872_s22 + $0x18] sm:$0xff]   ;;  %v7571_v38 = vld [vmem:[%s7872_s22 + $0x288] sm:$0xff]  }
  0x4e   : > { %6583 = vmatmul.mubr.bf16.vlgmr.msra.gmra.mrb[0].mxu0 %v7508_v39  ;;  %6619 = vmatmul.mubr.bf16.vlgmr.msra.gmra.mrb[0].mxu1 %v7509_v40  ;;  %v7573_v39 = vld [vmem:[%s7872_s22 + $0x20] sm:$0xff]   ;;  %v7574_v40 = vld [vmem:[%s7872_s22 + $0x290] sm:$0xff]  }
  0x4f   : > { %6639 = vmatpush3.bf16.msra.mxu0 %v7510_v36  ;;  %6675 = vmatpush3.bf16.msra.mxu1 %v7510_v36  ;;  %v7572_v36 = vld [vmem:[%s8216_s1 + $0x110] sm:$0xff]  }
  0x50   : > { %6640 = vmatprep.subr.bf16.mxu0 %v7511_v41  ;;  %6676 = vmatprep.subr.bf16.mxu1 %v7511_v41 }
  0x51   : > { %6586 = vmatprep.mubr.bf16.mxu0 %v7512_v42  ;;  %6622 = vmatprep.mubr.bf16.mxu1 %v7513_v43  ;;  %v7578_v42 = vld [vmem:[%s8216_s1 + $0x120] sm:$0xff]   ;;  %v7576_v43 = vld [vmem:[%s7872_s22 + $0x28] sm:$0xff]  }
  0x53   : > { %6641 = vmatpush3.bf16.msra.mxu0 %v7511_v41  ;;  %6677 = vmatpush3.bf16.msra.mxu1 %v7511_v41  ;;  %v7575_v41 = vld [vmem:[%s8216_s1 + $0x118] sm:$0xff]  }
  0x54   : > { %6642 = vmatprep.subr.bf16.mxu0 %v7516_v44  ;;  %6678 = vmatprep.subr.bf16.mxu1 %v7516_v44 }
  0x56   : > { %6587 = vmatmul.mubr.bf16.gmra.mrb[4].mxu0 %v7514_v45  ;;  %6623 = vmatmul.mubr.bf16.gmra.mrb[4].mxu1 %v7515_v46  ;;  %v7579_v45 = vld [vmem:[%s7872_s22 + $0x30] sm:$0xff]   ;;  %v7580_v46 = vld [vmem:[%s7872_s22 + $0x2a0] sm:$0xff]  }
  0x57   : > { %6643 = vmatpush3.bf16.msra.mxu0 %v7516_v44  ;;  %6679 = vmatpush3.bf16.msra.mxu1 %v7516_v44  ;;  %v7577_v44 = vld [vmem:[%s7872_s22 + $0x298] sm:$0xff]  }
  0x58   : > { %6590 = vmatprep.mubr.bf16.mxu0 %v7517_v47  ;;  %6626 = vmatprep.mubr.bf16.mxu1 %v7518_v48  ;;  %v7583_v47 = vld [vmem:[%s8216_s1 + $0x128] sm:$0xff]   ;;  %v7581_v48 = vld [vmem:[%s7872_s22 + $0x38] sm:$0xff]  }
  0x59   : > { %6644 = vmatprep.subr.bf16.mxu0 %v7519_v49  ;;  %6680 = vmatprep.subr.bf16.mxu1 %v7519_v49 }
  0x5b   : > { %6645 = vmatpush3.bf16.msra.mxu0 %v7519_v49  ;;  %6681 = vmatpush3.bf16.msra.mxu1 %v7519_v49  ;;  %v7584_v49 = vld [vmem:[%s8216_s1 + $0x130] sm:$0xff]  }
  0x5c   : > { %6646 = vmatprep.subr.bf16.mxu0 %v7522_v50  ;;  %6682 = vmatprep.subr.bf16.mxu1 %v7522_v50 }
  0x5e   : > { %6591 = vmatmul.mubr.bf16.gmra.mrb[8].mxu0 %v7520_v51  ;;  %6627 = vmatmul.mubr.bf16.gmra.mrb[8].mxu1 %v7521_v52  ;;  %v7585_v51 = vld [vmem:[%s7872_s22 + $0x40] sm:$0xff]   ;;  %v7586_v52 = vld [vmem:[%s7872_s22 + $0x2b0] sm:$0xff]  }
  0x5f   : > { %6647 = vmatpush3.bf16.msra.mxu0 %v7522_v50  ;;  %6683 = vmatpush3.bf16.msra.mxu1 %v7522_v50  ;;  %v7582_v50 = vld [vmem:[%s7872_s22 + $0x2a8] sm:$0xff]  }
  0x60   : > { %6594 = vmatprep.mubr.bf16.mxu0 %v7523_v53  ;;  %6630 = vmatprep.mubr.bf16.mxu1 %v7524_v54  ;;  %v7589_v53 = vld [vmem:[%s8216_s1 + $0x138] sm:$0xff]   ;;  %v7587_v54 = vld [vmem:[%s7872_s22 + $0x48] sm:$0xff]  }
  0x61   : > { %6648 = vmatprep.subr.bf16.mxu0 %v7527_v55  ;;  %6684 = vmatprep.subr.bf16.mxu1 %v7527_v55 }
  0x63   : > { %6649 = vmatpush3.bf16.msra.mxu0 %v7527_v55  ;;  %6685 = vmatpush3.bf16.msra.mxu1 %v7527_v55  ;;  %v7588_v55 = vld [vmem:[%s7872_s22 + $0x2b8] sm:$0xff]  }
  0x64   : > { %6650 = vmatprep.subr.bf16.mxu0 %v7528_v57  ;;  %6686 = vmatprep.subr.bf16.mxu1 %v7528_v57 }
  0x66   : > { %6595 = vmatmul.mubr.bf16.gmra.mrb[12].mxu0 %v7525_v56  ;;  %6631 = vmatmul.mubr.bf16.gmra.mrb[12].mxu1 %v7526_v58  ;;  %v7594_v56 = vld [vmem:[%s8216_s1 + $0x140] sm:$0xff]  }
  0x67   : > { %6598 = vmatprep.mubr.bf16.mxu0 %v7529_v59  ;;  %6634 = vmatprep.mubr.bf16.mxu1 %v7530_v60  ;;  %v7591_v58 = vld [vmem:[%s7872_s22 + $0x4e0] sm:$0xff]   ;;  %v7592_v59 = vld [vmem:[%s7872_s22 + $0x278] sm:$0xff]   ;;  %v7593_v60 = vld [vmem:[%s7872_s22 + $0x4e8] sm:$0xff]  }
  0x68   : > { %6651 = vmatpush3.bf16.msra.mxu0 %v7528_v57  ;;  %6687 = vmatpush3.bf16.msra.mxu1 %v7528_v57  ;;  %v7590_v57 = vld [vmem:[%s7872_s22 + $0x270] sm:$0xff]  }
  0x69   : > { %6652 = vmatprep.subr.bf16.mxu0 %v7533_v61  ;;  %6688 = vmatprep.subr.bf16.mxu1 %v7533_v61 }
  0x6c   : > { %6653 = vmatpush3.bf16.msra.mxu0 %v7533_v61  ;;  %6689 = vmatpush3.bf16.msra.mxu1 %v7533_v61  ;;  %v7595_v61 = vld [vmem:[%s8216_s1 + $0x148] sm:$0xff]  }
  0x6d   : > { %6710 = vmatprep.subr.bf16.mxu0 %v7538_v0  ;;  %6746 = vmatprep.subr.bf16.mxu1 %v7538_v0 }
  0x6e   : > { %6599 = vmatmul.mubr.bf16.gmra.mrb[16].mxu0 %v7531_v62  ;;  %6635 = vmatmul.mubr.bf16.gmra.mrb[16].mxu1 %v7532_v63  ;;  %v7596_v62 = vld [vmem:[%s7872_s22 + $0x280] sm:$0xff]   ;;  %v7597_v63 = vld [vmem:[%s7872_s22 + $0x4f0] sm:$0xff]  }
  0x6f   : > { %6654 = vmatprep.mubr.bf16.mxu0 %v7534_v1  ;;  %6690 = vmatprep.mubr.bf16.mxu1 %v7535_v2  ;;  %v7598_v1 = vld [vmem:[%s7872_s22 + $0x288] sm:$0xff]   ;;  %v7599_v2 = vld [vmem:[%s7872_s22 + $0x4f8] sm:$0xff]  }
  0x76   : > { %6655 = vmatmul.mubr.bf16.vlgmr.msra.gmra.mrb[0].mxu0 %v7536_v3  ;;  %6691 = vmatmul.mubr.bf16.vlgmr.msra.gmra.mrb[0].mxu1 %v7537_v4  ;;  %v7601_v3 = vld [vmem:[%s7872_s22 + $0x290] sm:$0xff]   ;;  %v7602_v4 = vld [vmem:[%s7872_s22 + $0x500] sm:$0xff]  }
  0x77   : > { %6711 = vmatpush3.bf16.msra.mxu0 %v7538_v0  ;;  %6747 = vmatpush3.bf16.msra.mxu1 %v7538_v0  ;;  %v7600_v0 = vld [vmem:[%s8216_s1 + $0x150] sm:$0xff]  }
  0x78   : > { %6712 = vmatprep.subr.bf16.mxu0 %v7539_v5  ;;  %6748 = vmatprep.subr.bf16.mxu1 %v7539_v5 }
  0x79   : > { %6658 = vmatprep.mubr.bf16.mxu0 %v7540_v6  ;;  %6694 = vmatprep.mubr.bf16.mxu1 %v7541_v7  ;;  %v7606_v6 = vld [vmem:[%s8216_s1 + $0x160] sm:$0xff]   ;;  %v7604_v7 = vld [vmem:[%s7872_s22 + $0x298] sm:$0xff]  }
  0x7b   : > { %6713 = vmatpush3.bf16.msra.mxu0 %v7539_v5  ;;  %6749 = vmatpush3.bf16.msra.mxu1 %v7539_v5  ;;  %v7603_v5 = vld [vmem:[%s8216_s1 + $0x158] sm:$0xff]  }
  0x7c   : > { %6714 = vmatprep.subr.bf16.mxu0 %v7544_v8  ;;  %6750 = vmatprep.subr.bf16.mxu1 %v7544_v8 }
  0x7e   : > { %6659 = vmatmul.mubr.bf16.gmra.mrb[4].mxu0 %v7542_v9  ;;  %6695 = vmatmul.mubr.bf16.gmra.mrb[4].mxu1 %v7543_v10  ;;  %v7607_v9 = vld [vmem:[%s7872_s22 + $0x2a0] sm:$0xff]   ;;  %v7608_v10 = vld [vmem:[%s7872_s22 + $0x510] sm:$0xff]  }
  0x7f   : > { %6715 = vmatpush3.bf16.msra.mxu0 %v7544_v8  ;;  %6751 = vmatpush3.bf16.msra.mxu1 %v7544_v8  ;;  %v7605_v8 = vld [vmem:[%s7872_s22 + $0x508] sm:$0xff]  }
  0x80   : > { %6662 = vmatprep.mubr.bf16.mxu0 %v7545_v11  ;;  %6698 = vmatprep.mubr.bf16.mxu1 %v7546_v12  ;;  %v7611_v11 = vld [vmem:[%s8216_s1 + $0x168] sm:$0xff]  }
  0x81   : > { %6716 = vmatprep.subr.bf16.mxu0 %v7547_v13  ;;  %6752 = vmatprep.subr.bf16.mxu1 %v7547_v13  ;;  %v7609_v12 = vld [vmem:[%s7872_s22 + $0x2a8] sm:$0xff]  }
  0x83   : > { %6717 = vmatpush3.bf16.msra.mxu0 %v7547_v13  ;;  %6753 = vmatpush3.bf16.msra.mxu1 %v7547_v13  ;;  %v7612_v13 = vld [vmem:[%s8216_s1 + $0x170] sm:$0xff]  }
  0x84   : > { %6718 = vmatprep.subr.bf16.mxu0 %v7550_v14  ;;  %6754 = vmatprep.subr.bf16.mxu1 %v7550_v14 }
  0x86   : > { %6663 = vmatmul.mubr.bf16.gmra.mrb[8].mxu0 %v7548_v15  ;;  %6699 = vmatmul.mubr.bf16.gmra.mrb[8].mxu1 %v7549_v16  ;;  %v7613_v15 = vld [vmem:[%s7872_s22 + $0x2b0] sm:$0xff]   ;;  %v7614_v16 = vld [vmem:[%s7872_s22 + $0x520] sm:$0xff]  }
  0x87   : > { %6719 = vmatpush3.bf16.msra.mxu0 %v7550_v14  ;;  %6755 = vmatpush3.bf16.msra.mxu1 %v7550_v14  ;;  %v7610_v14 = vld [vmem:[%s7872_s22 + $0x518] sm:$0xff]  }
  0x88   : > { %6666 = vmatprep.mubr.bf16.mxu0 %v7551_v17  ;;  %6702 = vmatprep.mubr.bf16.mxu1 %v7552_v18  ;;  %v7617_v17 = vld [vmem:[%s8216_s1 + $0x178] sm:$0xff]  }
  0x89   : > { %6720 = vmatprep.subr.bf16.mxu0 %v7555_v19  ;;  %6756 = vmatprep.subr.bf16.mxu1 %v7555_v19  ;;  %v7615_v18 = vld [vmem:[%s7872_s22 + $0x2b8] sm:$0xff]  }
  0x8b   : > { %6721 = vmatpush3.bf16.msra.mxu0 %v7555_v19  ;;  %6757 = vmatpush3.bf16.msra.mxu1 %v7555_v19  ;;  %v7616_v19 = vld [vmem:[%s7872_s22 + $0x528] sm:$0xff]  }
  0x8c   : > { %6722 = vmatprep.subr.bf16.mxu0 %v7556_v21  ;;  %6758 = vmatprep.subr.bf16.mxu1 %v7556_v21 }
  0x8e   : > { %6667 = vmatmul.mubr.bf16.gmra.mrb[12].mxu0 %v7553_v20  ;;  %6703 = vmatmul.mubr.bf16.gmra.mrb[12].mxu1 %v7554_v22  ;;  %v7622_v20 = vld [vmem:[%s8216_s1 + $0x180] sm:$0xff]   ;;  %v7619_v22 = vld [vmem:[%s7872_s22 + $0x750] sm:$0xff]  }
  0x8f   : > { %6670 = vmatprep.mubr.bf16.mxu0 %v7557_v23  ;;  %6706 = vmatprep.mubr.bf16.mxu1 %v7558_v24  ;;  %v7620_v23 = vld [vmem:[%s7872_s22 + $0x4e8] sm:$0xff]   ;;  %v7621_v24 = vld [vmem:[%s7872_s22 + $0x758] sm:$0xff]  }
  0x90   : > { %6723 = vmatpush3.bf16.msra.mxu0 %v7556_v21  ;;  %6759 = vmatpush3.bf16.msra.mxu1 %v7556_v21  ;;  %v7618_v21 = vld [vmem:[%s7872_s22 + $0x4e0] sm:$0xff]  }
  0x91   : > { %6724 = vmatprep.subr.bf16.mxu0 %v7561_v25  ;;  %6760 = vmatprep.subr.bf16.mxu1 %v7561_v25 }
  0x94   : > { %6725 = vmatpush3.bf16.msra.mxu0 %v7561_v25  ;;  %6761 = vmatpush3.bf16.msra.mxu1 %v7561_v25  ;;  %v7623_v25 = vld [vmem:[%s8216_s1 + $0x188] sm:$0xff]  }
  0x95   : > { %6782 = vmatprep.subr.bf16.mxu0 %v7566_v28  ;;  %6818 = vmatprep.subr.bf16.mxu1 %v7566_v28 }
  0x96   : > { %6671 = vmatmul.mubr.bf16.gmra.mrb[16].mxu0 %v7559_v26  ;;  %6707 = vmatmul.mubr.bf16.gmra.mrb[16].mxu1 %v7560_v27  ;;  %v7624_v26 = vld [vmem:[%s7872_s22 + $0x4f0] sm:$0xff]   ;;  %v7625_v27 = vld [vmem:[%s7872_s22 + $0x760] sm:$0xff]  }
  0x97   : > { %6726 = vmatprep.mubr.bf16.mxu0 %v7562_v29  ;;  %6762 = vmatprep.mubr.bf16.mxu1 %v7563_v30  ;;  %v7626_v29 = vld [vmem:[%s7872_s22 + $0x4f8] sm:$0xff]   ;;  %v7627_v30 = vld [vmem:[%s7872_s22 + $0x768] sm:$0xff]  }
  0x9e   : > { %6727 = vmatmul.mubr.bf16.vlgmr.msra.gmra.mrb[0].mxu0 %v7564_v31  ;;  %6763 = vmatmul.mubr.bf16.vlgmr.msra.gmra.mrb[0].mxu1 %v7565_v32  ;;  %v7629_v31 = vld [vmem:[%s7872_s22 + $0x500] sm:$0xff]   ;;  %v7630_v32 = vld [vmem:[%s7872_s22 + $0x770] sm:$0xff]  }
  0x9f   : > { %6783 = vmatpush3.bf16.msra.mxu0 %v7566_v28  ;;  %6819 = vmatpush3.bf16.msra.mxu1 %v7566_v28  ;;  %v7628_v28 = vld [vmem:[%s8216_s1 + $0x190] sm:$0xff]  }
  0xa0   : > { %6784 = vmatprep.subr.bf16.mxu0 %v7567_v33  ;;  %6820 = vmatprep.subr.bf16.mxu1 %v7567_v33 }
  0xa1   : > { %6730 = vmatprep.mubr.bf16.mxu0 %v7568_v34  ;;  %6766 = vmatprep.mubr.bf16.mxu1 %v7569_v35  ;;  %v7632_v34 = vld [vmem:[%s7872_s22 + $0x508] sm:$0xff]   ;;  %v7634_v35 = vld [vmem:[%s8216_s1 + $0x1a0] sm:$0xff]  }
  0xa3   : > { %6785 = vmatpush3.bf16.msra.mxu0 %v7567_v33  ;;  %6821 = vmatpush3.bf16.msra.mxu1 %v7567_v33  ;;  %v7631_v33 = vld [vmem:[%s8216_s1 + $0x198] sm:$0xff]  }
  0xa4   : > { %6786 = vmatprep.subr.bf16.mxu0 %v7572_v36  ;;  %6822 = vmatprep.subr.bf16.mxu1 %v7572_v36 }
  0xa6   : > { %6731 = vmatmul.mubr.bf16.gmra.mrb[4].mxu0 %v7570_v37  ;;  %6767 = vmatmul.mubr.bf16.gmra.mrb[4].mxu1 %v7571_v38  ;;  %v7635_v37 = vld [vmem:[%s7872_s22 + $0x510] sm:$0xff]   ;;  %v7636_v38 = vld [vmem:[%s7872_s22 + $0x780] sm:$0xff]  }
  0xa7   : > { %6787 = vmatpush3.bf16.msra.mxu0 %v7572_v36  ;;  %6823 = vmatpush3.bf16.msra.mxu1 %v7572_v36  ;;  %v7633_v36 = vld [vmem:[%s7872_s22 + $0x778] sm:$0xff]  }
  0xa8   : > { %6734 = vmatprep.mubr.bf16.mxu0 %v7573_v39  ;;  %6770 = vmatprep.mubr.bf16.mxu1 %v7574_v40  ;;  %v7639_v39 = vld [vmem:[%s8216_s1 + $0x1a8] sm:$0xff]   ;;  %v7640_v40 = vld [vmem:[%s8216_s1 + $0x1b0] sm:$0xff]  }
  0xa9   : > { %6788 = vmatprep.subr.bf16.mxu0 %v7575_v41  ;;  %6824 = vmatprep.subr.bf16.mxu1 %v7575_v41 }
  0xab   : > { %6789 = vmatpush3.bf16.msra.mxu0 %v7575_v41  ;;  %6825 = vmatpush3.bf16.msra.mxu1 %v7575_v41  ;;  %v7637_v41 = vld [vmem:[%s7872_s22 + $0x518] sm:$0xff]  }
  0xac   : > { %6790 = vmatprep.subr.bf16.mxu0 %v7578_v42  ;;  %6826 = vmatprep.subr.bf16.mxu1 %v7578_v42 }
  0xae   : > { %6735 = vmatmul.mubr.bf16.gmra.mrb[8].mxu0 %v7576_v43  ;;  %6771 = vmatmul.mubr.bf16.gmra.mrb[8].mxu1 %v7577_v44  ;;  %v7641_v43 = vld [vmem:[%s7872_s22 + $0x520] sm:$0xff]   ;;  %v7642_v44 = vld [vmem:[%s7872_s22 + $0x790] sm:$0xff]  }
  0xaf   : > { %6791 = vmatpush3.bf16.msra.mxu0 %v7578_v42  ;;  %6827 = vmatpush3.bf16.msra.mxu1 %v7578_v42  ;;  %v7638_v42 = vld [vmem:[%s7872_s22 + $0x788] sm:$0xff]  }
  0xb0   : > { %6738 = vmatprep.mubr.bf16.mxu0 %v7579_v45  ;;  %6774 = vmatprep.mubr.bf16.mxu1 %v7580_v46  ;;  %v7645_v45 = vld [vmem:[%s8216_s1 + $0x1b8] sm:$0xff]   ;;  %v7650_v46 = vld [vmem:[%s8216_s1 + $0x1c0] sm:$0xff]  }
  0xb1   : > { %6792 = vmatprep.subr.bf16.mxu0 %v7583_v47  ;;  %6828 = vmatprep.subr.bf16.mxu1 %v7583_v47 }
  0xb3   : > { %6793 = vmatpush3.bf16.msra.mxu0 %v7583_v47  ;;  %6829 = vmatpush3.bf16.msra.mxu1 %v7583_v47  ;;  %v7643_v47 = vld [vmem:[%s7872_s22 + $0x528] sm:$0xff]  }
  0xb4   : > { %6794 = vmatprep.subr.bf16.mxu0 %v7584_v49  ;;  %6830 = vmatprep.subr.bf16.mxu1 %v7584_v49 }
  0xb6   : > { %6739 = vmatmul.mubr.bf16.gmra.mrb[12].mxu0 %v7581_v48  ;;  %6775 = vmatmul.mubr.bf16.gmra.mrb[12].mxu1 %v7582_v50  ;;  %v7644_v48 = vld [vmem:[%s7872_s22 + $0x798] sm:$0xff]   ;;  %v7647_v50 = vld [vmem:[%s7973_s14 + $0x270] sm:$0xff]  }
  0xb7   : > { %6742 = vmatprep.mubr.bf16.mxu0 %v7585_v51  ;;  %6778 = vmatprep.mubr.bf16.mxu1 %v7586_v52  ;;  %v7648_v51 = vld [vmem:[%s7973_s14 + $0x8] sm:$0xff]   ;;  %v7649_v52 = vld [vmem:[%s7973_s14 + $0x278] sm:$0xff]  }
  0xb8   : > { %6795 = vmatpush3.bf16.msra.mxu0 %v7584_v49  ;;  %6831 = vmatpush3.bf16.msra.mxu1 %v7584_v49  ;;  %v7646_v49 = vld [vmem:[%s7973_s14] sm:$0xff]  }
  0xb9   : > { %6796 = vmatprep.subr.bf16.mxu0 %v7589_v53  ;;  %6832 = vmatprep.subr.bf16.mxu1 %v7589_v53 }
  0xbc   : > { %6797 = vmatpush3.bf16.msra.mxu0 %v7589_v53  ;;  %6833 = vmatpush3.bf16.msra.mxu1 %v7589_v53  ;;  %v7651_v53 = vld [vmem:[%s8216_s1 + $0x1c8] sm:$0xff]  }
  0xbd   : > { %6854 = vmatprep.subr.bf16.mxu0 %v7594_v56  ;;  %6890 = vmatprep.subr.bf16.mxu1 %v7594_v56 }
  0xbe   : > { %6743 = vmatmul.mubr.bf16.gmra.mrb[16].mxu0 %v7587_v54  ;;  %6779 = vmatmul.mubr.bf16.gmra.mrb[16].mxu1 %v7588_v55  ;;  %v7652_v54 = vld [vmem:[%s7973_s14 + $0x10] sm:$0xff]   ;;  %v7653_v55 = vld [vmem:[%s7973_s14 + $0x280] sm:$0xff]  }
  0xbf   : > { %6798 = vmatprep.mubr.bf16.mxu0 %v7590_v57  ;;  %6834 = vmatprep.mubr.bf16.mxu1 %v7591_v58  ;;  %v7654_v57 = vld [vmem:[%s7973_s14 + $0x18] sm:$0xff]   ;;  %v7655_v58 = vld [vmem:[%s7973_s14 + $0x288] sm:$0xff]  }
  0xc6   : > { %6799 = vmatmul.mubr.bf16.vlgmr.msra.gmra.mrb[0].mxu0 %v7592_v59  ;;  %6835 = vmatmul.mubr.bf16.vlgmr.msra.gmra.mrb[0].mxu1 %v7593_v60  ;;  %v7657_v59 = vld [vmem:[%s7973_s14 + $0x20] sm:$0xff]   ;;  %v7658_v60 = vld [vmem:[%s7973_s14 + $0x290] sm:$0xff]  }
  0xc7   : > { %6855 = vmatpush3.bf16.msra.mxu0 %v7594_v56  ;;  %6891 = vmatpush3.bf16.msra.mxu1 %v7594_v56  ;;  %v7656_v56 = vld [vmem:[%s8216_s1 + $0x1d0] sm:$0xff]  }
  0xc8   : > { %6856 = vmatprep.subr.bf16.mxu0 %v7595_v61  ;;  %6892 = vmatprep.subr.bf16.mxu1 %v7595_v61 }
  0xc9   : > { %6802 = vmatprep.mubr.bf16.mxu0 %v7596_v62  ;;  %6838 = vmatprep.mubr.bf16.mxu1 %v7597_v63  ;;  %v7662_v62 = vld [vmem:[%s8216_s1 + $0x1e0] sm:$0xff]   ;;  %v7660_v63 = vld [vmem:[%s7973_s14 + $0x28] sm:$0xff]  }
  0xcb   : > { %6857 = vmatpush3.bf16.msra.mxu0 %v7595_v61  ;;  %6893 = vmatpush3.bf16.msra.mxu1 %v7595_v61  ;;  %v7659_v61 = vld [vmem:[%s8216_s1 + $0x1d8] sm:$0xff]  }
  0xcc   : > { %6858 = vmatprep.subr.bf16.mxu0 %v7600_v0  ;;  %6894 = vmatprep.subr.bf16.mxu1 %v7600_v0 }
  0xce   : > { %6803 = vmatmul.mubr.bf16.gmra.mrb[4].mxu0 %v7598_v1  ;;  %6839 = vmatmul.mubr.bf16.gmra.mrb[4].mxu1 %v7599_v2  ;;  %v7663_v1 = vld [vmem:[%s7973_s14 + $0x30] sm:$0xff]   ;;  %v7664_v2 = vld [vmem:[%s7973_s14 + $0x2a0] sm:$0xff]  }
  0xcf   : > { %6859 = vmatpush3.bf16.msra.mxu0 %v7600_v0  ;;  %6895 = vmatpush3.bf16.msra.mxu1 %v7600_v0  ;;  %v7661_v0 = vld [vmem:[%s7973_s14 + $0x298] sm:$0xff]  }
  0xd0   : > { %6806 = vmatprep.mubr.bf16.mxu0 %v7601_v3  ;;  %6842 = vmatprep.mubr.bf16.mxu1 %v7602_v4  ;;  %v7667_v3 = vld [vmem:[%s8216_s1 + $0x1e8] sm:$0xff]   ;;  %v7668_v4 = vld [vmem:[%s8216_s1 + $0x1f0] sm:$0xff]  }
  0xd1   : > { %6860 = vmatprep.subr.bf16.mxu0 %v7603_v5  ;;  %6896 = vmatprep.subr.bf16.mxu1 %v7603_v5 }
  0xd3   : > { %6861 = vmatpush3.bf16.msra.mxu0 %v7603_v5  ;;  %6897 = vmatpush3.bf16.msra.mxu1 %v7603_v5  ;;  %v7665_v5 = vld [vmem:[%s7973_s14 + $0x38] sm:$0xff]  }
  0xd4   : > { %6862 = vmatprep.subr.bf16.mxu0 %v7606_v6  ;;  %6898 = vmatprep.subr.bf16.mxu1 %v7606_v6 }
  0xd6   : > { %6807 = vmatmul.mubr.bf16.gmra.mrb[8].mxu0 %v7604_v7  ;;  %6843 = vmatmul.mubr.bf16.gmra.mrb[8].mxu1 %v7605_v8  ;;  %v7669_v7 = vld [vmem:[%s7973_s14 + $0x40] sm:$0xff]   ;;  %v7670_v8 = vld [vmem:[%s7973_s14 + $0x2b0] sm:$0xff]  }
  0xd7   : > { %6863 = vmatpush3.bf16.msra.mxu0 %v7606_v6  ;;  %6899 = vmatpush3.bf16.msra.mxu1 %v7606_v6  ;;  %v7666_v6 = vld [vmem:[%s7973_s14 + $0x2a8] sm:$0xff]  }
  0xd8   : > { %6810 = vmatprep.mubr.bf16.mxu0 %v7607_v9  ;;  %6846 = vmatprep.mubr.bf16.mxu1 %v7608_v10  ;;  %v7673_v9 = vld [vmem:[%s8216_s1 + $0x1f8] sm:$0xff]   ;;  %v7678_v10 = vld [vmem:[%s8216_s1 + $0x200] sm:$0xff]  }
  0xd9   : > { %6864 = vmatprep.subr.bf16.mxu0 %v7611_v11  ;;  %6900 = vmatprep.subr.bf16.mxu1 %v7611_v11 }
  0xdb   : > { %6865 = vmatpush3.bf16.msra.mxu0 %v7611_v11  ;;  %6901 = vmatpush3.bf16.msra.mxu1 %v7611_v11  ;;  %v7671_v11 = vld [vmem:[%s7973_s14 + $0x48] sm:$0xff]  }
  0xdc   : > { %6866 = vmatprep.subr.bf16.mxu0 %v7612_v13  ;;  %6902 = vmatprep.subr.bf16.mxu1 %v7612_v13 }
  0xde   : > { %6811 = vmatmul.mubr.bf16.gmra.mrb[12].mxu0 %v7609_v12  ;;  %6847 = vmatmul.mubr.bf16.gmra.mrb[12].mxu1 %v7610_v14  ;;  %v7672_v12 = vld [vmem:[%s7973_s14 + $0x2b8] sm:$0xff]   ;;  %v7675_v14 = vld [vmem:[%s7973_s14 + $0x4e0] sm:$0xff]  }
  0xdf   : > { %6814 = vmatprep.mubr.bf16.mxu0 %v7613_v15  ;;  %6850 = vmatprep.mubr.bf16.mxu1 %v7614_v16  ;;  %v7676_v15 = vld [vmem:[%s7973_s14 + $0x278] sm:$0xff]   ;;  %v7677_v16 = vld [vmem:[%s7973_s14 + $0x4e8] sm:$0xff]  }
  0xe0   : > { %6867 = vmatpush3.bf16.msra.mxu0 %v7612_v13  ;;  %6903 = vmatpush3.bf16.msra.mxu1 %v7612_v13  ;;  %v7674_v13 = vld [vmem:[%s7973_s14 + $0x270] sm:$0xff]  }
  0xe1   : > { %6868 = vmatprep.subr.bf16.mxu0 %v7617_v17  ;;  %6904 = vmatprep.subr.bf16.mxu1 %v7617_v17 }
  0xe4   : > { %6869 = vmatpush3.bf16.msra.mxu0 %v7617_v17  ;;  %6905 = vmatpush3.bf16.msra.mxu1 %v7617_v17  ;;  %v7679_v17 = vld [vmem:[%s8216_s1 + $0x208] sm:$0xff]  }
  0xe5   : > { %6926 = vmatprep.subr.bf16.mxu0 %v7622_v20  ;;  %6962 = vmatprep.subr.bf16.mxu1 %v7622_v20 }
  0xe6   : > { %6815 = vmatmul.mubr.bf16.gmra.mrb[16].mxu0 %v7615_v18  ;;  %6851 = vmatmul.mubr.bf16.gmra.mrb[16].mxu1 %v7616_v19  ;;  %v7680_v18 = vld [vmem:[%s7973_s14 + $0x280] sm:$0xff]   ;;  %v7681_v19 = vld [vmem:[%s7973_s14 + $0x4f0] sm:$0xff]  }
  0xe7   : > { %6870 = vmatprep.mubr.bf16.mxu0 %v7618_v21  ;;  %6906 = vmatprep.mubr.bf16.mxu1 %v7619_v22  ;;  %v7682_v21 = vld [vmem:[%s7973_s14 + $0x288] sm:$0xff]   ;;  %v7683_v22 = vld [vmem:[%s7973_s14 + $0x4f8] sm:$0xff]  }
  0xee   : > { %6871 = vmatmul.mubr.bf16.vlgmr.msra.gmra.mrb[0].mxu0 %v7620_v23  ;;  %6907 = vmatmul.mubr.bf16.vlgmr.msra.gmra.mrb[0].mxu1 %v7621_v24  ;;  %v7685_v23 = vld [vmem:[%s7973_s14 + $0x290] sm:$0xff]   ;;  %v7686_v24 = vld [vmem:[%s7973_s14 + $0x500] sm:$0xff]  }
  0xef   : > { %6927 = vmatpush3.bf16.msra.mxu0 %v7622_v20  ;;  %6963 = vmatpush3.bf16.msra.mxu1 %v7622_v20  ;;  %v7684_v20 = vld [vmem:[%s8216_s1 + $0x210] sm:$0xff]  }
  0xf0   : > { %6928 = vmatprep.subr.bf16.mxu0 %v7623_v25  ;;  %6964 = vmatprep.subr.bf16.mxu1 %v7623_v25 }
  0xf1   : > { %6874 = vmatprep.mubr.bf16.mxu0 %v7624_v26  ;;  %6910 = vmatprep.mubr.bf16.mxu1 %v7625_v27  ;;  %v7690_v26 = vld [vmem:[%s8216_s1 + $0x220] sm:$0xff]   ;;  %v7688_v27 = vld [vmem:[%s7973_s14 + $0x298] sm:$0xff]  }
  0xf3   : > { %6929 = vmatpush3.bf16.msra.mxu0 %v7623_v25  ;;  %6965 = vmatpush3.bf16.msra.mxu1 %v7623_v25  ;;  %v7687_v25 = vld [vmem:[%s8216_s1 + $0x218] sm:$0xff]  }
  0xf4   : > { %6930 = vmatprep.subr.bf16.mxu0 %v7628_v28  ;;  %6966 = vmatprep.subr.bf16.mxu1 %v7628_v28 }
  0xf6   : > { %6875 = vmatmul.mubr.bf16.gmra.mrb[4].mxu0 %v7626_v29  ;;  %6911 = vmatmul.mubr.bf16.gmra.mrb[4].mxu1 %v7627_v30  ;;  %v7691_v29 = vld [vmem:[%s7973_s14 + $0x2a0] sm:$0xff]   ;;  %v7692_v30 = vld [vmem:[%s7973_s14 + $0x510] sm:$0xff]  }
  0xf7   : > { %6931 = vmatpush3.bf16.msra.mxu0 %v7628_v28  ;;  %6967 = vmatpush3.bf16.msra.mxu1 %v7628_v28  ;;  %v7689_v28 = vld [vmem:[%s7973_s14 + $0x508] sm:$0xff]  }
  0xf8   : > { %6878 = vmatprep.mubr.bf16.mxu0 %v7629_v31  ;;  %6914 = vmatprep.mubr.bf16.mxu1 %v7630_v32  ;;  %v7695_v31 = vld [vmem:[%s8216_s1 + $0x228] sm:$0xff]   ;;  %v7696_v32 = vld [vmem:[%s8216_s1 + $0x230] sm:$0xff]  }
  0xf9   : > { %6932 = vmatprep.subr.bf16.mxu0 %v7631_v33  ;;  %6968 = vmatprep.subr.bf16.mxu1 %v7631_v33 }
  0xfb   : > { %6933 = vmatpush3.bf16.msra.mxu0 %v7631_v33  ;;  %6969 = vmatpush3.bf16.msra.mxu1 %v7631_v33  ;;  %v7693_v33 = vld [vmem:[%s7973_s14 + $0x2a8] sm:$0xff]  }
  0xfc   : > { %6934 = vmatprep.subr.bf16.mxu0 %v7634_v35  ;;  %6970 = vmatprep.subr.bf16.mxu1 %v7634_v35 }
  0xfe   : > { %6879 = vmatmul.mubr.bf16.gmra.mrb[8].mxu0 %v7632_v34  ;;  %6915 = vmatmul.mubr.bf16.gmra.mrb[8].mxu1 %v7633_v36  ;;  %v7694_v34 = vld [vmem:[%s7973_s14 + $0x518] sm:$0xff]   ;;  %v7698_v36 = vld [vmem:[%s7973_s14 + $0x520] sm:$0xff]  }
  0xff   : > { %6935 = vmatpush3.bf16.msra.mxu0 %v7634_v35  ;;  %6971 = vmatpush3.bf16.msra.mxu1 %v7634_v35  ;;  %v7697_v35 = vld [vmem:[%s7973_s14 + $0x2b0] sm:$0xff]  }
 0x100   : > { %6882 = vmatprep.mubr.bf16.mxu0 %v7635_v37  ;;  %6918 = vmatprep.mubr.bf16.mxu1 %v7636_v38  ;;  %v7701_v37 = vld [vmem:[%s8216_s1 + $0x238] sm:$0xff]  }
 0x101   : > { %6936 = vmatprep.subr.bf16.mxu0 %v7639_v39  ;;  %6972 = vmatprep.subr.bf16.mxu1 %v7639_v39  ;;  %v7699_v38 = vld [vmem:[%s7973_s14 + $0x2b8] sm:$0xff]  }
 0x103   : > { %6937 = vmatpush3.bf16.msra.mxu0 %v7639_v39  ;;  %6973 = vmatpush3.bf16.msra.mxu1 %v7639_v39  ;;  %v7700_v39 = vld [vmem:[%s7973_s14 + $0x528] sm:$0xff]  }
 0x104   : > { %6938 = vmatprep.subr.bf16.mxu0 %v7640_v40  ;;  %6974 = vmatprep.subr.bf16.mxu1 %v7640_v40 }
 0x106   : > { %6883 = vmatmul.mubr.bf16.gmra.mrb[12].mxu0 %v7637_v41  ;;  %6919 = vmatmul.mubr.bf16.gmra.mrb[12].mxu1 %v7638_v42  ;;  %v7703_v41 = vld [vmem:[%s7973_s14 + $0x750] sm:$0xff]   ;;  %v7704_v42 = vld [vmem:[%s7973_s14 + $0x4e8] sm:$0xff]  }
 0x107   : > { %6886 = vmatprep.mubr.bf16.mxu0 %v7641_v43  ;;  %6922 = vmatprep.mubr.bf16.mxu1 %v7642_v44  ;;  %v7705_v43 = vld [vmem:[%s7973_s14 + $0x758] sm:$0xff]   ;;  %v7706_v44 = vld [vmem:[%s7973_s14 + $0x4f0] sm:$0xff]  }
 0x108   : > { %6939 = vmatpush3.bf16.msra.mxu0 %v7640_v40  ;;  %6975 = vmatpush3.bf16.msra.mxu1 %v7640_v40  ;;  %v7702_v40 = vld [vmem:[%s7973_s14 + $0x4e0] sm:$0xff]  }
 0x109   : > { %6940 = vmatprep.subr.bf16.mxu0 %v7645_v45  ;;  %6976 = vmatprep.subr.bf16.mxu1 %v7645_v45 }
 0x10c   : > { %6941 = vmatpush3.bf16.msra.mxu0 %v7645_v45  ;;  %6977 = vmatpush3.bf16.msra.mxu1 %v7645_v45  ;;  %v7707_v45 = vld [vmem:[%s7973_s14 + $0x760] sm:$0xff]  }
 0x10d   : > { %6998 = vmatprep.subr.bf16.mxu0 %v7650_v46  ;;  %7034 = vmatprep.subr.bf16.mxu1 %v7650_v46 }
 0x10e   : > { %6887 = vmatmul.mubr.bf16.gmra.mrb[16].mxu0 %v7643_v47  ;;  %6923 = vmatmul.mubr.bf16.gmra.mrb[16].mxu1 %v7644_v48  ;;  %v7709_v47 = vld [vmem:[%s7973_s14 + $0x768] sm:$0xff]   ;;  %v7710_v48 = vld [vmem:[%s7973_s14 + $0x500] sm:$0xff]  }
 0x10f   : > { %6942 = vmatprep.mubr.bf16.mxu0 %v7646_v49  ;;  %6978 = vmatprep.mubr.bf16.mxu1 %v7647_v50  ;;  %v7711_v49 = vld [vmem:[%s7973_s14 + $0x770] sm:$0xff]   ;;  %v7712_v50 = vld [vmem:[%s7973_s14 + $0x508] sm:$0xff]  }
 0x116   : > { %6943 = vmatmul.mubr.bf16.vlgmr.msra.gmra.mrb[0].mxu0 %v7648_v51  ;;  %6979 = vmatmul.mubr.bf16.vlgmr.msra.gmra.mrb[0].mxu1 %v7649_v52  ;;  %v7713_v51 = vld [vmem:[%s7973_s14 + $0x778] sm:$0xff]   ;;  %v7714_v52 = vld [vmem:[%s7973_s14 + $0x510] sm:$0xff]  }
 0x117   : > { %6999 = vmatpush3.bf16.msra.mxu0 %v7650_v46  ;;  %7035 = vmatpush3.bf16.msra.mxu1 %v7650_v46  ;;  %v7708_v46 = vld [vmem:[%s7973_s14 + $0x4f8] sm:$0xff]  }
 0x118   : > { %7000 = vmatprep.subr.bf16.mxu0 %v7651_v53  ;;  %7036 = vmatprep.subr.bf16.mxu1 %v7651_v53 }
 0x119   : > { %6946 = vmatprep.mubr.bf16.mxu0 %v7652_v54  ;;  %6982 = vmatprep.mubr.bf16.mxu1 %v7653_v55  ;;  %v7716_v54 = vld [vmem:[%s7973_s14 + $0x518] sm:$0xff]   ;;  %v7717_v55 = vld [vmem:[%s7973_s14 + $0x788] sm:$0xff]  }
 0x11b   : > { %7001 = vmatpush3.bf16.msra.mxu0 %v7651_v53  ;;  %7037 = vmatpush3.bf16.msra.mxu1 %v7651_v53  ;;  %v7715_v53 = vld [vmem:[%s7973_s14 + $0x780] sm:$0xff]  }
 0x11c   : > { %7002 = vmatprep.subr.bf16.mxu0 %v7656_v56  ;;  %7038 = vmatprep.subr.bf16.mxu1 %v7656_v56 }
 0x11e   : > { %6947 = vmatmul.mubr.bf16.gmra.mrb[4].mxu0 %v7654_v57  ;;  %6983 = vmatmul.mubr.bf16.gmra.mrb[4].mxu1 %v7655_v58  ;;  %v7719_v57 = vld [vmem:[%s7973_s14 + $0x790] sm:$0xff]   ;;  %v7720_v58 = vld [vmem:[%s7973_s14 + $0x528] sm:$0xff]  }
 0x11f   : > { %7003 = vmatpush3.bf16.msra.mxu0 %v7656_v56  ;;  %7039 = vmatpush3.bf16.msra.mxu1 %v7656_v56  ;;  %v7718_v56 = vld [vmem:[%s7973_s14 + $0x520] sm:$0xff]  }
 0x120   : > { %6950 = vmatprep.mubr.bf16.mxu0 %v7657_v59  ;;  %6986 = vmatprep.mubr.bf16.mxu1 %v7658_v60  ;;  %v7721_v59 = vld [vmem:[%s7973_s14 + $0x798] sm:$0xff]  }
 0x121   : > { %7004 = vmatprep.subr.bf16.mxu0 %v7659_v61  ;;  %7040 = vmatprep.subr.bf16.mxu1 %v7659_v61 }
 0x123   : > { %7005 = vmatpush3.bf16.msra.mxu0 %v7659_v61  ;;  %7041 = vmatpush3.bf16.msra.mxu1 %v7659_v61 }
 0x124   : > { %7006 = vmatprep.subr.bf16.mxu0 %v7662_v62  ;;  %7042 = vmatprep.subr.bf16.mxu1 %v7662_v62 }
 0x126   : > { %6951 = vmatmul.mubr.bf16.gmra.mrb[8].mxu0 %v7660_v63  ;;  %6987 = vmatmul.mubr.bf16.gmra.mrb[8].mxu1 %v7661_v0 }
 0x127   : > { %7007 = vmatpush3.bf16.msra.mxu0 %v7662_v62  ;;  %7043 = vmatpush3.bf16.msra.mxu1 %v7662_v62 }
 0x128   : > { %6954 = vmatprep.mubr.bf16.mxu0 %v7663_v1  ;;  %6990 = vmatprep.mubr.bf16.mxu1 %v7664_v2 }
 0x129   : > { %7008 = vmatprep.subr.bf16.mxu0 %v7667_v3  ;;  %7044 = vmatprep.subr.bf16.mxu1 %v7667_v3 }
 0x12b   : > { %7009 = vmatpush3.bf16.msra.mxu0 %v7667_v3  ;;  %7045 = vmatpush3.bf16.msra.mxu1 %v7667_v3 }
 0x12c   : > { %7010 = vmatprep.subr.bf16.mxu0 %v7668_v4  ;;  %7046 = vmatprep.subr.bf16.mxu1 %v7668_v4 }
 0x12e   : > { %6955 = vmatmul.mubr.bf16.gmra.mrb[12].mxu0 %v7665_v5  ;;  %6991 = vmatmul.mubr.bf16.gmra.mrb[12].mxu1 %v7666_v6 }
 0x12f   : > { %6958 = vmatprep.mubr.bf16.mxu0 %v7669_v7  ;;  %6994 = vmatprep.mubr.bf16.mxu1 %v7670_v8 }
 0x130   : > { %7011 = vmatpush3.bf16.msra.mxu0 %v7668_v4  ;;  %7047 = vmatpush3.bf16.msra.mxu1 %v7668_v4 }
 0x131   : > { %7012 = vmatprep.subr.bf16.mxu0 %v7673_v9  ;;  %7048 = vmatprep.subr.bf16.mxu1 %v7673_v9 }
 0x134   : > { %7013 = vmatpush3.bf16.msra.mxu0 %v7673_v9  ;;  %7049 = vmatpush3.bf16.msra.mxu1 %v7673_v9 }
 0x135   : > { %7070 = vmatprep.subr.bf16.mxu0 %v7678_v10  ;;  %7106 = vmatprep.subr.bf16.mxu1 %v7678_v10 }
 0x136   : > { %6959 = vmatmul.mubr.bf16.gmra.mrb[16].mxu0 %v7671_v11  ;;  %6995 = vmatmul.mubr.bf16.gmra.mrb[16].mxu1 %v7672_v12 }
 0x137   : > { %7014 = vmatprep.mubr.bf16.mxu0 %v7674_v13  ;;  %7050 = vmatprep.mubr.bf16.mxu1 %v7675_v14  ;;  %v8181_v13 = vld [vmem:[%s8217_s2] ss:$0 sm:$0xff] }
 0x13e   : > { %7015 = vmatmul.mubr.bf16.vlgmr.msra.gmra.mrb[0].mxu0 %v7676_v15  ;;  %7051 = vmatmul.mubr.bf16.vlgmr.msra.gmra.mrb[0].mxu1 %v7677_v16 }
 0x13f   : > { %7071 = vmatpush3.bf16.msra.mxu0 %v7678_v10  ;;  %7107 = vmatpush3.bf16.msra.mxu1 %v7678_v10 }
 0x140   : > { %7072 = vmatprep.subr.bf16.mxu0 %v7679_v17  ;;  %7108 = vmatprep.subr.bf16.mxu1 %v7679_v17 }
 0x141   : > { %7018 = vmatprep.mubr.bf16.mxu0 %v7680_v18  ;;  %7054 = vmatprep.mubr.bf16.mxu1 %v7681_v19 }
 0x143   : > { %7073 = vmatpush3.bf16.msra.mxu0 %v7679_v17  ;;  %7109 = vmatpush3.bf16.msra.mxu1 %v7679_v17 }
 0x144   : > { %7074 = vmatprep.subr.bf16.mxu0 %v7684_v20  ;;  %7110 = vmatprep.subr.bf16.mxu1 %v7684_v20 }
 0x146   : > { %7019 = vmatmul.mubr.bf16.gmra.mrb[4].mxu0 %v7682_v21  ;;  %7055 = vmatmul.mubr.bf16.gmra.mrb[4].mxu1 %v7683_v22 }
 0x147   : > { %7075 = vmatpush3.bf16.msra.mxu0 %v7684_v20  ;;  %7111 = vmatpush3.bf16.msra.mxu1 %v7684_v20 }
 0x148   : > { %7022 = vmatprep.mubr.bf16.mxu0 %v7685_v23  ;;  %7058 = vmatprep.mubr.bf16.mxu1 %v7686_v24 }
 0x149   : > { %7076 = vmatprep.subr.bf16.mxu0 %v7687_v25  ;;  %7112 = vmatprep.subr.bf16.mxu1 %v7687_v25 }
 0x14b   : > { %7077 = vmatpush3.bf16.msra.mxu0 %v7687_v25  ;;  %7113 = vmatpush3.bf16.msra.mxu1 %v7687_v25 }
 0x14c   : > { %7078 = vmatprep.subr.bf16.mxu0 %v7690_v26  ;;  %7114 = vmatprep.subr.bf16.mxu1 %v7690_v26 }
 0x14e   : > { %7023 = vmatmul.mubr.bf16.gmra.mrb[8].mxu0 %v7688_v27  ;;  %7059 = vmatmul.mubr.bf16.gmra.mrb[8].mxu1 %v7689_v28 }
 0x14f   : > { %7079 = vmatpush3.bf16.msra.mxu0 %v7690_v26  ;;  %7115 = vmatpush3.bf16.msra.mxu1 %v7690_v26 }
 0x150   : > { %7026 = vmatprep.mubr.bf16.mxu0 %v7691_v29  ;;  %7062 = vmatprep.mubr.bf16.mxu1 %v7692_v30 }
 0x151   : > { %7080 = vmatprep.subr.bf16.mxu0 %v7695_v31  ;;  %7116 = vmatprep.subr.bf16.mxu1 %v7695_v31 }
 0x153   : > { %7081 = vmatpush3.bf16.msra.mxu0 %v7695_v31  ;;  %7117 = vmatpush3.bf16.msra.mxu1 %v7695_v31 }
 0x154   : > { %7082 = vmatprep.subr.bf16.mxu0 %v7696_v32  ;;  %7118 = vmatprep.subr.bf16.mxu1 %v7696_v32 }
 0x156   : > { %7027 = vmatmul.mubr.bf16.gmra.mrb[12].mxu0 %v7693_v33  ;;  %7063 = vmatmul.mubr.bf16.gmra.mrb[12].mxu1 %v7694_v34 }
 0x157   : > { %7030 = vmatprep.mubr.bf16.mxu0 %v7697_v35  ;;  %7066 = vmatprep.mubr.bf16.mxu1 %v7698_v36 }
 0x158   : > { %7083 = vmatpush3.bf16.msra.mxu0 %v7696_v32  ;;  %7119 = vmatpush3.bf16.msra.mxu1 %v7696_v32 }
 0x159   : > { %7084 = vmatprep.subr.bf16.mxu0 %v7701_v37  ;;  %7120 = vmatprep.subr.bf16.mxu1 %v7701_v37 }
 0x15c   : > { %7085 = vmatpush3.bf16.msra.mxu0 %v7701_v37  ;;  %7121 = vmatpush3.bf16.msra.mxu1 %v7701_v37 }
 0x15e   : > { %7031 = vmatmul.mubr.bf16.gmra.mrb[16].mxu0 %v7699_v38  ;;  %7067 = vmatmul.mubr.bf16.gmra.mrb[16].mxu1 %v7700_v39 }
 0x15f   : > { %7086 = vmatprep.mubr.bf16.mxu0 %v7702_v40  ;;  %7122 = vmatprep.mubr.bf16.mxu1 %v7703_v41 }
 0x166   : > { %7087 = vmatmul.mubr.bf16.vlgmr.msra.gmra.mrb[0].mxu0 %v7704_v42  ;;  %7123 = vmatmul.mubr.bf16.vlgmr.msra.gmra.mrb[0].mxu1 %v7705_v43 }
 0x167   : > { %7090 = vmatprep.mubr.bf16.mxu0 %v7706_v44  ;;  %7126 = vmatprep.mubr.bf16.mxu1 %v7707_v45 }
 0x16e   : > { %7091 = vmatmul.mubr.bf16.gmra.mrb[4].mxu0 %v7708_v46  ;;  %7127 = vmatmul.mubr.bf16.gmra.mrb[4].mxu1 %v7709_v47 }
 0x16f   : > { %7094 = vmatprep.mubr.bf16.mxu0 %v7710_v48  ;;  %7130 = vmatprep.mubr.bf16.mxu1 %v7711_v49 }
 0x176   : > { %7095 = vmatmul.mubr.bf16.gmra.mrb[8].mxu0 %v7712_v50  ;;  %7131 = vmatmul.mubr.bf16.gmra.mrb[8].mxu1 %v7713_v51 }
 0x177   : > { %7098 = vmatprep.mubr.bf16.mxu0 %v7714_v52  ;;  %7134 = vmatprep.mubr.bf16.mxu1 %v7715_v53 }
 0x17e   : > { %7099 = vmatmul.mubr.bf16.gmra.mrb[12].mxu0 %v7716_v54  ;;  %7135 = vmatmul.mubr.bf16.gmra.mrb[12].mxu1 %v7717_v55 }
 0x17f   : > { %7102 = vmatprep.mubr.bf16.mxu0 %v7718_v56  ;;  %7138 = vmatprep.mubr.bf16.mxu1 %v7719_v57 }
 0x186   : > { %7103 = vmatmul.mubr.bf16.gmra.mrb[16].mxu0 %v7720_v58  ;;  %7139 = vmatmul.mubr.bf16.gmra.mrb[16].mxu1 %v7721_v59 }
 0x239   : > { %v7088_v60 = vpop.f32.mrb[0].mxu0  ;;  %v7124_v61 = vpop.f32.mrb[0].mxu1 }
 0x23a   : > { %v5287_v62 = vmax.f32 %v7088_v60, %v7124_v61  ;;  %v4873_v63 = vpop.f32.mrb[1].mxu0  ;;  %v5046_v0 = vpop.f32.mrb[1].mxu1 }
 0x23b   : > { %v5285_v1 = vmax.f32 %v4873_v63, %v5046_v0  ;;  %v7089_v2 = vpop.f32.mrb[2].mxu0  ;;  %v7125_v3 = vpop.f32.mrb[2].mxu1 }
 0x23c   : > { %v5288_v4 = vmax.f32 %v7089_v2, %v7125_v3  ;;  %v4876_v5 = vpop.f32.mrb[3].mxu0  ;;  %v5049_v6 = vpop.f32.mrb[3].mxu1 }
 0x23d   : > { %v5286_v7 = vmax.f32 %v4876_v5, %v5049_v6 }
 0x241   : > { %v7092_v8 = vpop.f32.mrb[4].mxu0  ;;  %v7128_v9 = vpop.f32.mrb[4].mxu1 }
 0x242   : > { %v5291_v10 = vmax.f32 %v7092_v8, %v7128_v9  ;;  %v4889_v11 = vpop.f32.mrb[5].mxu0  ;;  %v5062_v12 = vpop.f32.mrb[5].mxu1 }
 0x243   : > { %v5289_v14 = vmax.f32 %v4889_v11, %v5062_v12  ;;  %v7093_v15 = vpop.f32.mrb[6].mxu0  ;;  %v7129_v16 = vpop.f32.mrb[6].mxu1 }
 0x244   : > { %v5307_v17 = vmax.f32 %v5287_v62, %v5291_v10  ;;  %v5292_v18 = vmax.f32 %v7093_v15, %v7129_v16  ;;  %v4892_v19 = vpop.f32.mrb[7].mxu0  ;;  %v5065_v20 = vpop.f32.mrb[7].mxu1 }
 0x245   : > { %v5305_v21 = vmax.f32 %v5285_v1, %v5289_v14  ;;  %v5290_v22 = vmax.f32 %v4892_v19, %v5065_v20 }
 0x246   : > { %v5330_v23 = vadd.f32 %v8181_v13, %v5307_v17  ;;  %v5308_v24 = vmax.f32 %v5288_v4, %v5292_v18 }
 0x247   : > { %v5328_v25 = vadd.f32 %v8181_v13, %v5305_v21  ;;  %v5306_v26 = vmax.f32 %v5286_v7, %v5290_v22 }
 0x248   : > { %v5331_v27 = vadd.f32 %v8181_v13, %v5308_v24  ;;  %v5346_v31 = vmax.f32 %v5330_v23, 0.0 }
 0x249   : > { %v5329_v28 = vadd.f32 %v8181_v13, %v5306_v26  ;;  %v7096_v29 = vpop.f32.mrb[8].mxu0  ;;  %v7132_v30 = vpop.f32.mrb[8].mxu1  ;;  %v5344_v36 = vmax.f32 %v5328_v25, 0.0 }
 0x24a   : > { %v5347_v32 = vmax.f32 %v5331_v27, 0.0  ;;  %v5295_v33 = vmax.f32 %v7096_v29, %v7132_v30  ;;  %v4905_v34 = vpop.f32.mrb[9].mxu0  ;;  %v5078_v35 = vpop.f32.mrb[9].mxu1 }
 0x24b   : > { %v5345_v37 = vmax.f32 %v5329_v28, 0.0  ;;  %v5293_v38 = vmax.f32 %v4905_v34, %v5078_v35  ;;  %v7097_v39 = vpop.f32.mrb[10].mxu0  ;;  %v7133_v40 = vpop.f32.mrb[10].mxu1 }
 0x24c   : > { %v6131_v41 = vpack.c.bf16 %v5347_v32, %v5346_v31  ;;  %v5311_v42 = vmax.f32 %v5291_v10, %v5295_v33  ;;  %v5296_v43 = vmax.f32 %v7097_v39, %v7133_v40  ;;  %v4908_v44 = vpop.f32.mrb[11].mxu0  ;;  %v5081_v45 = vpop.f32.mrb[11].mxu1 }
 0x24d   : > { %v6126_v46 = vpack.c.bf16 %v5345_v37, %v5344_v36  ;;  %v5309_v47 = vmax.f32 %v5289_v14, %v5293_v38  ;;  %v5294_v48 = vmax.f32 %v4908_v44, %v5081_v45 }
 0x24e   : > { %6163 = vst [vmem:[%s8190_s11 + $0x8] sm:$0xff] %v6131_v41   ;;  %v5334_v49 = vadd.f32 %v8181_v13, %v5311_v42  ;;  %v5312_v50 = vmax.f32 %v5292_v18, %v5296_v43 }
 0x24f   : > { %6127 = vst [vmem:[%s8190_s11] sm:$0xff] %v6126_v46   ;;  %v5332_v51 = vadd.f32 %v8181_v13, %v5309_v47  ;;  %v5310_v52 = vmax.f32 %v5290_v22, %v5294_v48 }
 0x250   : > { %v5335_v53 = vadd.f32 %v8181_v13, %v5312_v50  ;;  %v5350_v57 = vmax.f32 %v5334_v49, 0.0 }
 0x251   : > { %v5333_v54 = vadd.f32 %v8181_v13, %v5310_v52  ;;  %v7100_v55 = vpop.f32.mrb[12].mxu0  ;;  %v7136_v56 = vpop.f32.mrb[12].mxu1  ;;  %v5348_v62 = vmax.f32 %v5332_v51, 0.0 }
 0x252   : > { %v5351_v58 = vmax.f32 %v5335_v53, 0.0  ;;  %v5299_v59 = vmax.f32 %v7100_v55, %v7136_v56  ;;  %v4921_v60 = vpop.f32.mrb[13].mxu0  ;;  %v5094_v61 = vpop.f32.mrb[13].mxu1 }
 0x253   : > { %v5349_v63 = vmax.f32 %v5333_v54, 0.0  ;;  %v5297_v0 = vmax.f32 %v4921_v60, %v5094_v61  ;;  %v7101_v1 = vpop.f32.mrb[14].mxu0  ;;  %v7137_v2 = vpop.f32.mrb[14].mxu1 }
 0x254   : > { %v6141_v3 = vpack.c.bf16 %v5351_v58, %v5350_v57  ;;  %v5315_v4 = vmax.f32 %v5295_v33, %v5299_v59  ;;  %v5300_v5 = vmax.f32 %v7101_v1, %v7137_v2  ;;  %v4924_v6 = vpop.f32.mrb[15].mxu0  ;;  %v5097_v7 = vpop.f32.mrb[15].mxu1 }
 0x255   : > { %v6136_v8 = vpack.c.bf16 %v5349_v63, %v5348_v62  ;;  %v5313_v9 = vmax.f32 %v5293_v38, %v5297_v0  ;;  %v5298_v10 = vmax.f32 %v4924_v6, %v5097_v7 }
 0x256   : > { %6165 = vst [vmem:[%s8190_s11 + $0x18] sm:$0xff] %v6141_v3   ;;  %v5338_v11 = vadd.f32 %v8181_v13, %v5315_v4  ;;  %v5316_v12 = vmax.f32 %v5296_v43, %v5300_v5 }
 0x257   : > { %6164 = vst [vmem:[%s8190_s11 + $0x10] sm:$0xff] %v6136_v8   ;;  %v5336_v14 = vadd.f32 %v8181_v13, %v5313_v9  ;;  %v5314_v15 = vmax.f32 %v5294_v48, %v5298_v10 }
 0x258   : > { %v5339_v16 = vadd.f32 %v8181_v13, %v5316_v12  ;;  %v5354_v20 = vmax.f32 %v5338_v11, 0.0 }
 0x259   : > { %v5337_v17 = vadd.f32 %v8181_v13, %v5314_v15  ;;  %v7104_v18 = vpop.f32.mrb[16].mxu0  ;;  %v7140_v19 = vpop.f32.mrb[16].mxu1  ;;  %v5352_v25 = vmax.f32 %v5336_v14, 0.0 }
 0x25a   : > { %v5355_v21 = vmax.f32 %v5339_v16, 0.0  ;;  %v5303_v22 = vmax.f32 %v7104_v18, %v7140_v19  ;;  %v4937_v23 = vpop.f32.mrb[17].mxu0  ;;  %v5110_v24 = vpop.f32.mrb[17].mxu1 }
 0x25b   : > { %v5353_v26 = vmax.f32 %v5337_v17, 0.0  ;;  %v5301_v27 = vmax.f32 %v4937_v23, %v5110_v24  ;;  %v7105_v28 = vpop.f32.mrb[18].mxu0  ;;  %v7141_v29 = vpop.f32.mrb[18].mxu1 }
 0x25c   : > { %v6151_v30 = vpack.c.bf16 %v5355_v21, %v5354_v20  ;;  %v5319_v31 = vmax.f32 %v5299_v59, %v5303_v22  ;;  %v5304_v32 = vmax.f32 %v7105_v28, %v7141_v29  ;;  %v4940_v33 = vpop.f32.mrb[19].mxu0  ;;  %v5113_v34 = vpop.f32.mrb[19].mxu1 }
 0x25d   : > { %v6146_v35 = vpack.c.bf16 %v5353_v26, %v5352_v25  ;;  %v5317_v36 = vmax.f32 %v5297_v0, %v5301_v27  ;;  %v5302_v37 = vmax.f32 %v4940_v33, %v5113_v34 }
 0x25e   : > { %6167 = vst [vmem:[%s8190_s11 + $0x28] sm:$0xff] %v6151_v30   ;;  %v5342_v38 = vadd.f32 %v8181_v13, %v5319_v31  ;;  %v5320_v39 = vmax.f32 %v5300_v5, %v5304_v32 }
 0x25f   : > { %6166 = vst [vmem:[%s8190_s11 + $0x20] sm:$0xff] %v6146_v35   ;;  %v5340_v40 = vadd.f32 %v8181_v13, %v5317_v36  ;;  %v5318_v41 = vmax.f32 %v5298_v10, %v5302_v37 }
 0x260   : > { %v5343_v42 = vadd.f32 %v8181_v13, %v5320_v39  ;;  %v5358_v44 = vmax.f32 %v5342_v38, 0.0 }
 0x261   : > { %v5341_v43 = vadd.f32 %v8181_v13, %v5318_v41  ;;  %v5356_v46 = vmax.f32 %v5340_v40, 0.0 }
 0x262   : > { %v5359_v45 = vmax.f32 %v5343_v42, 0.0 }
 0x263   : > { %v5357_v47 = vmax.f32 %v5341_v43, 0.0 }
 0x264   : > { %v6161_v48 = vpack.c.bf16 %v5359_v45, %v5358_v44 }
 0x265   : > { %v6156_v49 = vpack.c.bf16 %v5357_v47, %v5356_v46 }
 0x266   : > { %6169 = vst [vmem:[%s8190_s11 + $0x38] sm:$0xff] %v6161_v48  }
 0x267   : > { %6168 = vst [vmem:[%s8190_s11 + $0x30] sm:$0xff] %v6156_v49  }
 0x268 PF: > { %s13_s12 = sadd.s32 1, %s7728_s12  }
 0x269   : > { %p10_p4 = scmp.ge.s32.totalorder %s13_s12, 11  }
 0x26b   :  { %12 = sbr.rel (!%p10_p4) target bundleno = 1 (0x1), region = 71 }

// kernel: dcnn_simple_forward.5
= control target key start
LH: loop header
LB: loop body
LE: loop exit
PB: predicated region body
PF: predicated region fallthrough
CT: control target
= control target key end

     0   :  { %vm5803_vm0 = vmmov 0   ;;  %s7093_s1 = inlined_call_operand.vmem [shape: bf16[6272,128], index: 1, kind: input, shape index: {}]   ;;  %s7094_s0 = inlined_call_operand.vmem [shape: bf16[8,6272], index: 0, kind: input, shape index: {}]   ;;  %s7095_s2 = inlined_call_operand.vmem [shape: f32[1,128], index: 2, kind: input, shape index: {}]   ;;  %s7096_s3 = inlined_call_operand.vmem [shape: f32[8,128], index: 3, kind: output, shape index: {}]  }
   0x1   :  { %v5361_v0 = vld [vmem:[%s7093_s1 + $0x40] sm:$0xff]   ;;  %v5365_v4 = vld [vmem:[%s7093_s1 + $0x48] sm:$0xff]   ;;  %v5369_v8 = vld [vmem:[%s7093_s1 + $0x50] sm:$0xff]  }
   0x2   :  { %v5362_v1 = vld [vmem:[%s7093_s1] sm:$0xff]   ;;  %4802 = vmatprep.subr.bf16.mxu0 %v5361_v0  ;;  %v5366_v5 = vld [vmem:[%s7093_s1 + $0x8] sm:$0xff]   ;;  %v5370_v9 = vld [vmem:[%s7093_s1 + $0x10] sm:$0xff]  }
   0x3   :  { %v5363_v2 = vld [vmem:[%s7093_s1 + $0xc0] sm:$0xff]   ;;  %4803 = vmatpush3.bf16.msra.mxu0 %v5362_v1  ;;  %v5367_v6 = vld [vmem:[%s7093_s1 + $0xc8] sm:$0xff]   ;;  %v5371_v10 = vld [vmem:[%s7093_s1 + $0xd0] sm:$0xff]  }
   0x4   :  { %v5364_v3 = vld [vmem:[%s7093_s1 + $0x80] sm:$0xff]   ;;  %4824 = vmatprep.subr.bf16.mxu1 %v5363_v2  ;;  %4804 = vmatprep.subr.bf16.mxu0 %v5365_v4  ;;  %v5368_v7 = vld [vmem:[%s7093_s1 + $0x88] sm:$0xff]   ;;  %v5372_v11 = vld [vmem:[%s7093_s1 + $0x90] sm:$0xff]  }
   0x5   :  { %4825 = vmatpush3.bf16.msra.mxu1 %v5364_v3  ;;  %v5373_v12 = vld [vmem:[%s7093_s1 + $0x58] sm:$0xff]   ;;  %v5377_v16 = vld [vmem:[%s7093_s1 + $0x60] sm:$0xff]   ;;  %v5381_v20 = vld [vmem:[%s7093_s1 + $0x68] sm:$0xff]  }
   0x6   :  { %4826 = vmatprep.subr.bf16.mxu1 %v5367_v6  ;;  %v5374_v13 = vld [vmem:[%s7093_s1 + $0x18] sm:$0xff]   ;;  %v5378_v17 = vld [vmem:[%s7093_s1 + $0x20] sm:$0xff]   ;;  %v5382_v21 = vld [vmem:[%s7093_s1 + $0x28] sm:$0xff]  }
   0x7   :  { %4805 = vmatpush3.bf16.msra.mxu0 %v5366_v5  ;;  %v5375_v14 = vld [vmem:[%s7093_s1 + $0xd8] sm:$0xff]   ;;  %v5379_v18 = vld [vmem:[%s7093_s1 + $0xe0] sm:$0xff]   ;;  %v5383_v22 = vld [vmem:[%s7093_s1 + $0xe8] sm:$0xff]  }
   0x8   :  { %4806 = vmatprep.subr.bf16.mxu0 %v5369_v8  ;;  %v5376_v15 = vld [vmem:[%s7093_s1 + $0x98] sm:$0xff]   ;;  %v5380_v19 = vld [vmem:[%s7093_s1 + $0xa0] sm:$0xff]   ;;  %v5384_v23 = vld [vmem:[%s7093_s1 + $0xa8] sm:$0xff]  }
   0x9   :  { %4827 = vmatpush3.bf16.msra.mxu1 %v5368_v7  ;;  %v5385_v24 = vld [vmem:[%s7093_s1 + $0x70] sm:$0xff]   ;;  %v5389_v28 = vld [vmem:[%s7093_s1 + $0x78] sm:$0xff]   ;;  %v15_v31 = vld [vmem:[%s7094_s0] sm:$0xff] }
   0xa   :  { %4828 = vmatprep.subr.bf16.mxu1 %v5371_v10  ;;  %v5386_v25 = vld [vmem:[%s7093_s1 + $0x30] sm:$0xff]   ;;  %v5390_v29 = vld [vmem:[%s7093_s1 + $0x38] sm:$0xff]   ;;  %v4361_v32 = vcombine.low %v15_v31, %v15_v31  ;;  %v4362_v33 = vcombine.high %v15_v31, %v15_v31  ;;  %v5395_v35 = vld [vmem:[%s7093_s1 + $0x140] sm:$0xff]  }
   0xb   :  { %4807 = vmatpush3.bf16.msra.mxu0 %v5370_v9  ;;  %v5387_v26 = vld [vmem:[%s7093_s1 + $0xf0] sm:$0xff]   ;;  %v5391_v30 = vld [vmem:[%s7093_s1 + $0xf8] sm:$0xff]   ;;  %v16_v36 = vld [vmem:[%s7094_s0 + $0x8] sm:$0xff] }
   0xc   :  { %4808 = vmatprep.subr.bf16.mxu0 %v5373_v12  ;;  %v5388_v27 = vld [vmem:[%s7093_s1 + $0xb0] sm:$0xff]   ;;  %v5394_v34 = vld [vmem:[%s7093_s1 + $0xb8] sm:$0xff]   ;;  %3387 = vmatprep.mubr.bf16.mxu0 %v4362_v33  ;;  %v4363_v37 = vcombine.low %v16_v36, %v16_v36  ;;  %v4364_v38 = vcombine.high %v16_v36, %v16_v36  ;;  %v5398_v39 = vld [vmem:[%s7093_s1 + $0x100] sm:$0xff]  }
   0xd   :  { %4829 = vmatpush3.bf16.msra.mxu1 %v5372_v11  ;;  %v5399_v40 = vld [vmem:[%s7093_s1 + $0x1c0] sm:$0xff]   ;;  %v5401_v42 = vld [vmem:[%s7093_s1 + $0x148] sm:$0xff]   ;;  %v5405_v46 = vld [vmem:[%s7093_s1 + $0x150] sm:$0xff]  }
   0xe   :  { %4830 = vmatprep.subr.bf16.mxu1 %v5375_v14  ;;  %3427 = vmatprep.mubr.bf16.mxu1 %v4364_v38  ;;  %v5400_v41 = vld [vmem:[%s7093_s1 + $0x180] sm:$0xff]   ;;  %v5402_v43 = vld [vmem:[%s7093_s1 + $0x108] sm:$0xff]   ;;  %v5406_v47 = vld [vmem:[%s7093_s1 + $0x110] sm:$0xff]  }
   0xf   :  { %4809 = vmatpush3.bf16.msra.mxu0 %v5374_v13  ;;  %v5403_v44 = vld [vmem:[%s7093_s1 + $0x1c8] sm:$0xff]   ;;  %v5407_v48 = vld [vmem:[%s7093_s1 + $0x1d0] sm:$0xff]   ;;  %v5409_v50 = vld [vmem:[%s7093_s1 + $0x158] sm:$0xff]  }
  0x10   :  { %4810 = vmatprep.subr.bf16.mxu0 %v5377_v16  ;;  %v5404_v45 = vld [vmem:[%s7093_s1 + $0x188] sm:$0xff]   ;;  %v5408_v49 = vld [vmem:[%s7093_s1 + $0x190] sm:$0xff]   ;;  %v5410_v51 = vld [vmem:[%s7093_s1 + $0x118] sm:$0xff]  }
  0x11   :  { %4831 = vmatpush3.bf16.msra.mxu1 %v5376_v15  ;;  %v5411_v52 = vld [vmem:[%s7093_s1 + $0x1d8] sm:$0xff]   ;;  %v5413_v54 = vld [vmem:[%s7093_s1 + $0x160] sm:$0xff]   ;;  %v5417_v58 = vld [vmem:[%s7093_s1 + $0x168] sm:$0xff]  }
  0x12   :  { %4832 = vmatprep.subr.bf16.mxu1 %v5379_v18  ;;  %v5412_v53 = vld [vmem:[%s7093_s1 + $0x198] sm:$0xff]   ;;  %v5414_v55 = vld [vmem:[%s7093_s1 + $0x120] sm:$0xff]   ;;  %v5418_v59 = vld [vmem:[%s7093_s1 + $0x128] sm:$0xff]  }
  0x13   :  { %4811 = vmatpush3.bf16.msra.mxu0 %v5378_v17  ;;  %v5415_v56 = vld [vmem:[%s7093_s1 + $0x1e0] sm:$0xff]   ;;  %v5419_v60 = vld [vmem:[%s7093_s1 + $0x1e8] sm:$0xff]   ;;  %v5421_v62 = vld [vmem:[%s7093_s1 + $0x170] sm:$0xff]  }
  0x14   :  { %4812 = vmatprep.subr.bf16.mxu0 %v5381_v20  ;;  %v5416_v57 = vld [vmem:[%s7093_s1 + $0x1a0] sm:$0xff]   ;;  %v5420_v61 = vld [vmem:[%s7093_s1 + $0x1a8] sm:$0xff]   ;;  %v5422_v63 = vld [vmem:[%s7093_s1 + $0x130] sm:$0xff]  }
  0x15   :  { %4833 = vmatpush3.bf16.msra.mxu1 %v5380_v19  ;;  %v5423_v0 = vld [vmem:[%s7093_s1 + $0x1f0] sm:$0xff]   ;;  %v5425_v2 = vld [vmem:[%s7093_s1 + $0x178] sm:$0xff]   ;;  %v5431_v9 = vld [vmem:[%s7093_s1 + $0x240] sm:$0xff]  }
  0x16   :  { %4834 = vmatprep.subr.bf16.mxu1 %v5383_v22  ;;  %v5424_v1 = vld [vmem:[%s7093_s1 + $0x1b0] sm:$0xff]   ;;  %v5426_v3 = vld [vmem:[%s7093_s1 + $0x138] sm:$0xff]   ;;  %v5434_v13 = vld [vmem:[%s7093_s1 + $0x200] sm:$0xff]  }
  0x17   :  { %4813 = vmatpush3.bf16.msra.mxu0 %v5382_v21  ;;  %v5427_v4 = vld [vmem:[%s7093_s1 + $0x1f8] sm:$0xff]   ;;  %v17_v5 = vld [vmem:[%s7094_s0 + $0x10] sm:$0xff]  ;;  %v5435_v14 = vld [vmem:[%s7093_s1 + $0x2c0] sm:$0xff]  }
  0x18   :  { %4814 = vmatprep.subr.bf16.mxu0 %v5385_v24  ;;  %v4365_v6 = vcombine.low %v17_v5, %v17_v5  ;;  %v4366_v7 = vcombine.high %v17_v5, %v17_v5  ;;  %v5430_v8 = vld [vmem:[%s7093_s1 + $0x1b8] sm:$0xff]   ;;  %v5436_v15 = vld [vmem:[%s7093_s1 + $0x280] sm:$0xff]   ;;  %v5437_v16 = vld [vmem:[%s7093_s1 + $0x248] sm:$0xff]  }
  0x19   :  { %4835 = vmatpush3.bf16.msra.mxu1 %v5384_v23  ;;  %v18_v10 = vld [vmem:[%s7094_s0 + $0x18] sm:$0xff]  ;;  %v5438_v17 = vld [vmem:[%s7093_s1 + $0x208] sm:$0xff]   ;;  %v5441_v20 = vld [vmem:[%s7093_s1 + $0x250] sm:$0xff]  }
  0x1a   :  { %4836 = vmatprep.subr.bf16.mxu1 %v5387_v26  ;;  %v4367_v11 = vcombine.low %v18_v10, %v18_v10  ;;  %v4368_v12 = vcombine.high %v18_v10, %v18_v10  ;;  %v5439_v18 = vld [vmem:[%s7093_s1 + $0x2c8] sm:$0xff]   ;;  %v5442_v21 = vld [vmem:[%s7093_s1 + $0x210] sm:$0xff]   ;;  %v5445_v24 = vld [vmem:[%s7093_s1 + $0x258] sm:$0xff]  }
  0x1b   :  { %4815 = vmatpush3.bf16.msra.mxu0 %v5386_v25  ;;  %v5440_v19 = vld [vmem:[%s7093_s1 + $0x288] sm:$0xff]   ;;  %v5443_v22 = vld [vmem:[%s7093_s1 + $0x2d0] sm:$0xff]   ;;  %v5446_v25 = vld [vmem:[%s7093_s1 + $0x218] sm:$0xff]  }
  0x1c   :  { %4816 = vmatprep.subr.bf16.mxu0 %v5389_v28  ;;  %v5444_v23 = vld [vmem:[%s7093_s1 + $0x290] sm:$0xff]   ;;  %v5447_v26 = vld [vmem:[%s7093_s1 + $0x2d8] sm:$0xff]   ;;  %v5449_v28 = vld [vmem:[%s7093_s1 + $0x260] sm:$0xff]  }
  0x1d   :  { %4837 = vmatpush3.bf16.msra.mxu1 %v5388_v27  ;;  %v5448_v27 = vld [vmem:[%s7093_s1 + $0x298] sm:$0xff]   ;;  %v5452_v31 = vld [vmem:[%s7093_s1 + $0x2a0] sm:$0xff]   ;;  %v5454_v33 = vld [vmem:[%s7093_s1 + $0x228] sm:$0xff]  }
  0x1e   :  { %4838 = vmatprep.subr.bf16.mxu1 %v5391_v30  ;;  %v5451_v30 = vld [vmem:[%s7093_s1 + $0x2e0] sm:$0xff]   ;;  %v5457_v36 = vld [vmem:[%s7093_s1 + $0x270] sm:$0xff]  }
  0x1f   :  { %4817 = vmatpush3.bf16.msra.mxu0 %v5390_v29  ;;  %v5450_v29 = vld [vmem:[%s7093_s1 + $0x220] sm:$0xff]   ;;  %v5459_v38 = vld [vmem:[%s7093_s1 + $0x2f0] sm:$0xff]  }
  0x20   :  { %4846 = vmatprep.subr.bf16.mxu0 %v5395_v35  ;;  %v5456_v35 = vld [vmem:[%s7093_s1 + $0x2a8] sm:$0xff]   ;;  %v5488_v5 = vld [vmem:[%s7093_s1 + $0x3a0] sm:$0xff]   ;;  %v5493_v10 = vld [vmem:[%s7093_s1 + $0x370] sm:$0xff]  }
  0x21   :  { %4839 = vmatpush3.bf16.msra.mxu1 %v5394_v34  ;;  %v5455_v34 = vld [vmem:[%s7093_s1 + $0x2e8] sm:$0xff]  }
  0x22   :  { %3388 = vmatmul.mubr.bf16.vlgmr.msra.gmra.mrb[0].mxu0 %v4361_v32  ;;  %4868 = vmatprep.subr.bf16.mxu1 %v5399_v40  ;;  %v5453_v32 = vld [vmem:[%s7093_s1 + $0x268] sm:$0xff]   ;;  %v5461_v40 = vld [vmem:[%s7093_s1 + $0x278] sm:$0xff]  }
  0x23   :  { %4847 = vmatpush3.bf16.msra.mxu0 %v5398_v39  ;;  %3467 = vmatprep.mubr.bf16.mxu0 %v4366_v7  ;;  %v5460_v39 = vld [vmem:[%s7093_s1 + $0x2b0] sm:$0xff]   ;;  %v5490_v7 = vld [vmem:[%s7093_s1 + $0x328] sm:$0xff]  }
  0x24   :  { %3428 = vmatmul.mubr.bf16.vlgmr.msra.gmra.mrb[0].mxu1 %v4363_v37  ;;  %4848 = vmatprep.subr.bf16.mxu0 %v5401_v42  ;;  %v5458_v37 = vld [vmem:[%s7093_s1 + $0x230] sm:$0xff]   ;;  %v5463_v42 = vld [vmem:[%s7093_s1 + $0x2f8] sm:$0xff]  }
  0x25   :  { %4869 = vmatpush3.bf16.msra.mxu1 %v5400_v41  ;;  %3507 = vmatprep.mubr.bf16.mxu1 %v4368_v12  ;;  %v5462_v41 = vld [vmem:[%s7093_s1 + $0x238] sm:$0xff]   ;;  %v5495_v12 = vld [vmem:[%s7093_s1 + $0x3f0] sm:$0xff]  }
  0x26   :  { %4870 = vmatprep.subr.bf16.mxu1 %v5403_v44 }
  0x27   :  { %4849 = vmatpush3.bf16.msra.mxu0 %v5402_v43  ;;  %v19_v43 = vld [vmem:[%s7094_s0 + $0x20] sm:$0xff] }
  0x28   :  { %4850 = vmatprep.subr.bf16.mxu0 %v5405_v46  ;;  %v4369_v44 = vcombine.low %v19_v43, %v19_v43  ;;  %v5466_v46 = vld [vmem:[%s7093_s1 + $0x2b8] sm:$0xff]  }
  0x29   :  { %4871 = vmatpush3.bf16.msra.mxu1 %v5404_v45  ;;  %v4370_v45 = vcombine.high %v19_v43, %v19_v43  ;;  %v5524_v43 = vld [vmem:[%s7093_s1 + $0x4a0] sm:$0xff]  }
  0x2a   :  { %4872 = vmatprep.subr.bf16.mxu1 %v5407_v48  ;;  %v20_v48 = vld [vmem:[%s7094_s0 + $0x28] sm:$0xff] }
  0x2b   :  { %4851 = vmatpush3.bf16.msra.mxu0 %v5406_v47  ;;  %v5467_v47 = vld [vmem:[%s7093_s1 + $0x340] sm:$0xff]  }
  0x2c   :  { %4852 = vmatprep.subr.bf16.mxu0 %v5409_v50  ;;  %v4372_v50 = vcombine.high %v20_v48, %v20_v48 }
  0x2d   :  { %4873 = vmatpush3.bf16.msra.mxu1 %v5408_v49  ;;  %v4371_v49 = vcombine.low %v20_v48, %v20_v48  ;;  %v5529_v48 = vld [vmem:[%s7093_s1 + $0x470] sm:$0xff]  }
  0x2e   :  { %4874 = vmatprep.subr.bf16.mxu1 %v5411_v52  ;;  %v5471_v52 = vld [vmem:[%s7093_s1 + $0x3c0] sm:$0xff]  }
  0x2f   :  { %4853 = vmatpush3.bf16.msra.mxu0 %v5410_v51  ;;  %v5470_v51 = vld [vmem:[%s7093_s1 + $0x300] sm:$0xff]  }
  0x30   :  { %4854 = vmatprep.subr.bf16.mxu0 %v5413_v54  ;;  %v5473_v54 = vld [vmem:[%s7093_s1 + $0x348] sm:$0xff]  }
  0x31   :  { %4875 = vmatpush3.bf16.msra.mxu1 %v5412_v53  ;;  %v5472_v53 = vld [vmem:[%s7093_s1 + $0x380] sm:$0xff]  }
  0x32   :  { %4876 = vmatprep.subr.bf16.mxu1 %v5415_v56  ;;  %v5475_v56 = vld [vmem:[%s7093_s1 + $0x3c8] sm:$0xff]  }
  0x33   :  { %4855 = vmatpush3.bf16.msra.mxu0 %v5414_v55  ;;  %v5474_v55 = vld [vmem:[%s7093_s1 + $0x308] sm:$0xff]  }
  0x34   :  { %4856 = vmatprep.subr.bf16.mxu0 %v5417_v58  ;;  %v5477_v58 = vld [vmem:[%s7093_s1 + $0x350] sm:$0xff]  }
  0x35   :  { %4877 = vmatpush3.bf16.msra.mxu1 %v5416_v57  ;;  %v5476_v57 = vld [vmem:[%s7093_s1 + $0x388] sm:$0xff]  }
  0x36   :  { %4878 = vmatprep.subr.bf16.mxu1 %v5419_v60  ;;  %v5479_v60 = vld [vmem:[%s7093_s1 + $0x3d0] sm:$0xff]  }
  0x37   :  { %4857 = vmatpush3.bf16.msra.mxu0 %v5418_v59  ;;  %v5478_v59 = vld [vmem:[%s7093_s1 + $0x310] sm:$0xff]  }
  0x38   :  { %4858 = vmatprep.subr.bf16.mxu0 %v5421_v62  ;;  %v5481_v62 = vld [vmem:[%s7093_s1 + $0x358] sm:$0xff]  }
  0x39   :  { %4879 = vmatpush3.bf16.msra.mxu1 %v5420_v61  ;;  %v5480_v61 = vld [vmem:[%s7093_s1 + $0x390] sm:$0xff]  }
  0x3a   :  { %4880 = vmatprep.subr.bf16.mxu1 %v5423_v0  ;;  %v5483_v0 = vld [vmem:[%s7093_s1 + $0x3d8] sm:$0xff]  }
  0x3b   :  { %4859 = vmatpush3.bf16.msra.mxu0 %v5422_v63  ;;  %v5482_v63 = vld [vmem:[%s7093_s1 + $0x318] sm:$0xff]  }
  0x3c   :  { %4860 = vmatprep.subr.bf16.mxu0 %v5425_v2  ;;  %v5485_v2 = vld [vmem:[%s7093_s1 + $0x360] sm:$0xff]  }
  0x3d   :  { %4881 = vmatpush3.bf16.msra.mxu1 %v5424_v1  ;;  %v5484_v1 = vld [vmem:[%s7093_s1 + $0x398] sm:$0xff]  }
  0x3e   :  { %4882 = vmatprep.subr.bf16.mxu1 %v5427_v4  ;;  %v5487_v4 = vld [vmem:[%s7093_s1 + $0x3e0] sm:$0xff]  }
  0x3f   :  { %4861 = vmatpush3.bf16.msra.mxu0 %v5426_v3  ;;  %v5486_v3 = vld [vmem:[%s7093_s1 + $0x320] sm:$0xff]  }
  0x40   :  { %4890 = vmatprep.subr.bf16.mxu0 %v5431_v9  ;;  %v5492_v9 = vld [vmem:[%s7093_s1 + $0x3a8] sm:$0xff]  }
  0x41   :  { %4883 = vmatpush3.bf16.msra.mxu1 %v5430_v8  ;;  %v5491_v8 = vld [vmem:[%s7093_s1 + $0x3e8] sm:$0xff]  }
  0x42   :  { %3468 = vmatmul.mubr.bf16.vlgmr.msra.gmra.mrb[4].mxu0 %v4365_v6  ;;  %4912 = vmatprep.subr.bf16.mxu1 %v5435_v14  ;;  %v5489_v6 = vld [vmem:[%s7093_s1 + $0x368] sm:$0xff]   ;;  %v5497_v14 = vld [vmem:[%s7093_s1 + $0x378] sm:$0xff]  }
  0x43   :  { %4891 = vmatpush3.bf16.msra.mxu0 %v5434_v13  ;;  %3547 = vmatprep.mubr.bf16.mxu0 %v4370_v45  ;;  %v5496_v13 = vld [vmem:[%s7093_s1 + $0x3b0] sm:$0xff]   ;;  %v5526_v45 = vld [vmem:[%s7093_s1 + $0x428] sm:$0xff]  }
  0x44   :  { %3508 = vmatmul.mubr.bf16.vlgmr.msra.gmra.mrb[4].mxu1 %v4367_v11  ;;  %4892 = vmatprep.subr.bf16.mxu0 %v5437_v16  ;;  %v5494_v11 = vld [vmem:[%s7093_s1 + $0x330] sm:$0xff]   ;;  %v5499_v16 = vld [vmem:[%s7093_s1 + $0x3f8] sm:$0xff]  }
  0x45   :  { %4913 = vmatpush3.bf16.msra.mxu1 %v5436_v15  ;;  %3587 = vmatprep.mubr.bf16.mxu1 %v4372_v50  ;;  %v5498_v15 = vld [vmem:[%s7093_s1 + $0x338] sm:$0xff]   ;;  %v5531_v50 = vld [vmem:[%s7093_s1 + $0x4f0] sm:$0xff]  }
  0x46   :  { %4914 = vmatprep.subr.bf16.mxu1 %v5439_v18 }
  0x47   :  { %4893 = vmatpush3.bf16.msra.mxu0 %v5438_v17  ;;  %v21_v17 = vld [vmem:[%s7094_s0 + $0x30] sm:$0xff] }
  0x48   :  { %4894 = vmatprep.subr.bf16.mxu0 %v5441_v20  ;;  %v4373_v18 = vcombine.low %v21_v17, %v21_v17  ;;  %v5502_v20 = vld [vmem:[%s7093_s1 + $0x3b8] sm:$0xff]  }
  0x49   :  { %4915 = vmatpush3.bf16.msra.mxu1 %v5440_v19  ;;  %v4374_v19 = vcombine.high %v21_v17, %v21_v17  ;;  %v5560_v17 = vld [vmem:[%s7093_s1 + $0x5a0] sm:$0xff]  }
  0x4a   :  { %4916 = vmatprep.subr.bf16.mxu1 %v5443_v22  ;;  %v22_v22 = vld [vmem:[%s7094_s0 + $0x38] sm:$0xff] }
  0x4b   :  { %4895 = vmatpush3.bf16.msra.mxu0 %v5442_v21  ;;  %v5503_v21 = vld [vmem:[%s7093_s1 + $0x440] sm:$0xff]  }
  0x4c   :  { %4896 = vmatprep.subr.bf16.mxu0 %v5445_v24  ;;  %v4376_v24 = vcombine.high %v22_v22, %v22_v22 }
  0x4d   :  { %4917 = vmatpush3.bf16.msra.mxu1 %v5444_v23  ;;  %v4375_v23 = vcombine.low %v22_v22, %v22_v22  ;;  %v5565_v22 = vld [vmem:[%s7093_s1 + $0x570] sm:$0xff]  }
  0x4e   :  { %4918 = vmatprep.subr.bf16.mxu1 %v5447_v26  ;;  %v5507_v26 = vld [vmem:[%s7093_s1 + $0x4c0] sm:$0xff]  }
  0x4f   :  { %4897 = vmatpush3.bf16.msra.mxu0 %v5446_v25  ;;  %v5506_v25 = vld [vmem:[%s7093_s1 + $0x400] sm:$0xff]  }
  0x50   :  { %4898 = vmatprep.subr.bf16.mxu0 %v5449_v28  ;;  %v5509_v28 = vld [vmem:[%s7093_s1 + $0x448] sm:$0xff]  }
  0x51   :  { %4919 = vmatpush3.bf16.msra.mxu1 %v5448_v27  ;;  %v5508_v27 = vld [vmem:[%s7093_s1 + $0x480] sm:$0xff]  }
  0x52   :  { %4920 = vmatprep.subr.bf16.mxu1 %v5451_v30  ;;  %v5511_v30 = vld [vmem:[%s7093_s1 + $0x4c8] sm:$0xff]  }
  0x53   :  { %4899 = vmatpush3.bf16.msra.mxu0 %v5450_v29  ;;  %v5510_v29 = vld [vmem:[%s7093_s1 + $0x408] sm:$0xff]  }
  0x54   :  { %4900 = vmatprep.subr.bf16.mxu0 %v5453_v32  ;;  %v5513_v32 = vld [vmem:[%s7093_s1 + $0x450] sm:$0xff]  }
  0x55   :  { %4921 = vmatpush3.bf16.msra.mxu1 %v5452_v31  ;;  %v5512_v31 = vld [vmem:[%s7093_s1 + $0x488] sm:$0xff]  }
  0x56   :  { %4922 = vmatprep.subr.bf16.mxu1 %v5455_v34  ;;  %v5515_v34 = vld [vmem:[%s7093_s1 + $0x4d0] sm:$0xff]  }
  0x57   :  { %4901 = vmatpush3.bf16.msra.mxu0 %v5454_v33  ;;  %v5514_v33 = vld [vmem:[%s7093_s1 + $0x410] sm:$0xff]  }
  0x58   :  { %4902 = vmatprep.subr.bf16.mxu0 %v5457_v36  ;;  %v5517_v36 = vld [vmem:[%s7093_s1 + $0x458] sm:$0xff]  }
  0x59   :  { %4923 = vmatpush3.bf16.msra.mxu1 %v5456_v35  ;;  %v5516_v35 = vld [vmem:[%s7093_s1 + $0x490] sm:$0xff]  }
  0x5a   :  { %4924 = vmatprep.subr.bf16.mxu1 %v5459_v38  ;;  %v5519_v38 = vld [vmem:[%s7093_s1 + $0x4d8] sm:$0xff]  }
  0x5b   :  { %4903 = vmatpush3.bf16.msra.mxu0 %v5458_v37  ;;  %v5518_v37 = vld [vmem:[%s7093_s1 + $0x418] sm:$0xff]  }
  0x5c   :  { %4904 = vmatprep.subr.bf16.mxu0 %v5461_v40  ;;  %v5521_v40 = vld [vmem:[%s7093_s1 + $0x460] sm:$0xff]  }
  0x5d   :  { %4925 = vmatpush3.bf16.msra.mxu1 %v5460_v39  ;;  %v5520_v39 = vld [vmem:[%s7093_s1 + $0x498] sm:$0xff]  }
  0x5e   :  { %4926 = vmatprep.subr.bf16.mxu1 %v5463_v42  ;;  %v5523_v42 = vld [vmem:[%s7093_s1 + $0x4e0] sm:$0xff]  }
  0x5f   :  { %4905 = vmatpush3.bf16.msra.mxu0 %v5462_v41  ;;  %v5522_v41 = vld [vmem:[%s7093_s1 + $0x420] sm:$0xff]  }
  0x60   :  { %4934 = vmatprep.subr.bf16.mxu0 %v5467_v47  ;;  %v5528_v47 = vld [vmem:[%s7093_s1 + $0x4a8] sm:$0xff]  }
  0x61   :  { %4927 = vmatpush3.bf16.msra.mxu1 %v5466_v46  ;;  %v5527_v46 = vld [vmem:[%s7093_s1 + $0x4e8] sm:$0xff]  }
  0x62   :  { %3548 = vmatmul.mubr.bf16.vlgmr.msra.gmra.mrb[8].mxu0 %v4369_v44  ;;  %4956 = vmatprep.subr.bf16.mxu1 %v5471_v52  ;;  %v5525_v44 = vld [vmem:[%s7093_s1 + $0x468] sm:$0xff]   ;;  %v5533_v52 = vld [vmem:[%s7093_s1 + $0x478] sm:$0xff]  }
  0x63   :  { %4935 = vmatpush3.bf16.msra.mxu0 %v5470_v51  ;;  %3627 = vmatprep.mubr.bf16.mxu0 %v4374_v19  ;;  %v5532_v51 = vld [vmem:[%s7093_s1 + $0x4b0] sm:$0xff]   ;;  %v5562_v19 = vld [vmem:[%s7093_s1 + $0x528] sm:$0xff]  }
  0x64   :  { %3588 = vmatmul.mubr.bf16.vlgmr.msra.gmra.mrb[8].mxu1 %v4371_v49  ;;  %4936 = vmatprep.subr.bf16.mxu0 %v5473_v54  ;;  %v5530_v49 = vld [vmem:[%s7093_s1 + $0x430] sm:$0xff]   ;;  %v5535_v54 = vld [vmem:[%s7093_s1 + $0x4f8] sm:$0xff]  }
  0x65   :  { %4957 = vmatpush3.bf16.msra.mxu1 %v5472_v53  ;;  %3667 = vmatprep.mubr.bf16.mxu1 %v4376_v24  ;;  %v5534_v53 = vld [vmem:[%s7093_s1 + $0x438] sm:$0xff]   ;;  %v5567_v24 = vld [vmem:[%s7093_s1 + $0x5f0] sm:$0xff]  }
  0x66   :  { %4958 = vmatprep.subr.bf16.mxu1 %v5475_v56 }
  0x67   :  { %4937 = vmatpush3.bf16.msra.mxu0 %v5474_v55  ;;  %v23_v55 = vld [vmem:[%s7094_s0 + $0x40] sm:$0xff] }
  0x68   :  { %4938 = vmatprep.subr.bf16.mxu0 %v5477_v58  ;;  %v4377_v56 = vcombine.low %v23_v55, %v23_v55  ;;  %v5538_v58 = vld [vmem:[%s7093_s1 + $0x4b8] sm:$0xff]  }
  0x69   :  { %4959 = vmatpush3.bf16.msra.mxu1 %v5476_v57  ;;  %v4378_v57 = vcombine.high %v23_v55, %v23_v55  ;;  %v5596_v55 = vld [vmem:[%s7093_s1 + $0x6a0] sm:$0xff]  }
  0x6a   :  { %4960 = vmatprep.subr.bf16.mxu1 %v5479_v60  ;;  %v24_v60 = vld [vmem:[%s7094_s0 + $0x48] sm:$0xff] }
  0x6b   :  { %4939 = vmatpush3.bf16.msra.mxu0 %v5478_v59  ;;  %v5539_v59 = vld [vmem:[%s7093_s1 + $0x540] sm:$0xff]  }
  0x6c   :  { %4940 = vmatprep.subr.bf16.mxu0 %v5481_v62  ;;  %v4380_v62 = vcombine.high %v24_v60, %v24_v60 }
  0x6d   :  { %4961 = vmatpush3.bf16.msra.mxu1 %v5480_v61  ;;  %v4379_v61 = vcombine.low %v24_v60, %v24_v60  ;;  %v5601_v60 = vld [vmem:[%s7093_s1 + $0x670] sm:$0xff]  }
  0x6e   :  { %4962 = vmatprep.subr.bf16.mxu1 %v5483_v0  ;;  %v5543_v0 = vld [vmem:[%s7093_s1 + $0x5c0] sm:$0xff]  }
  0x6f   :  { %4941 = vmatpush3.bf16.msra.mxu0 %v5482_v63  ;;  %v5542_v63 = vld [vmem:[%s7093_s1 + $0x500] sm:$0xff]  }
  0x70   :  { %4942 = vmatprep.subr.bf16.mxu0 %v5485_v2  ;;  %v5545_v2 = vld [vmem:[%s7093_s1 + $0x548] sm:$0xff]  }
  0x71   :  { %4963 = vmatpush3.bf16.msra.mxu1 %v5484_v1  ;;  %v5544_v1 = vld [vmem:[%s7093_s1 + $0x580] sm:$0xff]  }
  0x72   :  { %4964 = vmatprep.subr.bf16.mxu1 %v5487_v4  ;;  %v5547_v4 = vld [vmem:[%s7093_s1 + $0x5c8] sm:$0xff]  }
  0x73   :  { %4943 = vmatpush3.bf16.msra.mxu0 %v5486_v3  ;;  %v5546_v3 = vld [vmem:[%s7093_s1 + $0x508] sm:$0xff]  }
  0x74   :  { %4944 = vmatprep.subr.bf16.mxu0 %v5489_v6  ;;  %v5549_v6 = vld [vmem:[%s7093_s1 + $0x550] sm:$0xff]  }
  0x75   :  { %4965 = vmatpush3.bf16.msra.mxu1 %v5488_v5  ;;  %v5548_v5 = vld [vmem:[%s7093_s1 + $0x588] sm:$0xff]  }
  0x76   :  { %4966 = vmatprep.subr.bf16.mxu1 %v5491_v8  ;;  %v5551_v8 = vld [vmem:[%s7093_s1 + $0x5d0] sm:$0xff]  }
  0x77   :  { %4945 = vmatpush3.bf16.msra.mxu0 %v5490_v7  ;;  %v5550_v7 = vld [vmem:[%s7093_s1 + $0x510] sm:$0xff]  }
  0x78   :  { %4946 = vmatprep.subr.bf16.mxu0 %v5493_v10  ;;  %v5553_v10 = vld [vmem:[%s7093_s1 + $0x558] sm:$0xff]  }
  0x79   :  { %4967 = vmatpush3.bf16.msra.mxu1 %v5492_v9  ;;  %v5552_v9 = vld [vmem:[%s7093_s1 + $0x590] sm:$0xff]  }
  0x7a   :  { %4968 = vmatprep.subr.bf16.mxu1 %v5495_v12  ;;  %v5555_v12 = vld [vmem:[%s7093_s1 + $0x5d8] sm:$0xff]  }
  0x7b   :  { %4947 = vmatpush3.bf16.msra.mxu0 %v5494_v11  ;;  %v5554_v11 = vld [vmem:[%s7093_s1 + $0x518] sm:$0xff]  }
  0x7c   :  { %4948 = vmatprep.subr.bf16.mxu0 %v5497_v14  ;;  %v5557_v14 = vld [vmem:[%s7093_s1 + $0x560] sm:$0xff]  }
  0x7d   :  { %4969 = vmatpush3.bf16.msra.mxu1 %v5496_v13  ;;  %v5556_v13 = vld [vmem:[%s7093_s1 + $0x598] sm:$0xff]  }
  0x7e   :  { %4970 = vmatprep.subr.bf16.mxu1 %v5499_v16  ;;  %v5559_v16 = vld [vmem:[%s7093_s1 + $0x5e0] sm:$0xff]  }
  0x7f   :  { %4949 = vmatpush3.bf16.msra.mxu0 %v5498_v15  ;;  %v5558_v15 = vld [vmem:[%s7093_s1 + $0x520] sm:$0xff]  }
  0x80   :  { %4978 = vmatprep.subr.bf16.mxu0 %v5503_v21  ;;  %v5564_v21 = vld [vmem:[%s7093_s1 + $0x5a8] sm:$0xff]  }
  0x81   :  { %4971 = vmatpush3.bf16.msra.mxu1 %v5502_v20  ;;  %v5563_v20 = vld [vmem:[%s7093_s1 + $0x5e8] sm:$0xff]  }
  0x82   :  { %3628 = vmatmul.mubr.bf16.vlgmr.msra.gmra.mrb[12].mxu0 %v4373_v18  ;;  %5000 = vmatprep.subr.bf16.mxu1 %v5507_v26  ;;  %v5561_v18 = vld [vmem:[%s7093_s1 + $0x568] sm:$0xff]   ;;  %v5569_v26 = vld [vmem:[%s7093_s1 + $0x578] sm:$0xff]  }
  0x83   :  { %4979 = vmatpush3.bf16.msra.mxu0 %v5506_v25  ;;  %3707 = vmatprep.mubr.bf16.mxu0 %v4378_v57  ;;  %v5568_v25 = vld [vmem:[%s7093_s1 + $0x5b0] sm:$0xff]   ;;  %v5598_v57 = vld [vmem:[%s7093_s1 + $0x628] sm:$0xff]  }
  0x84   :  { %3668 = vmatmul.mubr.bf16.vlgmr.msra.gmra.mrb[12].mxu1 %v4375_v23  ;;  %4980 = vmatprep.subr.bf16.mxu0 %v5509_v28  ;;  %v5566_v23 = vld [vmem:[%s7093_s1 + $0x530] sm:$0xff]   ;;  %v5571_v28 = vld [vmem:[%s7093_s1 + $0x5f8] sm:$0xff]  }
  0x85   :  { %5001 = vmatpush3.bf16.msra.mxu1 %v5508_v27  ;;  %3747 = vmatprep.mubr.bf16.mxu1 %v4380_v62  ;;  %v5570_v27 = vld [vmem:[%s7093_s1 + $0x538] sm:$0xff]   ;;  %v5603_v62 = vld [vmem:[%s7093_s1 + $0x6f0] sm:$0xff]  }
  0x86   :  { %5002 = vmatprep.subr.bf16.mxu1 %v5511_v30 }
  0x87   :  { %4981 = vmatpush3.bf16.msra.mxu0 %v5510_v29  ;;  %v25_v29 = vld [vmem:[%s7094_s0 + $0x50] sm:$0xff] }
  0x88   :  { %4982 = vmatprep.subr.bf16.mxu0 %v5513_v32  ;;  %v4381_v30 = vcombine.low %v25_v29, %v25_v29  ;;  %v5574_v32 = vld [vmem:[%s7093_s1 + $0x5b8] sm:$0xff]  }
  0x89   :  { %5003 = vmatpush3.bf16.msra.mxu1 %v5512_v31  ;;  %v4382_v31 = vcombine.high %v25_v29, %v25_v29  ;;  %v5631_v29 = vld [vmem:[%s7093_s1 + $0x7e0] sm:$0xff]  }
  0x8a   :  { %5004 = vmatprep.subr.bf16.mxu1 %v5515_v34  ;;  %v26_v34 = vld [vmem:[%s7094_s0 + $0x58] sm:$0xff] }
  0x8b   :  { %4983 = vmatpush3.bf16.msra.mxu0 %v5514_v33  ;;  %v5575_v33 = vld [vmem:[%s7093_s1 + $0x640] sm:$0xff]  }
  0x8c   :  { %4984 = vmatprep.subr.bf16.mxu0 %v5517_v36  ;;  %v4384_v36 = vcombine.high %v26_v34, %v26_v34 }
  0x8d   :  { %5005 = vmatpush3.bf16.msra.mxu1 %v5516_v35  ;;  %v4383_v35 = vcombine.low %v26_v34, %v26_v34 }
  0x8e   :  { %5006 = vmatprep.subr.bf16.mxu1 %v5519_v38  ;;  %v5579_v38 = vld [vmem:[%s7093_s1 + $0x6c0] sm:$0xff]  }
  0x8f   :  { %4985 = vmatpush3.bf16.msra.mxu0 %v5518_v37  ;;  %v5578_v37 = vld [vmem:[%s7093_s1 + $0x600] sm:$0xff]  }
  0x90   :  { %4986 = vmatprep.subr.bf16.mxu0 %v5521_v40  ;;  %v5581_v40 = vld [vmem:[%s7093_s1 + $0x648] sm:$0xff]  }
  0x91   :  { %5007 = vmatpush3.bf16.msra.mxu1 %v5520_v39  ;;  %v5580_v39 = vld [vmem:[%s7093_s1 + $0x680] sm:$0xff]  }
  0x92   :  { %5008 = vmatprep.subr.bf16.mxu1 %v5523_v42  ;;  %v5583_v42 = vld [vmem:[%s7093_s1 + $0x6c8] sm:$0xff]  }
  0x93   :  { %4987 = vmatpush3.bf16.msra.mxu0 %v5522_v41  ;;  %v5582_v41 = vld [vmem:[%s7093_s1 + $0x608] sm:$0xff]  }
  0x94   :  { %4988 = vmatprep.subr.bf16.mxu0 %v5525_v44  ;;  %v5585_v44 = vld [vmem:[%s7093_s1 + $0x650] sm:$0xff]  }
  0x95   :  { %5009 = vmatpush3.bf16.msra.mxu1 %v5524_v43  ;;  %v5584_v43 = vld [vmem:[%s7093_s1 + $0x688] sm:$0xff]  }
  0x96   :  { %5010 = vmatprep.subr.bf16.mxu1 %v5527_v46  ;;  %v5587_v46 = vld [vmem:[%s7093_s1 + $0x6d0] sm:$0xff]  }
  0x97   :  { %4989 = vmatpush3.bf16.msra.mxu0 %v5526_v45  ;;  %v5586_v45 = vld [vmem:[%s7093_s1 + $0x610] sm:$0xff]  }
  0x98   :  { %4990 = vmatprep.subr.bf16.mxu0 %v5529_v48  ;;  %v5589_v48 = vld [vmem:[%s7093_s1 + $0x658] sm:$0xff]  }
  0x99   :  { %5011 = vmatpush3.bf16.msra.mxu1 %v5528_v47  ;;  %v5588_v47 = vld [vmem:[%s7093_s1 + $0x690] sm:$0xff]  }
  0x9a   :  { %5012 = vmatprep.subr.bf16.mxu1 %v5531_v50  ;;  %v5591_v50 = vld [vmem:[%s7093_s1 + $0x6d8] sm:$0xff]  }
  0x9b   :  { %4991 = vmatpush3.bf16.msra.mxu0 %v5530_v49  ;;  %v5590_v49 = vld [vmem:[%s7093_s1 + $0x618] sm:$0xff]  }
  0x9c   :  { %4992 = vmatprep.subr.bf16.mxu0 %v5533_v52  ;;  %v5593_v52 = vld [vmem:[%s7093_s1 + $0x660] sm:$0xff]  }
  0x9d   :  { %5013 = vmatpush3.bf16.msra.mxu1 %v5532_v51  ;;  %v5592_v51 = vld [vmem:[%s7093_s1 + $0x698] sm:$0xff]  }
  0x9e   :  { %5014 = vmatprep.subr.bf16.mxu1 %v5535_v54  ;;  %v5595_v54 = vld [vmem:[%s7093_s1 + $0x6e0] sm:$0xff]  }
  0x9f   :  { %4993 = vmatpush3.bf16.msra.mxu0 %v5534_v53  ;;  %v5594_v53 = vld [vmem:[%s7093_s1 + $0x620] sm:$0xff]  }
  0xa0   :  { %5022 = vmatprep.subr.bf16.mxu0 %v5539_v59  ;;  %v5600_v59 = vld [vmem:[%s7093_s1 + $0x6a8] sm:$0xff]  }
  0xa1   :  { %5015 = vmatpush3.bf16.msra.mxu1 %v5538_v58  ;;  %v5599_v58 = vld [vmem:[%s7093_s1 + $0x6e8] sm:$0xff]  }
  0xa2   :  { %3708 = vmatmul.mubr.bf16.vlgmr.msra.gmra.mrb[16].mxu0 %v4377_v56  ;;  %5044 = vmatprep.subr.bf16.mxu1 %v5543_v0  ;;  %v5597_v56 = vld [vmem:[%s7093_s1 + $0x668] sm:$0xff]   ;;  %v5605_v0 = vld [vmem:[%s7093_s1 + $0x678] sm:$0xff]  }
  0xa3   :  { %5023 = vmatpush3.bf16.msra.mxu0 %v5542_v63  ;;  %3787 = vmatprep.mubr.bf16.mxu0 %v4382_v31  ;;  %v5604_v63 = vld [vmem:[%s7093_s1 + $0x6b0] sm:$0xff]   ;;  %v5632_v31 = vld [vmem:[%s7093_s1 + $0x7a0] sm:$0xff]  }
  0xa4   :  { %3748 = vmatmul.mubr.bf16.vlgmr.msra.gmra.mrb[16].mxu1 %v4379_v61  ;;  %5024 = vmatprep.subr.bf16.mxu0 %v5545_v2  ;;  %v5602_v61 = vld [vmem:[%s7093_s1 + $0x630] sm:$0xff]   ;;  %v5607_v2 = vld [vmem:[%s7093_s1 + $0x6f8] sm:$0xff]  }
  0xa5   :  { %5045 = vmatpush3.bf16.msra.mxu1 %v5544_v1  ;;  %3827 = vmatprep.mubr.bf16.mxu1 %v4384_v36  ;;  %v5606_v1 = vld [vmem:[%s7093_s1 + $0x638] sm:$0xff]  }
  0xa6   :  { %5046 = vmatprep.subr.bf16.mxu1 %v5547_v4 }
  0xa7   :  { %5025 = vmatpush3.bf16.msra.mxu0 %v5546_v3  ;;  %v27_v3 = vld [vmem:[%s7094_s0 + $0x60] sm:$0xff] }
  0xa8   :  { %5026 = vmatprep.subr.bf16.mxu0 %v5549_v6  ;;  %v4385_v4 = vcombine.low %v27_v3, %v27_v3  ;;  %v5610_v6 = vld [vmem:[%s7093_s1 + $0x6b8] sm:$0xff]  }
  0xa9   :  { %5047 = vmatpush3.bf16.msra.mxu1 %v5548_v5  ;;  %v4386_v5 = vcombine.high %v27_v3, %v27_v3  ;;  %v5655_v3 = vld [vmem:[%s7093_s1 + $0x8c8] sm:$0xff]  }
  0xaa   :  { %5048 = vmatprep.subr.bf16.mxu1 %v5551_v8  ;;  %v28_v8 = vld [vmem:[%s7094_s0 + $0x68] sm:$0xff] }
  0xab   :  { %5027 = vmatpush3.bf16.msra.mxu0 %v5550_v7  ;;  %v5611_v7 = vld [vmem:[%s7093_s1 + $0x740] sm:$0xff]  }
  0xac   :  { %5028 = vmatprep.subr.bf16.mxu0 %v5553_v10  ;;  %v4388_v10 = vcombine.high %v28_v8, %v28_v8 }
  0xad   :  { %5049 = vmatpush3.bf16.msra.mxu1 %v5552_v9  ;;  %v4387_v9 = vcombine.low %v28_v8, %v28_v8  ;;  %v5660_v8 = vld [vmem:[%s7093_s1 + $0x890] sm:$0xff]  }
  0xae   :  { %5050 = vmatprep.subr.bf16.mxu1 %v5555_v12  ;;  %v5615_v12 = vld [vmem:[%s7093_s1 + $0x7c0] sm:$0xff]  }
  0xaf   :  { %5029 = vmatpush3.bf16.msra.mxu0 %v5554_v11  ;;  %v5614_v11 = vld [vmem:[%s7093_s1 + $0x700] sm:$0xff]  }
  0xb0   :  { %5030 = vmatprep.subr.bf16.mxu0 %v5557_v14  ;;  %v5617_v14 = vld [vmem:[%s7093_s1 + $0x748] sm:$0xff]  }
  0xb1   :  { %5051 = vmatpush3.bf16.msra.mxu1 %v5556_v13  ;;  %v5616_v13 = vld [vmem:[%s7093_s1 + $0x780] sm:$0xff]  }
  0xb2   :  { %5052 = vmatprep.subr.bf16.mxu1 %v5559_v16  ;;  %v5619_v16 = vld [vmem:[%s7093_s1 + $0x7c8] sm:$0xff]  }
  0xb3   :  { %5031 = vmatpush3.bf16.msra.mxu0 %v5558_v15  ;;  %v5618_v15 = vld [vmem:[%s7093_s1 + $0x708] sm:$0xff]  }
  0xb4   :  { %5032 = vmatprep.subr.bf16.mxu0 %v5561_v18  ;;  %v5621_v18 = vld [vmem:[%s7093_s1 + $0x750] sm:$0xff]  }
  0xb5   :  { %5053 = vmatpush3.bf16.msra.mxu1 %v5560_v17  ;;  %v5620_v17 = vld [vmem:[%s7093_s1 + $0x788] sm:$0xff]  }
  0xb6   :  { %5054 = vmatprep.subr.bf16.mxu1 %v5563_v20  ;;  %v5623_v20 = vld [vmem:[%s7093_s1 + $0x7d0] sm:$0xff]  }
  0xb7   :  { %5033 = vmatpush3.bf16.msra.mxu0 %v5562_v19  ;;  %v5622_v19 = vld [vmem:[%s7093_s1 + $0x710] sm:$0xff]  }
  0xb8   :  { %5034 = vmatprep.subr.bf16.mxu0 %v5565_v22  ;;  %v5625_v22 = vld [vmem:[%s7093_s1 + $0x758] sm:$0xff]  }
  0xb9   :  { %5055 = vmatpush3.bf16.msra.mxu1 %v5564_v21  ;;  %v5624_v21 = vld [vmem:[%s7093_s1 + $0x790] sm:$0xff]  }
  0xba   :  { %5056 = vmatprep.subr.bf16.mxu1 %v5567_v24  ;;  %v5627_v24 = vld [vmem:[%s7093_s1 + $0x7d8] sm:$0xff]  }
  0xbb   :  { %5035 = vmatpush3.bf16.msra.mxu0 %v5566_v23  ;;  %v5626_v23 = vld [vmem:[%s7093_s1 + $0x718] sm:$0xff]  }
  0xbc   :  { %5036 = vmatprep.subr.bf16.mxu0 %v5569_v26  ;;  %v5629_v26 = vld [vmem:[%s7093_s1 + $0x760] sm:$0xff]  }
  0xbd   :  { %5057 = vmatpush3.bf16.msra.mxu1 %v5568_v25  ;;  %v5628_v25 = vld [vmem:[%s7093_s1 + $0x798] sm:$0xff]  }
  0xbe   :  { %5058 = vmatprep.subr.bf16.mxu1 %v5571_v28 }
  0xbf   :  { %5037 = vmatpush3.bf16.msra.mxu0 %v5570_v27  ;;  %v5630_v27 = vld [vmem:[%s7093_s1 + $0x720] sm:$0xff]  }
  0xc0   :  { %5066 = vmatprep.subr.bf16.mxu0 %v5575_v33 }
  0xc1   :  { %5059 = vmatpush3.bf16.msra.mxu1 %v5574_v32  ;;  %v4360_v32 = vld [vmem:[%s7095_s2] ss:$0 sm:$0xff] }
  0xc2   :  { %3788 = vmatmul.mubr.bf16.vlgmr.msra.gmra.mrb[20].mxu0 %v4381_v30  ;;  %5088 = vmatprep.subr.bf16.mxu1 %v5579_v38  ;;  %v5634_v38 = vld [vmem:[%s7093_s1 + $0x728] sm:$0xff]  }
  0xc3   :  { %5067 = vmatpush3.bf16.msra.mxu0 %v5578_v37  ;;  %3867 = vmatprep.mubr.bf16.mxu0 %v4386_v5  ;;  %v5657_v5 = vld [vmem:[%s7093_s1 + $0x850] sm:$0xff]  }
  0xc4   :  { %3828 = vmatmul.mubr.bf16.vlgmr.msra.gmra.mrb[20].mxu1 %v4383_v35  ;;  %5068 = vmatprep.subr.bf16.mxu0 %v5581_v40  ;;  %v5633_v35 = vld [vmem:[%s7093_s1 + $0x768] sm:$0xff]  }
  0xc5   :  { %5089 = vmatpush3.bf16.msra.mxu1 %v5580_v39  ;;  %3907 = vmatprep.mubr.bf16.mxu1 %v4388_v10  ;;  %v5662_v10 = vld [vmem:[%s7093_s1 + $0x818] sm:$0xff]  }
  0xc6   :  { %5090 = vmatprep.subr.bf16.mxu1 %v5583_v42 }
  0xc7   :  { %5069 = vmatpush3.bf16.msra.mxu0 %v5582_v41  ;;  %v5635_v41 = vld [vmem:[%s7093_s1 + $0x7e8] sm:$0xff]  }
  0xc8   :  { %5070 = vmatprep.subr.bf16.mxu0 %v5585_v44 }
  0xc9   :  { %5091 = vmatpush3.bf16.msra.mxu1 %v5584_v43  ;;  %v5636_v43 = vld [vmem:[%s7093_s1 + $0x7a8] sm:$0xff]  }
  0xca   :  { %5092 = vmatprep.subr.bf16.mxu1 %v5587_v46 }
  0xcb   :  { %5071 = vmatpush3.bf16.msra.mxu0 %v5586_v45  ;;  %v5637_v45 = vld [vmem:[%s7093_s1 + $0x770] sm:$0xff]  }
  0xcc   :  { %5072 = vmatprep.subr.bf16.mxu0 %v5589_v48  ;;  %v5638_v48 = vld [vmem:[%s7093_s1 + $0x730] sm:$0xff]  }
  0xcd   :  { %5093 = vmatpush3.bf16.msra.mxu1 %v5588_v47 }
  0xce   :  { %5094 = vmatprep.subr.bf16.mxu1 %v5591_v50  ;;  %v5640_v50 = vld [vmem:[%s7093_s1 + $0x7b0] sm:$0xff]  }
  0xcf   :  { %5073 = vmatpush3.bf16.msra.mxu0 %v5590_v49  ;;  %v5639_v49 = vld [vmem:[%s7093_s1 + $0x7f0] sm:$0xff]  }
  0xd0   :  { %5074 = vmatprep.subr.bf16.mxu0 %v5593_v52  ;;  %v5642_v52 = vld [vmem:[%s7093_s1 + $0x738] sm:$0xff]  }
  0xd1   :  { %5095 = vmatpush3.bf16.msra.mxu1 %v5592_v51  ;;  %v5641_v51 = vld [vmem:[%s7093_s1 + $0x778] sm:$0xff]  }
  0xd2   :  { %5096 = vmatprep.subr.bf16.mxu1 %v5595_v54  ;;  %v29_v54 = vld [vmem:[%s7094_s0 + $0x70] sm:$0xff] }
  0xd3   :  { %5075 = vmatpush3.bf16.msra.mxu0 %v5594_v53  ;;  %v5643_v53 = vld [vmem:[%s7093_s1 + $0x7f8] sm:$0xff]  }
  0xd4   :  { %5076 = vmatprep.subr.bf16.mxu0 %v5597_v56  ;;  %v4390_v56 = vcombine.high %v29_v54, %v29_v54 }
  0xd5   :  { %5097 = vmatpush3.bf16.msra.mxu1 %v5596_v55  ;;  %v4389_v55 = vcombine.low %v29_v54, %v29_v54  ;;  %v5692_v54 = vld [vmem:[%s7093_s1 + $0x988] sm:$0xff]  }
  0xd6   :  { %5098 = vmatprep.subr.bf16.mxu1 %v5599_v58  ;;  %v5647_v58 = vld [vmem:[%s7093_s1 + $0x840] sm:$0xff]  }
  0xd7   :  { %5077 = vmatpush3.bf16.msra.mxu0 %v5598_v57  ;;  %v5646_v57 = vld [vmem:[%s7093_s1 + $0x7b8] sm:$0xff]  }
  0xd8   :  { %5078 = vmatprep.subr.bf16.mxu0 %v5601_v60 }
  0xd9   :  { %5099 = vmatpush3.bf16.msra.mxu1 %v5600_v59  ;;  %v30_v59 = vld [vmem:[%s7094_s0 + $0x78] sm:$0xff] }
  0xda   :  { %5100 = vmatprep.subr.bf16.mxu1 %v5603_v62  ;;  %v4391_v60 = vcombine.low %v30_v59, %v30_v59  ;;  %v5650_v62 = vld [vmem:[%s7093_s1 + $0x800] sm:$0xff]  }
  0xdb   :  { %5079 = vmatpush3.bf16.msra.mxu0 %v5602_v61  ;;  %v4392_v61 = vcombine.high %v30_v59, %v30_v59  ;;  %v5697_v59 = vld [vmem:[%s7093_s1 + $0x958] sm:$0xff]  }
  0xdc   :  { %5080 = vmatprep.subr.bf16.mxu0 %v5605_v0  ;;  %v5652_v0 = vld [vmem:[%s7093_s1 + $0x880] sm:$0xff]  }
  0xdd   :  { %5101 = vmatpush3.bf16.msra.mxu1 %v5604_v63  ;;  %v5651_v63 = vld [vmem:[%s7093_s1 + $0x8c0] sm:$0xff]  }
  0xde   :  { %5102 = vmatprep.subr.bf16.mxu1 %v5607_v2  ;;  %v5654_v2 = vld [vmem:[%s7093_s1 + $0x808] sm:$0xff]  }
  0xdf   :  { %5081 = vmatpush3.bf16.msra.mxu0 %v5606_v1  ;;  %v5653_v1 = vld [vmem:[%s7093_s1 + $0x848] sm:$0xff]  }
  0xe0   :  { %5110 = vmatprep.subr.bf16.mxu0 %v5611_v7  ;;  %v5659_v7 = vld [vmem:[%s7093_s1 + $0x8d0] sm:$0xff]  }
  0xe1   :  { %5103 = vmatpush3.bf16.msra.mxu1 %v5610_v6  ;;  %v5658_v6 = vld [vmem:[%s7093_s1 + $0x810] sm:$0xff]  }
  0xe2   :  { %3868 = vmatmul.mubr.bf16.vlgmr.msra.gmra.mrb[24].mxu0 %v4385_v4  ;;  %5132 = vmatprep.subr.bf16.mxu1 %v5615_v12  ;;  %v5656_v4 = vld [vmem:[%s7093_s1 + $0x888] sm:$0xff]   ;;  %v5664_v12 = vld [vmem:[%s7093_s1 + $0x898] sm:$0xff]  }
  0xe3   :  { %5111 = vmatpush3.bf16.msra.mxu0 %v5614_v11  ;;  %3947 = vmatprep.mubr.bf16.mxu0 %v4390_v56  ;;  %v5663_v11 = vld [vmem:[%s7093_s1 + $0x8d8] sm:$0xff]   ;;  %v5694_v56 = vld [vmem:[%s7093_s1 + $0x910] sm:$0xff]  }
  0xe4   :  { %3908 = vmatmul.mubr.bf16.vlgmr.msra.gmra.mrb[24].mxu1 %v4387_v9  ;;  %5112 = vmatprep.subr.bf16.mxu0 %v5617_v14  ;;  %v5661_v9 = vld [vmem:[%s7093_s1 + $0x858] sm:$0xff]  }
  0xe5   :  { %5133 = vmatpush3.bf16.msra.mxu1 %v5616_v13  ;;  %3987 = vmatprep.mubr.bf16.mxu1 %v4392_v61  ;;  %v5665_v13 = vld [vmem:[%s7093_s1 + $0x860] sm:$0xff]   ;;  %v5699_v61 = vld [vmem:[%s7093_s1 + $0x9d8] sm:$0xff]  }
  0xe6   :  { %5134 = vmatprep.subr.bf16.mxu1 %v5619_v16 }
  0xe7   :  { %5113 = vmatpush3.bf16.msra.mxu0 %v5618_v15  ;;  %v5666_v15 = vld [vmem:[%s7093_s1 + $0x820] sm:$0xff]  }
  0xe8   :  { %5114 = vmatprep.subr.bf16.mxu0 %v5621_v18 }
  0xe9   :  { %5135 = vmatpush3.bf16.msra.mxu1 %v5620_v17  ;;  %v5667_v17 = vld [vmem:[%s7093_s1 + $0x8e0] sm:$0xff]  }
  0xea   :  { %5136 = vmatprep.subr.bf16.mxu1 %v5623_v20  ;;  %v5668_v20 = vld [vmem:[%s7093_s1 + $0x8a0] sm:$0xff]  }
  0xeb   :  { %5115 = vmatpush3.bf16.msra.mxu0 %v5622_v19 }
  0xec   :  { %5116 = vmatprep.subr.bf16.mxu0 %v5625_v22 }
  0xed   :  { %5137 = vmatpush3.bf16.msra.mxu1 %v5624_v21 }
  0xee   :  { %5138 = vmatprep.subr.bf16.mxu1 %v5627_v24 }
  0xef   :  { %5117 = vmatpush3.bf16.msra.mxu0 %v5626_v23  ;;  %v5669_v23 = vld [vmem:[%s7093_s1 + $0x868] sm:$0xff]  }
  0xf0   :  { %5118 = vmatprep.subr.bf16.mxu0 %v5629_v26 }
  0xf1   :  { %5139 = vmatpush3.bf16.msra.mxu1 %v5628_v25  ;;  %v5670_v25 = vld [vmem:[%s7093_s1 + $0x828] sm:$0xff]  }
  0xf2   :  { %5140 = vmatprep.subr.bf16.mxu1 %v5631_v29 }
  0xf3   :  { %5119 = vmatpush3.bf16.msra.mxu0 %v5630_v27 }
  0xf4   :  { %5120 = vmatprep.subr.bf16.mxu0 %v5633_v35  ;;  %v5675_v35 = vld [vmem:[%s7093_s1 + $0x8f0] sm:$0xff]  }
  0xf5   :  { %v4818_v28 = vpop.f32.mrb[0].mxu0  ;;  %5141 = vmatpush3.bf16.msra.mxu1 %v5632_v31 }
  0xf6   :  { %v4819_v30 = vpop.f32.mrb[1].mxu0  ;;  %5142 = vmatprep.subr.bf16.mxu1 %v5635_v41 }
  0xf7   :  { %v4820_v33 = vadd.f32 %v4819_v30, %v4818_v28  ;;  %v4821_v34 = vpop.f32.mrb[2].mxu0  ;;  %v4840_v36 = vpop.f32.mrb[0].mxu1  ;;  %5121 = vmatpush3.bf16.msra.mxu0 %v5634_v38  ;;  %v5671_v28 = vld [vmem:[%s7093_s1 + $0x8e8] sm:$0xff]   ;;  %v5678_v38 = vld [vmem:[%s7093_s1 + $0x838] sm:$0xff]  }
  0xf8   :  { %v4822_v39 = vpop.f32.mrb[3].mxu0  ;;  %v4841_v40 = vpop.f32.mrb[1].mxu1  ;;  %5122 = vmatprep.subr.bf16.mxu0 %v5637_v45  ;;  %v5672_v30 = vld [vmem:[%s7093_s1 + $0x8a8] sm:$0xff]   ;;  %v5674_v34 = vld [vmem:[%s7093_s1 + $0x830] sm:$0xff]  }
  0xf9   :  { %v3390_v37 = vadd.f32 %v4820_v33, %v4360_v32  ;;  %v4842_v42 = vadd.f32 %v4841_v40, %v4840_v36  ;;  %v4843_v44 = vpop.f32.mrb[2].mxu1  ;;  %5143 = vmatpush3.bf16.msra.mxu1 %v5636_v43  ;;  %v5673_v33 = vld [vmem:[%s7093_s1 + $0x870] sm:$0xff]   ;;  %v5679_v39 = vld [vmem:[%s7093_s1 + $0x8f8] sm:$0xff]   ;;  %v31_v40 = vld [vmem:[%s7094_s0 + $0x80] sm:$0xff] }
  0xfa   :  { %v4844_v46 = vpop.f32.mrb[3].mxu1  ;;  %5144 = vmatprep.subr.bf16.mxu1 %v5639_v49  ;;  %v5676_v36 = vld [vmem:[%s7093_s1 + $0x8b0] sm:$0xff]   ;;  %v4393_v41 = vcombine.low %v31_v40, %v31_v40  ;;  %v5682_v43 = vld [vmem:[%s7093_s1 + $0x8b8] sm:$0xff]   ;;  %v5683_v44 = vld [vmem:[%s7093_s1 + $0x940] sm:$0xff]  }
  0xfb   :  { %v6616_v47 = vadd.f32 %v4842_v42, %v3390_v37  ;;  %5123 = vmatpush3.bf16.msra.mxu0 %v5638_v48  ;;  %v5677_v37 = vld [vmem:[%s7093_s1 + $0x878] sm:$0xff]   ;;  %v4394_v42 = vcombine.high %v31_v40, %v31_v40  ;;  %v32_v45 = vld [vmem:[%s7094_s0 + $0x88] sm:$0xff]  ;;  %v5686_v48 = vld [vmem:[%s7093_s1 + $0x900] sm:$0xff]  }
  0xfc   :  { %5124 = vmatprep.subr.bf16.mxu0 %v5641_v51  ;;  %v4395_v46 = vcombine.low %v32_v45, %v32_v45  ;;  %v5687_v49 = vld [vmem:[%s7093_s1 + $0x9c0] sm:$0xff]   ;;  %v5689_v51 = vld [vmem:[%s7093_s1 + $0x948] sm:$0xff]  }
  0xfd   :  { %5145 = vmatpush3.bf16.msra.mxu1 %v5640_v50  ;;  %v5688_v50 = vld [vmem:[%s7093_s1 + $0x980] sm:$0xff]   ;;  %v5728_v40 = vld [vmem:[%s7093_s1 + $0xa88] sm:$0xff]  }
  0xfe   :  { %5146 = vmatprep.subr.bf16.mxu1 %v5643_v53  ;;  %v5691_v53 = vld [vmem:[%s7093_s1 + $0x9c8] sm:$0xff]  }
  0xff   :  { %5125 = vmatpush3.bf16.msra.mxu0 %v5642_v52  ;;  %v5690_v52 = vld [vmem:[%s7093_s1 + $0x908] sm:$0xff]  }
 0x100   :  { %5154 = vmatprep.subr.bf16.mxu0 %v5647_v58  ;;  %v5696_v58 = vld [vmem:[%s7093_s1 + $0x990] sm:$0xff]  }
 0x101   :  { %5147 = vmatpush3.bf16.msra.mxu1 %v5646_v57  ;;  %v5695_v57 = vld [vmem:[%s7093_s1 + $0x9d0] sm:$0xff]  }
 0x102   :  { %3948 = vmatmul.mubr.bf16.vlgmr.msra.gmra.mrb[28].mxu0 %v4389_v55  ;;  %5176 = vmatprep.subr.bf16.mxu1 %v5651_v63  ;;  %v5693_v55 = vld [vmem:[%s7093_s1 + $0x950] sm:$0xff]   ;;  %v5701_v63 = vld [vmem:[%s7093_s1 + $0x960] sm:$0xff]  }
 0x103   :  { %5155 = vmatpush3.bf16.msra.mxu0 %v5650_v62  ;;  %4027 = vmatprep.mubr.bf16.mxu0 %v4394_v42  ;;  %v5700_v62 = vld [vmem:[%s7093_s1 + $0x998] sm:$0xff]   ;;  %v5730_v42 = vld [vmem:[%s7093_s1 + $0xa10] sm:$0xff]  }
 0x104   :  { %3988 = vmatmul.mubr.bf16.vlgmr.msra.gmra.mrb[28].mxu1 %v4391_v60  ;;  %5156 = vmatprep.subr.bf16.mxu0 %v5653_v1  ;;  %v5698_v60 = vld [vmem:[%s7093_s1 + $0x918] sm:$0xff]   ;;  %v5702_v1 = vld [vmem:[%s7093_s1 + $0x920] sm:$0xff]  }
 0x105   :  { %5177 = vmatpush3.bf16.msra.mxu1 %v5652_v0 }
 0x106   :  { %5178 = vmatprep.subr.bf16.mxu1 %v5655_v3  ;;  %v5703_v3 = vld [vmem:[%s7093_s1 + $0x9e0] sm:$0xff]  }
 0x107   :  { %5157 = vmatpush3.bf16.msra.mxu0 %v5654_v2 }
 0x108   :  { %5158 = vmatprep.subr.bf16.mxu0 %v5657_v5 }
 0x109   :  { %5179 = vmatpush3.bf16.msra.mxu1 %v5656_v4 }
 0x10a   :  { %5180 = vmatprep.subr.bf16.mxu1 %v5659_v7 }
 0x10b   :  { %5159 = vmatpush3.bf16.msra.mxu0 %v5658_v6  ;;  %v5704_v6 = vld [vmem:[%s7093_s1 + $0x9a0] sm:$0xff]  }
 0x10c   :  { %5160 = vmatprep.subr.bf16.mxu0 %v5661_v9  ;;  %v5705_v9 = vld [vmem:[%s7093_s1 + $0x968] sm:$0xff]  }
 0x10d   :  { %5181 = vmatpush3.bf16.msra.mxu1 %v5660_v8 }
 0x10e   :  { %5182 = vmatprep.subr.bf16.mxu1 %v5663_v11  ;;  %v5706_v11 = vld [vmem:[%s7093_s1 + $0x928] sm:$0xff]  }
 0x10f   :  { %5161 = vmatpush3.bf16.msra.mxu0 %v5662_v10 }
 0x110   :  { %5162 = vmatprep.subr.bf16.mxu0 %v5665_v13 }
 0x111   :  { %5183 = vmatpush3.bf16.msra.mxu1 %v5664_v12 }
 0x112   :  { %5184 = vmatprep.subr.bf16.mxu1 %v5667_v17 }
 0x113   :  { %5163 = vmatpush3.bf16.msra.mxu0 %v5666_v15 }
 0x114   :  { %5164 = vmatprep.subr.bf16.mxu0 %v5669_v23  ;;  %v5713_v23 = vld [vmem:[%s7093_s1 + $0x978] sm:$0xff]  }
 0x115   :  { %v4862_v14 = vpop.f32.mrb[4].mxu0  ;;  %5185 = vmatpush3.bf16.msra.mxu1 %v5668_v20  ;;  %v5710_v20 = vld [vmem:[%s7093_s1 + $0x930] sm:$0xff]  }
 0x116   :  { %v4863_v16 = vpop.f32.mrb[5].mxu0  ;;  %5186 = vmatprep.subr.bf16.mxu1 %v5671_v28 }
 0x117   :  { %v4864_v18 = vadd.f32 %v4863_v16, %v4862_v14  ;;  %v4865_v19 = vpop.f32.mrb[6].mxu0  ;;  %v4884_v21 = vpop.f32.mrb[4].mxu1  ;;  %5165 = vmatpush3.bf16.msra.mxu0 %v5670_v25  ;;  %v5707_v14 = vld [vmem:[%s7093_s1 + $0x9e8] sm:$0xff]   ;;  %v5715_v25 = vld [vmem:[%s7093_s1 + $0x9f8] sm:$0xff]  }
 0x118   :  { %v4866_v24 = vpop.f32.mrb[7].mxu0  ;;  %v4885_v26 = vpop.f32.mrb[5].mxu1  ;;  %5166 = vmatprep.subr.bf16.mxu0 %v5673_v33  ;;  %v5708_v16 = vld [vmem:[%s7093_s1 + $0x9a8] sm:$0xff]   ;;  %v5709_v19 = vld [vmem:[%s7093_s1 + $0x970] sm:$0xff]  }
 0x119   :  { %v3470_v22 = vadd.f32 %v4864_v18, %v6616_v47  ;;  %v4886_v27 = vadd.f32 %v4885_v26, %v4884_v21  ;;  %v4887_v29 = vpop.f32.mrb[6].mxu1  ;;  %5187 = vmatpush3.bf16.msra.mxu1 %v5672_v30  ;;  %v4396_v47 = vcombine.high %v32_v45, %v32_v45  ;;  %v5711_v21 = vld [vmem:[%s7093_s1 + $0x9f0] sm:$0xff]   ;;  %v5714_v24 = vld [vmem:[%s7093_s1 + $0x938] sm:$0xff]   ;;  %v5719_v30 = vld [vmem:[%s7093_s1 + $0xa40] sm:$0xff]  }
 0x11a   :  { %v4888_v31 = vpop.f32.mrb[7].mxu1  ;;  %5188 = vmatprep.subr.bf16.mxu1 %v5675_v35  ;;  %v33_v26 = vld [vmem:[%s7094_s0 + $0x90] sm:$0xff]  ;;  %v5718_v29 = vld [vmem:[%s7093_s1 + $0x9b8] sm:$0xff]   ;;  %v5723_v35 = vld [vmem:[%s7093_s1 + $0xac0] sm:$0xff]  }
 0x11b   :  { %v6718_v32 = vadd.f32 %v4886_v27, %v3470_v22  ;;  %5167 = vmatpush3.bf16.msra.mxu0 %v5674_v34  ;;  %4067 = vmatprep.mubr.bf16.mxu1 %v4396_v47  ;;  %v5712_v22 = vld [vmem:[%s7093_s1 + $0x9b0] sm:$0xff]   ;;  %v4397_v27 = vcombine.low %v33_v26, %v33_v26  ;;  %v4398_v28 = vcombine.high %v33_v26, %v33_v26  ;;  %v34_v31 = vld [vmem:[%s7094_s0 + $0x98] sm:$0xff]  ;;  %v5722_v34 = vld [vmem:[%s7093_s1 + $0xa00] sm:$0xff]  }
 0x11c   :  { %5168 = vmatprep.subr.bf16.mxu0 %v5677_v37  ;;  %v4400_v33 = vcombine.high %v34_v31, %v34_v31  ;;  %v5725_v37 = vld [vmem:[%s7093_s1 + $0xa48] sm:$0xff]   ;;  %v5733_v45 = vld [vmem:[%s7093_s1 + $0xa58] sm:$0xff]  }
 0x11d   :  { %5189 = vmatpush3.bf16.msra.mxu1 %v5676_v36  ;;  %v5724_v36 = vld [vmem:[%s7093_s1 + $0xa80] sm:$0xff]   ;;  %v5735_v47 = vld [vmem:[%s7093_s1 + $0xad8] sm:$0xff]   ;;  %v5764_v26 = vld [vmem:[%s7093_s1 + $0xb88] sm:$0xff]  }
 0x11e   :  { %5190 = vmatprep.subr.bf16.mxu1 %v5679_v39  ;;  %v5727_v39 = vld [vmem:[%s7093_s1 + $0xac8] sm:$0xff]  }
 0x11f   :  { %5169 = vmatpush3.bf16.msra.mxu0 %v5678_v38  ;;  %v5726_v38 = vld [vmem:[%s7093_s1 + $0xa08] sm:$0xff]  }
 0x120   :  { %5198 = vmatprep.subr.bf16.mxu0 %v5683_v44  ;;  %v5732_v44 = vld [vmem:[%s7093_s1 + $0xa90] sm:$0xff]  }
 0x121   :  { %5191 = vmatpush3.bf16.msra.mxu1 %v5682_v43  ;;  %v5731_v43 = vld [vmem:[%s7093_s1 + $0xad0] sm:$0xff]  }
 0x122   :  { %4028 = vmatmul.mubr.bf16.vlgmr.msra.gmra.mrb[32].mxu0 %v4393_v41  ;;  %5220 = vmatprep.subr.bf16.mxu1 %v5687_v49  ;;  %v5729_v41 = vld [vmem:[%s7093_s1 + $0xa50] sm:$0xff]   ;;  %v5737_v49 = vld [vmem:[%s7093_s1 + $0xa60] sm:$0xff]  }
 0x123   :  { %5199 = vmatpush3.bf16.msra.mxu0 %v5686_v48  ;;  %4107 = vmatprep.mubr.bf16.mxu0 %v4398_v28  ;;  %v5736_v48 = vld [vmem:[%s7093_s1 + $0xa98] sm:$0xff]   ;;  %v5766_v28 = vld [vmem:[%s7093_s1 + $0xb10] sm:$0xff]  }
 0x124   :  { %4068 = vmatmul.mubr.bf16.vlgmr.msra.gmra.mrb[32].mxu1 %v4395_v46  ;;  %5200 = vmatprep.subr.bf16.mxu0 %v5689_v51  ;;  %v5734_v46 = vld [vmem:[%s7093_s1 + $0xa18] sm:$0xff]  }
 0x125   :  { %5221 = vmatpush3.bf16.msra.mxu1 %v5688_v50  ;;  %4147 = vmatprep.mubr.bf16.mxu1 %v4400_v33  ;;  %v5738_v50 = vld [vmem:[%s7093_s1 + $0xa20] sm:$0xff]   ;;  %v5771_v33 = vld [vmem:[%s7093_s1 + $0xbd8] sm:$0xff]  }
 0x126   :  { %5222 = vmatprep.subr.bf16.mxu1 %v5691_v53 }
 0x127   :  { %5201 = vmatpush3.bf16.msra.mxu0 %v5690_v52  ;;  %v5739_v52 = vld [vmem:[%s7093_s1 + $0xae0] sm:$0xff]  }
 0x128   :  { %5202 = vmatprep.subr.bf16.mxu0 %v5693_v55 }
 0x129   :  { %5223 = vmatpush3.bf16.msra.mxu1 %v5692_v54  ;;  %v5740_v54 = vld [vmem:[%s7093_s1 + $0xaa0] sm:$0xff]  }
 0x12a   :  { %5224 = vmatprep.subr.bf16.mxu1 %v5695_v57  ;;  %v5741_v57 = vld [vmem:[%s7093_s1 + $0xa68] sm:$0xff]  }
 0x12b   :  { %5203 = vmatpush3.bf16.msra.mxu0 %v5694_v56 }
 0x12c   :  { %5204 = vmatprep.subr.bf16.mxu0 %v5697_v59 }
 0x12d   :  { %5225 = vmatpush3.bf16.msra.mxu1 %v5696_v58 }
 0x12e   :  { %5226 = vmatprep.subr.bf16.mxu1 %v5699_v61 }
 0x12f   :  { %5205 = vmatpush3.bf16.msra.mxu0 %v5698_v60  ;;  %v5742_v60 = vld [vmem:[%s7093_s1 + $0xa28] sm:$0xff]  }
 0x130   :  { %5206 = vmatprep.subr.bf16.mxu0 %v5701_v63  ;;  %v5743_v63 = vld [vmem:[%s7093_s1 + $0xae8] sm:$0xff]  }
 0x131   :  { %5227 = vmatpush3.bf16.msra.mxu1 %v5700_v62 }
 0x132   :  { %5228 = vmatprep.subr.bf16.mxu1 %v5703_v3  ;;  %v5745_v3 = vld [vmem:[%s7093_s1 + $0xa70] sm:$0xff]  }
 0x133   :  { %5207 = vmatpush3.bf16.msra.mxu0 %v5702_v1  ;;  %v5744_v1 = vld [vmem:[%s7093_s1 + $0xaa8] sm:$0xff]  }
 0x134   :  { %5208 = vmatprep.subr.bf16.mxu0 %v5705_v9  ;;  %v5749_v9 = vld [vmem:[%s7093_s1 + $0xa78] sm:$0xff]  }
 0x135   :  { %v4906_v0 = vpop.f32.mrb[8].mxu0  ;;  %5229 = vmatpush3.bf16.msra.mxu1 %v5704_v6  ;;  %v5746_v6 = vld [vmem:[%s7093_s1 + $0xa30] sm:$0xff]  }
 0x136   :  { %v4907_v2 = vpop.f32.mrb[9].mxu0  ;;  %5230 = vmatprep.subr.bf16.mxu1 %v5707_v14 }
 0x137   :  { %v4908_v4 = vadd.f32 %v4907_v2, %v4906_v0  ;;  %v4909_v5 = vpop.f32.mrb[10].mxu0  ;;  %v4928_v7 = vpop.f32.mrb[8].mxu1  ;;  %5209 = vmatpush3.bf16.msra.mxu0 %v5706_v11  ;;  %v5751_v11 = vld [vmem:[%s7093_s1 + $0xaf8] sm:$0xff]  }
 0x138   :  { %v4910_v10 = vpop.f32.mrb[11].mxu0  ;;  %v4929_v12 = vpop.f32.mrb[9].mxu1  ;;  %5210 = vmatprep.subr.bf16.mxu0 %v5709_v19 }
 0x139   :  { %v3550_v8 = vadd.f32 %v4908_v4, %v6718_v32  ;;  %v4930_v13 = vadd.f32 %v4929_v12, %v4928_v7  ;;  %v4931_v15 = vpop.f32.mrb[10].mxu1  ;;  %5231 = vmatpush3.bf16.msra.mxu1 %v5708_v16  ;;  %v4399_v32 = vcombine.low %v34_v31, %v34_v31  ;;  %v5747_v7 = vld [vmem:[%s7093_s1 + $0xaf0] sm:$0xff]   ;;  %v5750_v10 = vld [vmem:[%s7093_s1 + $0xa38] sm:$0xff]   ;;  %v35_v12 = vld [vmem:[%s7094_s0 + $0xa0] sm:$0xff] }
 0x13a   :  { %v4932_v17 = vpop.f32.mrb[11].mxu1  ;;  %5232 = vmatprep.subr.bf16.mxu1 %v5711_v21  ;;  %v4402_v14 = vcombine.high %v35_v12, %v35_v12  ;;  %v5754_v15 = vld [vmem:[%s7093_s1 + $0xab8] sm:$0xff]   ;;  %v5755_v16 = vld [vmem:[%s7093_s1 + $0xb40] sm:$0xff]  }
 0x13b   :  { %v6823_v18 = vadd.f32 %v4930_v13, %v3550_v8  ;;  %5211 = vmatpush3.bf16.msra.mxu0 %v5710_v20  ;;  %v5748_v8 = vld [vmem:[%s7093_s1 + $0xab0] sm:$0xff]   ;;  %v4401_v13 = vcombine.low %v35_v12, %v35_v12  ;;  %v36_v17 = vld [vmem:[%s7094_s0 + $0xa8] sm:$0xff]  ;;  %v5758_v20 = vld [vmem:[%s7093_s1 + $0xb00] sm:$0xff]  }
 0x13c   :  { %5212 = vmatprep.subr.bf16.mxu0 %v5713_v23  ;;  %v4404_v19 = vcombine.high %v36_v17, %v36_v17  ;;  %v5759_v21 = vld [vmem:[%s7093_s1 + $0xbc0] sm:$0xff]   ;;  %v5761_v23 = vld [vmem:[%s7093_s1 + $0xb48] sm:$0xff]   ;;  %v5769_v31 = vld [vmem:[%s7093_s1 + $0xb58] sm:$0xff]  }
 0x13d   :  { %5233 = vmatpush3.bf16.msra.mxu1 %v5712_v22  ;;  %v5760_v22 = vld [vmem:[%s7093_s1 + $0xb80] sm:$0xff]  }
 0x13e   :  { %5234 = vmatprep.subr.bf16.mxu1 %v5715_v25  ;;  %v5763_v25 = vld [vmem:[%s7093_s1 + $0xbc8] sm:$0xff]  }
 0x13f   :  { %5213 = vmatpush3.bf16.msra.mxu0 %v5714_v24  ;;  %v5762_v24 = vld [vmem:[%s7093_s1 + $0xb08] sm:$0xff]  }
 0x140   :  { %5242 = vmatprep.subr.bf16.mxu0 %v5719_v30  ;;  %v5768_v30 = vld [vmem:[%s7093_s1 + $0xb90] sm:$0xff]  }
 0x141   :  { %5235 = vmatpush3.bf16.msra.mxu1 %v5718_v29  ;;  %v5767_v29 = vld [vmem:[%s7093_s1 + $0xbd0] sm:$0xff]  }
 0x142   :  { %4108 = vmatmul.mubr.bf16.vlgmr.msra.gmra.mrb[36].mxu0 %v4397_v27  ;;  %5264 = vmatprep.subr.bf16.mxu1 %v5723_v35  ;;  %v5765_v27 = vld [vmem:[%s7093_s1 + $0xb50] sm:$0xff]   ;;  %v5773_v35 = vld [vmem:[%s7093_s1 + $0xb60] sm:$0xff]  }
 0x143   :  { %5243 = vmatpush3.bf16.msra.mxu0 %v5722_v34  ;;  %4187 = vmatprep.mubr.bf16.mxu0 %v4402_v14  ;;  %v5772_v34 = vld [vmem:[%s7093_s1 + $0xb98] sm:$0xff]  }
 0x144   :  { %4148 = vmatmul.mubr.bf16.vlgmr.msra.gmra.mrb[36].mxu1 %v4399_v32  ;;  %5244 = vmatprep.subr.bf16.mxu0 %v5725_v37  ;;  %v5770_v32 = vld [vmem:[%s7093_s1 + $0xb18] sm:$0xff]   ;;  %v5774_v37 = vld [vmem:[%s7093_s1 + $0xb20] sm:$0xff]  }
 0x145   :  { %5265 = vmatpush3.bf16.msra.mxu1 %v5724_v36  ;;  %4227 = vmatprep.mubr.bf16.mxu1 %v4404_v19 }
 0x146   :  { %5266 = vmatprep.subr.bf16.mxu1 %v5727_v39  ;;  %v5775_v39 = vld [vmem:[%s7093_s1 + $0xbe0] sm:$0xff]  }
 0x147   :  { %5245 = vmatpush3.bf16.msra.mxu0 %v5726_v38 }
 0x148   :  { %5246 = vmatprep.subr.bf16.mxu0 %v5729_v41 }
 0x149   :  { %5267 = vmatpush3.bf16.msra.mxu1 %v5728_v40 }
 0x14a   :  { %5268 = vmatprep.subr.bf16.mxu1 %v5731_v43 }
 0x14b   :  { %5247 = vmatpush3.bf16.msra.mxu0 %v5730_v42  ;;  %v5776_v42 = vld [vmem:[%s7093_s1 + $0xba0] sm:$0xff]  }
 0x14c   :  { %5248 = vmatprep.subr.bf16.mxu0 %v5733_v45  ;;  %v5777_v45 = vld [vmem:[%s7093_s1 + $0xb68] sm:$0xff]  }
 0x14d   :  { %5269 = vmatpush3.bf16.msra.mxu1 %v5732_v44 }
 0x14e   :  { %5270 = vmatprep.subr.bf16.mxu1 %v5735_v47  ;;  %v5778_v47 = vld [vmem:[%s7093_s1 + $0xb28] sm:$0xff]  }
 0x14f   :  { %5249 = vmatpush3.bf16.msra.mxu0 %v5734_v46 }
 0x150   :  { %5250 = vmatprep.subr.bf16.mxu0 %v5737_v49 }
 0x151   :  { %5271 = vmatpush3.bf16.msra.mxu1 %v5736_v48 }
 0x152   :  { %5272 = vmatprep.subr.bf16.mxu1 %v5739_v52  ;;  %v5780_v52 = vld [vmem:[%s7093_s1 + $0xba8] sm:$0xff]  }
 0x153   :  { %5251 = vmatpush3.bf16.msra.mxu0 %v5738_v50  ;;  %v5779_v50 = vld [vmem:[%s7093_s1 + $0xbe8] sm:$0xff]  }
 0x154   :  { %5252 = vmatprep.subr.bf16.mxu0 %v5741_v57  ;;  %v5783_v57 = vld [vmem:[%s7093_s1 + $0xbf0] sm:$0xff]  }
 0x155   :  { %v4950_v51 = vpop.f32.mrb[12].mxu0  ;;  %5273 = vmatpush3.bf16.msra.mxu1 %v5740_v54 }
 0x156   :  { %v4951_v53 = vpop.f32.mrb[13].mxu0  ;;  %5274 = vmatprep.subr.bf16.mxu1 %v5743_v63 }
 0x157   :  { %v4952_v55 = vadd.f32 %v4951_v53, %v4950_v51  ;;  %v4953_v56 = vpop.f32.mrb[14].mxu0  ;;  %v4972_v58 = vpop.f32.mrb[12].mxu1  ;;  %5253 = vmatpush3.bf16.msra.mxu0 %v5742_v60  ;;  %v5786_v60 = vld [vmem:[%s7093_s1 + $0xb38] sm:$0xff]  }
 0x158   :  { %v4954_v61 = vpop.f32.mrb[15].mxu0  ;;  %v4973_v62 = vpop.f32.mrb[13].mxu1  ;;  %5254 = vmatprep.subr.bf16.mxu0 %v5745_v3  ;;  %v5782_v56 = vld [vmem:[%s7093_s1 + $0xb30] sm:$0xff]   ;;  %v38_v3 = vld [vmem:[%s7094_s0 + $0xb8] sm:$0xff] }
 0x159   :  { %v3630_v59 = vadd.f32 %v4952_v55, %v6823_v18  ;;  %v4974_v0 = vadd.f32 %v4973_v62, %v4972_v58  ;;  %v4975_v2 = vpop.f32.mrb[14].mxu1  ;;  %5275 = vmatpush3.bf16.msra.mxu1 %v5744_v1  ;;  %v4403_v18 = vcombine.low %v36_v17, %v36_v17  ;;  %v5781_v55 = vld [vmem:[%s7093_s1 + $0xb70] sm:$0xff]   ;;  %v5787_v61 = vld [vmem:[%s7093_s1 + $0xbf8] sm:$0xff]  }
 0x15a   :  { %v4976_v4 = vpop.f32.mrb[15].mxu1  ;;  %5276 = vmatprep.subr.bf16.mxu1 %v5747_v7  ;;  %v5784_v58 = vld [vmem:[%s7093_s1 + $0xbb0] sm:$0xff]   ;;  %v5790_v1 = vld [vmem:[%s7093_s1 + $0xbb8] sm:$0xff]   ;;  %v5802_v2 = vmov 0.0   ;;  %v5794_v7 = vld [vmem:[%s7093_s1 + $0xc08] sm:$0xff]  }
 0x15b   :  { %v6931_v5 = vadd.f32 %v4974_v0, %v3630_v59  ;;  %5255 = vmatpush3.bf16.msra.mxu0 %v5746_v6  ;;  %v5785_v59 = vld [vmem:[%s7093_s1 + $0xb78] sm:$0xff]   ;;  %v37_v62 = vld [vmem:[%s7094_s0 + $0xb0] sm:$0xff]  ;;  %v4407_v4 = vcombine.low %v38_v3, %v38_v3  ;;  %v5793_v6 = vld [vmem:[%s7093_s1 + $0xc00] sm:$0xff]  }
 0x15c   :  { %5256 = vmatprep.subr.bf16.mxu0 %v5749_v9  ;;  %v4405_v63 = vcombine.low %v37_v62, %v37_v62  ;;  %v4406_v0 = vcombine.high %v37_v62, %v37_v62  ;;  %v5796_v9 = vld [vmem:[%s7093_s1 + $0xc18] sm:$0xff]  }
 0x15d   :  { %5277 = vmatpush3.bf16.msra.mxu1 %v5748_v8  ;;  %v5795_v8 = vld [vmem:[%s7093_s1 + $0xc10] sm:$0xff]  }
 0x15e   :  { %5278 = vmatprep.subr.bf16.mxu1 %v5751_v11 }
 0x15f   :  { %5257 = vmatpush3.bf16.msra.mxu0 %v5750_v10  ;;  %v5797_v10 = vld [vmem:[%s7093_s1 + $0xc20] sm:$0xff]  }
 0x160   :  { %5286 = vmatprep.subr.bf16.mxu0 %v5755_v16  ;;  %v5798_v16 = vld [vmem:[%s7093_s1 + $0xc28] sm:$0xff]  }
 0x161   :  { %5279 = vmatpush3.bf16.msra.mxu1 %v5754_v15 }
 0x162   :  { %4188 = vmatmul.mubr.bf16.vlgmr.msra.gmra.mrb[40].mxu0 %v4401_v13  ;;  %5308 = vmatprep.subr.bf16.mxu1 %v5759_v21 }
 0x163   :  { %5287 = vmatpush3.bf16.msra.mxu0 %v5758_v20  ;;  %4267 = vmatprep.mubr.bf16.mxu0 %v4406_v0 }
 0x164   :  { %4228 = vmatmul.mubr.bf16.vlgmr.msra.gmra.mrb[40].mxu1 %v4403_v18  ;;  %5288 = vmatprep.subr.bf16.mxu0 %v5761_v23 }
 0x165   :  { %5309 = vmatpush3.bf16.msra.mxu1 %v5760_v22 }
 0x166   :  { %5310 = vmatprep.subr.bf16.mxu1 %v5763_v25  ;;  %v5800_v25 = vld [vmem:[%s7093_s1 + $0xc38] sm:$0xff]  }
 0x167   :  { %5289 = vmatpush3.bf16.msra.mxu0 %v5762_v24  ;;  %v5799_v24 = vld [vmem:[%s7093_s1 + $0xc30] sm:$0xff]  }
 0x168   :  { %5290 = vmatprep.subr.bf16.mxu0 %v5765_v27 }
 0x169   :  { %5311 = vmatpush3.bf16.msra.mxu1 %v5764_v26  ;;  %v5801_v26 = vld [vmem:[%s7094_s0 + $0xc0] ss:$0 sps:$4 sm:$0xff]  }
 0x16a   :  { %5312 = vmatprep.subr.bf16.mxu1 %v5767_v29 }
 0x16b   :  { %5291 = vmatpush3.bf16.msra.mxu0 %v5766_v28 }
 0x16c   :  { %5292 = vmatprep.subr.bf16.mxu0 %v5769_v31 }
 0x16d   :  { %5313 = vmatpush3.bf16.msra.mxu1 %v5768_v30 }
 0x16e   :  { %5314 = vmatprep.subr.bf16.mxu1 %v5771_v33 }
 0x16f   :  { %5293 = vmatpush3.bf16.msra.mxu0 %v5770_v32 }
 0x170   :  { %5294 = vmatprep.subr.bf16.mxu0 %v5773_v35 }
 0x171   :  { %5315 = vmatpush3.bf16.msra.mxu1 %v5772_v34 }
 0x172   :  { %5316 = vmatprep.subr.bf16.mxu1 %v5775_v39 }
 0x173   :  { %5295 = vmatpush3.bf16.msra.mxu0 %v5774_v37 }
 0x174   :  { %5296 = vmatprep.subr.bf16.mxu0 %v5777_v45 }
 0x175   :  { %v4994_v36 = vpop.f32.mrb[16].mxu0  ;;  %5317 = vmatpush3.bf16.msra.mxu1 %v5776_v42 }
 0x176   :  { %v4995_v38 = vpop.f32.mrb[17].mxu0  ;;  %5318 = vmatprep.subr.bf16.mxu1 %v5779_v50 }
 0x177   :  { %v4996_v40 = vadd.f32 %v4995_v38, %v4994_v36  ;;  %v4997_v41 = vpop.f32.mrb[18].mxu0  ;;  %v5016_v43 = vpop.f32.mrb[16].mxu1  ;;  %5297 = vmatpush3.bf16.msra.mxu0 %v5778_v47 }
 0x178   :  { %v4998_v46 = vpop.f32.mrb[19].mxu0  ;;  %v5017_v48 = vpop.f32.mrb[17].mxu1  ;;  %5298 = vmatprep.subr.bf16.mxu0 %v5781_v55 }
 0x179   :  { %v3710_v44 = vadd.f32 %v4996_v40, %v6931_v5  ;;  %v5018_v49 = vadd.f32 %v5017_v48, %v5016_v43  ;;  %v5019_v51 = vpop.f32.mrb[18].mxu1  ;;  %5319 = vmatpush3.bf16.msra.mxu1 %v5780_v52  ;;  %v4408_v5 = vcombine.high %v38_v3, %v38_v3 }
 0x17a   :  { %v5020_v53 = vpop.f32.mrb[19].mxu1  ;;  %5320 = vmatprep.subr.bf16.mxu1 %v5783_v57 }
 0x17b   :  { %v3750_v54 = vadd.f32 %v5018_v49, %v3710_v44  ;;  %5299 = vmatpush3.bf16.msra.mxu0 %v5782_v56  ;;  %4307 = vmatprep.mubr.bf16.mxu1 %v4408_v5 }
 0x17c   :  { %5300 = vmatprep.subr.bf16.mxu0 %v5785_v59 }
 0x17d   :  { %5321 = vmatpush3.bf16.msra.mxu1 %v5784_v58 }
 0x17e   :  { %5322 = vmatprep.subr.bf16.mxu1 %v5787_v61 }
 0x17f   :  { %5301 = vmatpush3.bf16.msra.mxu0 %v5786_v60 }
 0x180   :  { %5339 = vmatprep.subr.bf16.mxu0 %v5802_v2 }
 0x181   :  { %5323 = vmatpush3.bf16.msra.mxu1 %v5790_v1 }
 0x182   :  { %4268 = vmatmul.mubr.bf16.vlgmr.msra.gmra.mrb[44].mxu0 %v4405_v63 }
 0x183   :  { %5340 = vmatpush3.bf16.msra.mxu0 %v5793_v6  ;;  %5355 = vmatprep.mubr.msk.bf16.mxu0 %vm5803_vm0, %v5802_v2 }
 0x184   :  { %4308 = vmatmul.mubr.bf16.vlgmr.msra.gmra.mrb[44].mxu1 %v4407_v4  ;;  %5341 = vmatprep.subr.bf16.mxu0 %v5802_v2 }
 0x187   :  { %5342 = vmatpush3.bf16.msra.mxu0 %v5794_v7 }
 0x188   :  { %5343 = vmatprep.subr.bf16.mxu0 %v5802_v2 }
 0x18b   :  { %5344 = vmatpush3.bf16.msra.mxu0 %v5795_v8 }
 0x18c   :  { %5345 = vmatprep.subr.bf16.mxu0 %v5802_v2 }
 0x18f   :  { %5346 = vmatpush3.bf16.msra.mxu0 %v5796_v9 }
 0x190   :  { %5347 = vmatprep.subr.bf16.mxu0 %v5802_v2 }
 0x193   :  { %5348 = vmatpush3.bf16.msra.mxu0 %v5797_v10 }
 0x194   :  { %5349 = vmatprep.subr.bf16.mxu0 %v5802_v2 }
 0x195   :  { %v5038_v11 = vpop.f32.mrb[20].mxu0 }
 0x196   :  { %v5039_v12 = vpop.f32.mrb[21].mxu0 }
 0x197   :  { %v5040_v13 = vadd.f32 %v5039_v12, %v5038_v11  ;;  %v5041_v14 = vpop.f32.mrb[22].mxu0  ;;  %v5060_v15 = vpop.f32.mrb[20].mxu1  ;;  %5350 = vmatpush3.bf16.msra.mxu0 %v5798_v16 }
 0x198   :  { %v5042_v17 = vpop.f32.mrb[23].mxu0  ;;  %v5061_v18 = vpop.f32.mrb[21].mxu1  ;;  %5351 = vmatprep.subr.bf16.mxu0 %v5802_v2 }
 0x199   :  { %v3790_v19 = vadd.f32 %v5040_v13, %v3750_v54  ;;  %v5062_v20 = vadd.f32 %v5061_v18, %v5060_v15  ;;  %v5063_v21 = vpop.f32.mrb[22].mxu1 }
 0x19a   :  { %v5064_v22 = vpop.f32.mrb[23].mxu1 }
 0x19b   :  { %v3830_v23 = vadd.f32 %v5062_v20, %v3790_v19  ;;  %5352 = vmatpush3.bf16.msra.mxu0 %v5799_v24 }
 0x19c   :  { %5353 = vmatprep.subr.bf16.mxu0 %v5802_v2 }
 0x19f   :  { %5354 = vmatpush3.bf16.msra.mxu0 %v5800_v25 }
 0x1a2   :  { %5356 = vmatmul.mubr.bf16.vlgmr.msra.gmra.mrb[48].mxu0 %v5801_v26 }
 0x1b5   :  { %v5082_v27 = vpop.f32.mrb[24].mxu0 }
 0x1b6   :  { %v5083_v28 = vpop.f32.mrb[25].mxu0 }
 0x1b7   :  { %v5084_v29 = vadd.f32 %v5083_v28, %v5082_v27  ;;  %v5085_v30 = vpop.f32.mrb[26].mxu0  ;;  %v5104_v31 = vpop.f32.mrb[24].mxu1 }
 0x1b8   :  { %v5086_v32 = vpop.f32.mrb[27].mxu0  ;;  %v5105_v33 = vpop.f32.mrb[25].mxu1 }
 0x1b9   :  { %v3870_v34 = vadd.f32 %v5084_v29, %v3830_v23  ;;  %v5106_v35 = vadd.f32 %v5105_v33, %v5104_v31  ;;  %v5107_v36 = vpop.f32.mrb[26].mxu1 }
 0x1ba   :  { %v5108_v37 = vpop.f32.mrb[27].mxu1 }
 0x1bb   :  { %v3910_v38 = vadd.f32 %v5106_v35, %v3870_v34 }
 0x1d5   :  { %v5126_v39 = vpop.f32.mrb[28].mxu0 }
 0x1d6   :  { %v5127_v40 = vpop.f32.mrb[29].mxu0 }
 0x1d7   :  { %v5128_v41 = vadd.f32 %v5127_v40, %v5126_v39  ;;  %v5129_v42 = vpop.f32.mrb[30].mxu0  ;;  %v5148_v43 = vpop.f32.mrb[28].mxu1 }
 0x1d8   :  { %v5130_v44 = vpop.f32.mrb[31].mxu0  ;;  %v5149_v45 = vpop.f32.mrb[29].mxu1 }
 0x1d9   :  { %v3950_v46 = vadd.f32 %v5128_v41, %v3910_v38  ;;  %v5150_v47 = vadd.f32 %v5149_v45, %v5148_v43  ;;  %v5151_v48 = vpop.f32.mrb[30].mxu1 }
 0x1da   :  { %v5152_v49 = vpop.f32.mrb[31].mxu1 }
 0x1db   :  { %v3990_v50 = vadd.f32 %v5150_v47, %v3950_v46 }
 0x1f5   :  { %v5170_v51 = vpop.f32.mrb[32].mxu0 }
 0x1f6   :  { %v5171_v52 = vpop.f32.mrb[33].mxu0 }
 0x1f7   :  { %v5172_v53 = vadd.f32 %v5171_v52, %v5170_v51  ;;  %v5173_v54 = vpop.f32.mrb[34].mxu0  ;;  %v5192_v55 = vpop.f32.mrb[32].mxu1 }
 0x1f8   :  { %v5174_v56 = vpop.f32.mrb[35].mxu0  ;;  %v5193_v58 = vpop.f32.mrb[33].mxu1 }
 0x1f9   :  { %v4030_v57 = vadd.f32 %v5172_v53, %v3990_v50  ;;  %v5194_v59 = vadd.f32 %v5193_v58, %v5192_v55  ;;  %v5195_v60 = vpop.f32.mrb[34].mxu1 }
 0x1fa   :  { %v5196_v61 = vpop.f32.mrb[35].mxu1 }
 0x1fb   :  { %v4070_v62 = vadd.f32 %v5194_v59, %v4030_v57 }
 0x215   :  { %v5214_v63 = vpop.f32.mrb[36].mxu0 }
 0x216   :  { %v5215_v0 = vpop.f32.mrb[37].mxu0 }
 0x217   :  { %v5216_v1 = vadd.f32 %v5215_v0, %v5214_v63  ;;  %v5217_v2 = vpop.f32.mrb[38].mxu0  ;;  %v5236_v3 = vpop.f32.mrb[36].mxu1 }
 0x218   :  { %v5218_v4 = vpop.f32.mrb[39].mxu0  ;;  %v5237_v5 = vpop.f32.mrb[37].mxu1 }
 0x219   :  { %v4110_v6 = vadd.f32 %v5216_v1, %v4070_v62  ;;  %v5238_v7 = vadd.f32 %v5237_v5, %v5236_v3  ;;  %v5239_v8 = vpop.f32.mrb[38].mxu1 }
 0x21a   :  { %v5240_v9 = vpop.f32.mrb[39].mxu1 }
 0x21b   :  { %v4150_v10 = vadd.f32 %v5238_v7, %v4110_v6 }
 0x235   :  { %v5258_v11 = vpop.f32.mrb[40].mxu0 }
 0x236   :  { %v5259_v12 = vpop.f32.mrb[41].mxu0 }
 0x237   :  { %v5260_v13 = vadd.f32 %v5259_v12, %v5258_v11  ;;  %v5261_v14 = vpop.f32.mrb[42].mxu0  ;;  %v5280_v15 = vpop.f32.mrb[40].mxu1 }
 0x238   :  { %v5262_v16 = vpop.f32.mrb[43].mxu0  ;;  %v5281_v17 = vpop.f32.mrb[41].mxu1 }
 0x239   :  { %v4190_v18 = vadd.f32 %v5260_v13, %v4150_v10  ;;  %v5282_v19 = vadd.f32 %v5281_v17, %v5280_v15  ;;  %v5283_v20 = vpop.f32.mrb[42].mxu1 }
 0x23a   :  { %v5284_v21 = vpop.f32.mrb[43].mxu1 }
 0x23b   :  { %v4230_v22 = vadd.f32 %v5282_v19, %v4190_v18 }
 0x255   :  { %v5302_v23 = vpop.f32.mrb[44].mxu0 }
 0x256   :  { %v5303_v24 = vpop.f32.mrb[45].mxu0 }
 0x257   :  { %v5304_v25 = vadd.f32 %v5303_v24, %v5302_v23  ;;  %v5305_v26 = vpop.f32.mrb[46].mxu0  ;;  %v5324_v27 = vpop.f32.mrb[44].mxu1 }
 0x258   :  { %v5306_v28 = vpop.f32.mrb[47].mxu0  ;;  %v5325_v29 = vpop.f32.mrb[45].mxu1 }
 0x259   :  { %v4270_v30 = vadd.f32 %v5304_v25, %v4230_v22  ;;  %v5326_v31 = vadd.f32 %v5325_v29, %v5324_v27  ;;  %v5327_v32 = vpop.f32.mrb[46].mxu1 }
 0x25a   :  { %v5328_v33 = vpop.f32.mrb[47].mxu1 }
 0x25b   :  { %v4310_v34 = vadd.f32 %v5326_v31, %v4270_v30 }
 0x275   :  { %v4349_v35 = vpop.f32.mrb[48].mxu0 }
 0x276   :  { %v4350_v36 = vadd.f32 %v4349_v35, %v4310_v34  ;;  %v5357_v37 = vpop.f32.mrb[49].mxu0 }
 0x277   :  { %v4352_v38 = vpop.f32.mrb[50].mxu0 }
 0x278   :  { %4355 = vst [vmem:[%s7096_s3] sm:$0xff] %v4350_v36  ;;  %v5358_v39 = vpop.f32.mrb[51].mxu0 }

</bundles_post_ra>
